<compile_context>
chip_gen: v7x
topology: tpu7x:2x2x1
jax: 0.10.0
libtpu: 0.0.40
codegen_flags: <defaults>
</compile_context>

<pallas_src>
import jax
import jax.numpy as jnp
from jax import lax
from jax.experimental import pallas as pl
from jax.experimental.pallas import tpu as pltpu

_VMEM_LIMIT = 32 * 1024 * 1024  # well within v5e/v6e (128 MiB) and v7x (64 MiB)


def _pick_tm(m, max_tm=576):
    """Row-tile: full if small; else a multiple-of-8 divisor <= max_tm, preferring an
    even chunk count (balanced 2-TensorCore split on v7x) and bounded VMEM blocks."""
    if m <= max_tm:
        return m
    for t in range(max_tm, 7, -8):
        if m % t == 0 and (m // t) % 2 == 0:
            return t
    for t in range(max_tm, 7, -8):
        if m % t == 0:
            return t
    return m


# ------------------- fused conv(5x5, s2) + bias + ReLU + maxpool(2x2, s2) ------------------- #

def _conv_relu_maxpool_kernel(p_ref, w_ref, b_ref, o_ref):
    # Grid = (row_chunks, 4 pool phases). Phase axis is innermost / "arbitrary";
    # the output block stays resident and is max-accumulated across phases.
    q = pl.program_id(1)
    y = jnp.dot(p_ref[...], w_ref[...], preferred_element_type=jnp.float32)
    y = jnp.maximum(y + b_ref[...], 0.0)

    @pl.when(q == 0)
    def _():
        o_ref[...] = y

    @pl.when(q > 0)
    def _():
        o_ref[...] = jnp.maximum(o_ref[...], y)


def _im2col_pool_phases(x_nhwc, k_pad):
    """Phase-grouped im2col for conv(5x5, stride 2) followed by maxpool(2x2, stride 2).

    Returns (4, N*Hp*Wp, k_pad). Phase q = 2*ph + pw holds the patches of conv-output
    position (2*hp + ph, 2*wp + pw); patch columns are ordered (kh, kw, c).
    """
    n, h, w, c = x_nhwc.shape
    ho, wo = (h - 5) // 2 + 1, (w - 5) // 2 + 1
    hp, wp = ho // 2, wo // 2
    k = 25 * c
    phases = []
    for ph in range(2):
        for pw in range(2):
            cols = []
            for kh in range(5):
                for kw in range(5):
                    r0 = 2 * ph + kh          # input row = 4*hp + 2*ph + kh
                    c0 = 2 * pw + kw          # input col = 4*wp + 2*pw + kw
                    cols.append(x_nhwc[:, r0:r0 + 4 * (hp - 1) + 1:4,
                                       c0:c0 + 4 * (wp - 1) + 1:4, :])
            p = jnp.stack(cols, axis=3)                     # (N, Hp, Wp, 25, C)
            phases.append(p.reshape(n * hp * wp, k))
    patches = jnp.stack(phases, axis=0)                     # (4, N*Hp*Wp, K)
    if k_pad != k:
        patches = jnp.pad(patches, ((0, 0), (0, 0), (0, k_pad - k)))
    return patches, hp, wp


def conv5x5s2_relu_pool2(x_nhwc, w, b, cout_pad=128):
    """x: (N, H, W, Cin) NHWC; w: (Cout, Cin, 5, 5) OIHW (PyTorch); returns pooled NHWC."""
    n, h, wd, cin = x_nhwc.shape
    cout = w.shape[0]
    k = 25 * cin
    k_pad = ((k + 7) // 8) * 8

    patches, hp, wp = _im2col_pool_phases(x_nhwc, k_pad)    # (4, M, Kp)
    # Weight rows ordered (kh, kw, c) to match the patch columns; pad to (Kp, 128).
    w2 = w.transpose(2, 3, 1, 0).reshape(k, cout)
    w2 = jnp.pad(w2, ((0, k_pad - k), (0, cout_pad - cout)))
    b2 = jnp.pad(b, (0, cout_pad - cout)).reshape(1, cout_pad)

    m = n * hp * wp
    tm = _pick_tm(m)
    out = pl.pallas_call(
        _conv_relu_maxpool_kernel,
        out_shape=jax.ShapeDtypeStruct((m, cout_pad), jnp.float32),
        grid_spec=pltpu.PrefetchScalarGridSpec(
            num_scalar_prefetch=0,
            grid=(m // tm, 4),
            in_specs=[
                pl.BlockSpec((None, tm, k_pad), lambda i, q: (q, i, 0)),
                pl.BlockSpec((k_pad, cout_pad), lambda i, q: (0, 0)),
                pl.BlockSpec((1, cout_pad), lambda i, q: (0, 0)),
            ],
            out_specs=pl.BlockSpec((tm, cout_pad), lambda i, q: (i, 0)),
        ),
        compiler_params=pltpu.CompilerParams(
            dimension_semantics=("parallel", "arbitrary"),
            vmem_limit_bytes=_VMEM_LIMIT,
        ),
    )(patches, w2, b2)
    return out.reshape(n, hp, wp, cout_pad)[..., :cout]     # drop zero-padded channels


# ----------------------- fused classifier: fc1+ReLU, fc2+ReLU, fc3+Sigmoid ----------------------- #

def _fc_stack_kernel(x_ref, w1_ref, b1_ref, w2_ref, b2_ref, w3_ref, b3_ref, o_ref):
    h = jnp.dot(x_ref[...], w1_ref[...], preferred_element_type=jnp.float32)
    h = jnp.maximum(h + b1_ref[...], 0.0)
    h = jnp.dot(h, w2_ref[...], preferred_element_type=jnp.float32)
    h = jnp.maximum(h + b2_ref[...], 0.0)
    y = jnp.dot(h, w3_ref[...], preferred_element_type=jnp.float32) + b3_ref[...]
    o_ref[...] = jax.nn.sigmoid(y).astype(o_ref.dtype)


def classifier(params, x, n_classes):
    bsz = x.shape[0]
    n_pad = ((n_classes + 127) // 128) * 128                # lane-dense final matmul/store
    w3 = jnp.pad(params["fc3_w"].T, ((0, 0), (0, n_pad - n_classes)))
    b3 = jnp.pad(params["fc3_b"], (0, n_pad - n_classes)).reshape(1, n_pad)
    vmem_spec = pl.BlockSpec(memory_space=pltpu.MemorySpace.VMEM)
    out = pl.pallas_call(
        _fc_stack_kernel,
        out_shape=jax.ShapeDtypeStruct((bsz, n_pad), jnp.float32),
        in_specs=[vmem_spec] * 7,
        out_specs=vmem_spec,
        compiler_params=pltpu.CompilerParams(vmem_limit_bytes=_VMEM_LIMIT),
    )(x, params["fc1_w"].T, params["fc1_b"].reshape(1, -1),
      params["fc2_w"].T, params["fc2_b"].reshape(1, -1), w3, b3)
    return out[:, :n_classes]


# ----------------------------------------- model ----------------------------------------- #

def init_params(key, n_classes, ndf=64, w_out=5, h_out=5):
    ks = jax.random.split(key, 10)

    def lin(kw, kb, fin, fout):
        w = jax.random.normal(kw, (fout, fin), jnp.float32) / jnp.sqrt(float(fin))
        b = jax.random.normal(kb, (fout,), jnp.float32) * 0.01
        return w, b

    p = {}
    p["conv1_w"] = jax.random.normal(ks[0], (ndf, 3, 5, 5), jnp.float32) / jnp.sqrt(3.0 * 25)
    p["conv1_b"] = jax.random.normal(ks[1], (ndf,), jnp.float32) * 0.01
    p["conv2_w"] = jax.random.normal(ks[2], (ndf, ndf, 5, 5), jnp.float32) / jnp.sqrt(64.0 * 25)
    p["conv2_b"] = jax.random.normal(ks[3], (ndf,), jnp.float32) * 0.01
    p["fc1_w"], p["fc1_b"] = lin(ks[4], ks[5], ndf * w_out * h_out, 384)
    p["fc2_w"], p["fc2_b"] = lin(ks[6], ks[7], 384, 384)
    p["fc3_w"], p["fc3_b"] = lin(ks[8], ks[9], 384, n_classes)
    return p


def lfw_convnet_forward(params, x, ndf=64, w_out=5, h_out=5):
    """x: (N, 3, H, W) NCHW like PyTorch. Internally NHWC (channels on the lane dim)."""
    n = x.shape[0]
    n_classes = params["fc3_w"].shape[0]
    x = x.transpose(0, 2, 3, 1)                                        # NCHW -> NHWC
    x = conv5x5s2_relu_pool2(x, params["conv1_w"], params["conv1_b"])  # (N, 24, 24, 64)
    x = conv5x5s2_relu_pool2(x, params["conv2_w"], params["conv2_b"])  # (N, 5, 5, 64)
    # View(-1, ndf*w_out*h_out) flattens NCHW (c, h, w) contiguously.
    x = x.transpose(0, 3, 1, 2).reshape(n, ndf * w_out * h_out)
    return classifier(params, x, n_classes)


# ----------------------------------- pure-JAX reference ----------------------------------- #

def reference_forward(params, x, ndf=64, w_out=5, h_out=5):
    def conv(x, w, b):
        y = lax.conv_general_dilated(x, w, (2, 2), "VALID",
                                     dimension_numbers=("NCHW", "OIHW", "NCHW"))
        return jax.nn.relu(y + b[None, :, None, None])

    def pool(x):
        return lax.reduce_window(x, -jnp.inf, lax.max, (1, 1, 2, 2), (1, 1, 2, 2), "VALID")

    x = pool(conv(x, params["conv1_w"], params["conv1_b"]))
    x = pool(conv(x, params["conv2_w"], params["conv2_b"]))
    x = x.reshape(-1, ndf * w_out * h_out)
    x = jax.nn.relu(x @ params["fc1_w"].T + params["fc1_b"])
    x = jax.nn.relu(x @ params["fc2_w"].T + params["fc2_b"])
    return jax.nn.sigmoid(x @ params["fc3_w"].T + params["fc3_b"])


if __name__ == "__main__":
    key = jax.random.PRNGKey(0)
    k_x, k_p = jax.random.split(key)
    n_classes = 8
    # 100x100 input: conv(5,s2)->48, pool->24, conv(5,s2)->10, pool->5  => 64*5*5 = 1600 features.
    x = jax.random.normal(k_x, (2, 3, 100, 100), jnp.float32)
    params = init_params(k_p, n_classes)

    forward = jax.jit(lfw_convnet_forward)
    out = jax.block_until_ready(forward(params, x))
    assert out.shape == (2, n_classes), out.shape
    assert bool(jnp.all(jnp.isfinite(out)))

    ref = jax.block_until_ready(reference_forward(params, x))
    err = float(jnp.max(jnp.abs(out - ref)))
    assert jnp.allclose(out, ref, atol=1e-4), err

    print("KERNEL_OK")
</pallas_src>

<mosaic_0001>
module attributes {stable_mosaic.version = 11 : i64} {
  func.func @_conv_relu_maxpool_kernel(%arg0: i32, %arg1: i32, %arg2: memref<1x576x80xf32, #tpu.memory_space<vmem>>, %arg3: memref<80x128xf32, #tpu.memory_space<vmem>>, %arg4: memref<1x128xf32, #tpu.memory_space<vmem>>, %arg5: memref<576x128xf32, #tpu.memory_space<vmem>>) attributes {dimension_semantics = [#tpu.dimension_semantics<parallel>, #tpu.dimension_semantics<arbitrary>], iteration_bounds = array<i64: 2, 4>, scalar_prefetch = 0 : i64, scratch_operands = 0 : i64, tpu.core_type = #tpu.core_type<tc>, window_params = [{transform_indices = @transform_0, window_bounds = array<i64: 1, 576, 80>}, {pipeline_mode = #tpu.pipeline_mode<synchronous>, transform_indices = @transform_1, window_bounds = array<i64: 80, 128>}, {pipeline_mode = #tpu.pipeline_mode<synchronous>, transform_indices = @transform_2, window_bounds = array<i64: 1, 128>}, {transform_indices = @transform_3, window_bounds = array<i64: 576, 128>}]} {
    %c0 = arith.constant 0 : index
    %c0_0 = arith.constant 0 : index
    %c0_1 = arith.constant 0 : index
    %0 = vector.load %arg2[%c0, %c0_0, %c0_1] : memref<1x576x80xf32, #tpu.memory_space<vmem>>, vector<1x576x80xf32>
    %1 = vector.shape_cast %0 : vector<1x576x80xf32> to vector<576x80xf32>
    %c0_2 = arith.constant 0 : index
    %c0_3 = arith.constant 0 : index
    %2 = vector.load %arg3[%c0_2, %c0_3] : memref<80x128xf32, #tpu.memory_space<vmem>>, vector<80x128xf32>
    %cst = arith.constant dense<0.000000e+00> : vector<576x128xf32>
    %3 = tpu.matmul %1, %2, %cst {dimension_numbers = #tpu.dot_dimension_numbers<[1], [0], [0], [1], [0, 0, 1, 1], [], []>} : vector<576x80xf32>, vector<80x128xf32>, vector<576x128xf32> -> vector<576x128xf32>
    %c0_4 = arith.constant 0 : index
    %c0_5 = arith.constant 0 : index
    %4 = vector.load %arg4[%c0_4, %c0_5] : memref<1x128xf32, #tpu.memory_space<vmem>>, vector<1x128xf32>
    %5 = vector.broadcast %4 : vector<1x128xf32> to vector<576x128xf32>
    %6 = arith.addf %3, %5 : vector<576x128xf32>
    %cst_6 = arith.constant 0.000000e+00 : f32
    %7 = vector.broadcast %cst_6 : f32 to vector<576x128xf32>
    %8 = arith.maximumf %6, %7 : vector<576x128xf32>
    %c0_i32 = arith.constant 0 : i32
    %9 = arith.cmpi eq, %arg1, %c0_i32 : i32
    %10 = arith.extui %9 : i1 to i32
    %c0_i32_7 = arith.constant 0 : i32
    %11 = arith.cmpi ne, %10, %c0_i32_7 : i32
    scf.if %11 {
      %c0_10 = arith.constant 0 : index
      %c0_11 = arith.constant 0 : index
      %15 = vector.load %arg5[%c0_10, %c0_11] : memref<576x128xf32, #tpu.memory_space<vmem>>, vector<576x128xf32>
      tpu.vector_store %arg5[%c0_10, %c0_11], %8 {strides = array<i32>} : memref<576x128xf32, #tpu.memory_space<vmem>>, vector<576x128xf32>,
    } else {
    }
    %c0_i32_8 = arith.constant 0 : i32
    %12 = arith.cmpi sgt, %arg1, %c0_i32_8 : i32
    %13 = arith.extui %12 : i1 to i32
    %c0_i32_9 = arith.constant 0 : i32
    %14 = arith.cmpi ne, %13, %c0_i32_9 : i32
    scf.if %14 {
      %c0_10 = arith.constant 0 : index
      %c0_11 = arith.constant 0 : index
      %15 = vector.load %arg5[%c0_10, %c0_11] : memref<576x128xf32, #tpu.memory_space<vmem>>, vector<576x128xf32>
      %16 = arith.maximumf %15, %8 : vector<576x128xf32>
      %c0_12 = arith.constant 0 : index
      %c0_13 = arith.constant 0 : index
      %17 = vector.load %arg5[%c0_12, %c0_13] : memref<576x128xf32, #tpu.memory_space<vmem>>, vector<576x128xf32>
      tpu.vector_store %arg5[%c0_12, %c0_13], %16 {strides = array<i32>} : memref<576x128xf32, #tpu.memory_space<vmem>>, vector<576x128xf32>,
    } else {
    }
    return
  }
  func.func @transform_0(%arg0: i32, %arg1: i32) -> (i32, i32, i32) {
    %c0_i32 = arith.constant 0 : i32
    %c0_i32_0 = arith.constant 0 : i32
    return %arg1, %arg0, %c0_i32 : i32, i32, i32
  }
  func.func @transform_1(%arg0: i32, %arg1: i32) -> (i32, i32) {
    %c0_i32 = arith.constant 0 : i32
    %c0_i32_0 = arith.constant 0 : i32
    %c0_i32_1 = arith.constant 0 : i32
    return %c0_i32, %c0_i32_0 : i32, i32
  }
  func.func @transform_2(%arg0: i32, %arg1: i32) -> (i32, i32) {
    %c0_i32 = arith.constant 0 : i32
    %c0_i32_0 = arith.constant 0 : i32
    %c0_i32_1 = arith.constant 0 : i32
    return %c0_i32, %c0_i32_0 : i32, i32
  }
  func.func @transform_3(%arg0: i32, %arg1: i32) -> (i32, i32) {
    %c0_i32 = arith.constant 0 : i32
    %c0_i32_0 = arith.constant 0 : i32
    return %arg0, %c0_i32 : i32, i32
  }
}

module attributes {stable_mosaic.version = 11 : i64} {
  func.func @_conv_relu_maxpool_kernel(%arg0: i32, %arg1: i32, %arg2: memref<1x50x1600xf32, #tpu.memory_space<vmem>>, %arg3: memref<1600x128xf32, #tpu.memory_space<vmem>>, %arg4: memref<1x128xf32, #tpu.memory_space<vmem>>, %arg5: memref<50x128xf32, #tpu.memory_space<vmem>>) attributes {dimension_semantics = [#tpu.dimension_semantics<parallel>, #tpu.dimension_semantics<arbitrary>], iteration_bounds = array<i64: 1, 4>, scalar_prefetch = 0 : i64, scratch_operands = 0 : i64, tpu.core_type = #tpu.core_type<tc>, window_params = [{transform_indices = @transform_0, window_bounds = array<i64: 1, 50, 1600>}, {pipeline_mode = #tpu.pipeline_mode<synchronous>, transform_indices = @transform_1, window_bounds = array<i64: 1600, 128>}, {pipeline_mode = #tpu.pipeline_mode<synchronous>, transform_indices = @transform_2, window_bounds = array<i64: 1, 128>}, {transform_indices = @transform_3, window_bounds = array<i64: 50, 128>}]} {
    %c0 = arith.constant 0 : index
    %c0_0 = arith.constant 0 : index
    %c0_1 = arith.constant 0 : index
    %0 = vector.load %arg2[%c0, %c0_0, %c0_1] : memref<1x50x1600xf32, #tpu.memory_space<vmem>>, vector<1x50x1600xf32>
    %1 = vector.shape_cast %0 : vector<1x50x1600xf32> to vector<50x1600xf32>
    %c0_2 = arith.constant 0 : index
    %c0_3 = arith.constant 0 : index
    %2 = vector.load %arg3[%c0_2, %c0_3] : memref<1600x128xf32, #tpu.memory_space<vmem>>, vector<1600x128xf32>
    %cst = arith.constant dense<0.000000e+00> : vector<50x128xf32>
    %3 = tpu.matmul %1, %2, %cst {dimension_numbers = #tpu.dot_dimension_numbers<[1], [0], [0], [1], [0, 0, 1, 1], [], []>} : vector<50x1600xf32>, vector<1600x128xf32>, vector<50x128xf32> -> vector<50x128xf32>
    %c0_4 = arith.constant 0 : index
    %c0_5 = arith.constant 0 : index
    %4 = vector.load %arg4[%c0_4, %c0_5] : memref<1x128xf32, #tpu.memory_space<vmem>>, vector<1x128xf32>
    %5 = vector.broadcast %4 : vector<1x128xf32> to vector<50x128xf32>
    %6 = arith.addf %3, %5 : vector<50x128xf32>
    %cst_6 = arith.constant 0.000000e+00 : f32
    %7 = vector.broadcast %cst_6 : f32 to vector<50x128xf32>
    %8 = arith.maximumf %6, %7 : vector<50x128xf32>
    %c0_i32 = arith.constant 0 : i32
    %9 = arith.cmpi eq, %arg1, %c0_i32 : i32
    %10 = arith.extui %9 : i1 to i32
    %c0_i32_7 = arith.constant 0 : i32
    %11 = arith.cmpi ne, %10, %c0_i32_7 : i32
    scf.if %11 {
      %c0_10 = arith.constant 0 : index
      %c0_11 = arith.constant 0 : index
      %15 = vector.load %arg5[%c0_10, %c0_11] : memref<50x128xf32, #tpu.memory_space<vmem>>, vector<50x128xf32>
      tpu.vector_store %arg5[%c0_10, %c0_11], %8 {strides = array<i32>} : memref<50x128xf32, #tpu.memory_space<vmem>>, vector<50x128xf32>,
    } else {
    }
    %c0_i32_8 = arith.constant 0 : i32
    %12 = arith.cmpi sgt, %arg1, %c0_i32_8 : i32
    %13 = arith.extui %12 : i1 to i32
    %c0_i32_9 = arith.constant 0 : i32
    %14 = arith.cmpi ne, %13, %c0_i32_9 : i32
    scf.if %14 {
      %c0_10 = arith.constant 0 : index
      %c0_11 = arith.constant 0 : index
      %15 = vector.load %arg5[%c0_10, %c0_11] : memref<50x128xf32, #tpu.memory_space<vmem>>, vector<50x128xf32>
      %16 = arith.maximumf %15, %8 : vector<50x128xf32>
      %c0_12 = arith.constant 0 : index
      %c0_13 = arith.constant 0 : index
      %17 = vector.load %arg5[%c0_12, %c0_13] : memref<50x128xf32, #tpu.memory_space<vmem>>, vector<50x128xf32>
      tpu.vector_store %arg5[%c0_12, %c0_13], %16 {strides = array<i32>} : memref<50x128xf32, #tpu.memory_space<vmem>>, vector<50x128xf32>,
    } else {
    }
    return
  }
  func.func @transform_0(%arg0: i32, %arg1: i32) -> (i32, i32, i32) {
    %c0_i32 = arith.constant 0 : i32
    %c0_i32_0 = arith.constant 0 : i32
    return %arg1, %arg0, %c0_i32 : i32, i32, i32
  }
  func.func @transform_1(%arg0: i32, %arg1: i32) -> (i32, i32) {
    %c0_i32 = arith.constant 0 : i32
    %c0_i32_0 = arith.constant 0 : i32
    %c0_i32_1 = arith.constant 0 : i32
    return %c0_i32, %c0_i32_0 : i32, i32
  }
  func.func @transform_2(%arg0: i32, %arg1: i32) -> (i32, i32) {
    %c0_i32 = arith.constant 0 : i32
    %c0_i32_0 = arith.constant 0 : i32
    %c0_i32_1 = arith.constant 0 : i32
    return %c0_i32, %c0_i32_0 : i32, i32
  }
  func.func @transform_3(%arg0: i32, %arg1: i32) -> (i32, i32) {
    %c0_i32 = arith.constant 0 : i32
    %c0_i32_0 = arith.constant 0 : i32
    return %arg0, %c0_i32 : i32, i32
  }
}

module attributes {stable_mosaic.version = 11 : i64} {
  func.func @_fc_stack_kernel(%arg0: memref<2x1600xf32, #tpu.memory_space<vmem>>, %arg1: memref<1600x384xf32, #tpu.memory_space<vmem>>, %arg2: memref<1x384xf32, #tpu.memory_space<vmem>>, %arg3: memref<384x384xf32, #tpu.memory_space<vmem>>, %arg4: memref<1x384xf32, #tpu.memory_space<vmem>>, %arg5: memref<384x128xf32, #tpu.memory_space<vmem>>, %arg6: memref<1x128xf32, #tpu.memory_space<vmem>>, %arg7: memref<2x128xf32, #tpu.memory_space<vmem>>) attributes {dimension_semantics = [], scalar_prefetch = 0 : i64, scratch_operands = 0 : i64, tpu.core_type = #tpu.core_type<tc>} {
    %c0 = arith.constant 0 : index
    %c0_0 = arith.constant 0 : index
    %0 = vector.load %arg0[%c0, %c0_0] : memref<2x1600xf32, #tpu.memory_space<vmem>>, vector<2x1600xf32>
    %c0_1 = arith.constant 0 : index
    %c0_2 = arith.constant 0 : index
    %1 = vector.load %arg1[%c0_1, %c0_2] : memref<1600x384xf32, #tpu.memory_space<vmem>>, vector<1600x384xf32>
    %cst = arith.constant dense<0.000000e+00> : vector<2x384xf32>
    %2 = tpu.matmul %0, %1, %cst {dimension_numbers = #tpu.dot_dimension_numbers<[1], [0], [0], [1], [0, 0, 1, 1], [], []>} : vector<2x1600xf32>, vector<1600x384xf32>, vector<2x384xf32> -> vector<2x384xf32>
    %c0_3 = arith.constant 0 : index
    %c0_4 = arith.constant 0 : index
    %3 = vector.load %arg2[%c0_3, %c0_4] : memref<1x384xf32, #tpu.memory_space<vmem>>, vector<1x384xf32>
    %4 = vector.broadcast %3 : vector<1x384xf32> to vector<2x384xf32>
    %5 = arith.addf %2, %4 : vector<2x384xf32>
    %cst_5 = arith.constant 0.000000e+00 : f32
    %6 = vector.broadcast %cst_5 : f32 to vector<2x384xf32>
    %7 = arith.maximumf %5, %6 : vector<2x384xf32>
    %c0_6 = arith.constant 0 : index
    %c0_7 = arith.constant 0 : index
    %8 = vector.load %arg3[%c0_6, %c0_7] : memref<384x384xf32, #tpu.memory_space<vmem>>, vector<384x384xf32>
    %cst_8 = arith.constant dense<0.000000e+00> : vector<2x384xf32>
    %9 = tpu.matmul %7, %8, %cst_8 {dimension_numbers = #tpu.dot_dimension_numbers<[1], [0], [0], [1], [0, 0, 1, 1], [], []>} : vector<2x384xf32>, vector<384x384xf32>, vector<2x384xf32> -> vector<2x384xf32>
    %c0_9 = arith.constant 0 : index
    %c0_10 = arith.constant 0 : index
    %10 = vector.load %arg4[%c0_9, %c0_10] : memref<1x384xf32, #tpu.memory_space<vmem>>, vector<1x384xf32>
    %11 = vector.broadcast %10 : vector<1x384xf32> to vector<2x384xf32>
    %12 = arith.addf %9, %11 : vector<2x384xf32>
    %cst_11 = arith.constant 0.000000e+00 : f32
    %13 = vector.broadcast %cst_11 : f32 to vector<2x384xf32>
    %14 = arith.maximumf %12, %13 : vector<2x384xf32>
    %c0_12 = arith.constant 0 : index
    %c0_13 = arith.constant 0 : index
    %15 = vector.load %arg5[%c0_12, %c0_13] : memref<384x128xf32, #tpu.memory_space<vmem>>, vector<384x128xf32>
    %cst_14 = arith.constant dense<0.000000e+00> : vector<2x128xf32>
    %16 = tpu.matmul %14, %15, %cst_14 {dimension_numbers = #tpu.dot_dimension_numbers<[1], [0], [0], [1], [0, 0, 1, 1], [], []>} : vector<2x384xf32>, vector<384x128xf32>, vector<2x128xf32> -> vector<2x128xf32>
    %c0_15 = arith.constant 0 : index
    %c0_16 = arith.constant 0 : index
    %17 = vector.load %arg6[%c0_15, %c0_16] : memref<1x128xf32, #tpu.memory_space<vmem>>, vector<1x128xf32>
    %18 = vector.broadcast %17 : vector<1x128xf32> to vector<2x128xf32>
    %19 = arith.addf %16, %18 : vector<2x128xf32>
    %20 = arith.negf %19 : vector<2x128xf32>
    %21 = math.exp %20 : vector<2x128xf32>
    %cst_17 = arith.constant 1.000000e+00 : f32
    %22 = vector.broadcast %cst_17 : f32 to vector<2x128xf32>
    %23 = arith.addf %22, %21 : vector<2x128xf32>
    %24 = arith.divf %22, %23 : vector<2x128xf32>
    %c0_18 = arith.constant 0 : index
    %c0_19 = arith.constant 0 : index
    %25 = vector.load %arg7[%c0_18, %c0_19] : memref<2x128xf32, #tpu.memory_space<vmem>>, vector<2x128xf32>
    tpu.vector_store %arg7[%c0_18, %c0_19], %24 {strides = array<i32>} : memref<2x128xf32, #tpu.memory_space<vmem>>, vector<2x128xf32>,
    return
  }
}

</mosaic_0001>

<bundles_post_ra>
// kernel: lfw_convnet_forward.3
= control target key start
LH: loop header
LB: loop body
LE: loop exit
PB: predicated region body
PF: predicated region fallthrough
CT: control target
= control target key end

     0   :  { %s1798_s12 = smov 0   ;;  %s1800_s13 = smov 0   ;;  %s2833_s0 = inlined_call_operand.vmem [shape: f32[4,1152,80], index: 0, kind: input, shape index: {}]   ;;  %s2834_s1 = inlined_call_operand.vmem [shape: f32[80,128], index: 1, kind: input, shape index: {}]   ;;  %s2835_s2 = inlined_call_operand.vmem [shape: f32[1,128], index: 2, kind: input, shape index: {}]   ;;  %s2836_s3 = inlined_call_operand.vmem [shape: f32[1152,128], index: 3, kind: output, shape index: {}]  }
   0x1   :  { %s1802_s14 = smov 0   ;;  %s1804_s15 = smov 0  }
   0x2   :  { %s1806_s16 = smov 0  }
   0x3 LB: > { %s22_s17 = sadd.s32 1, %s1768_s14  ;;  %s25_s18 = sadd.s32 1, %s1772_s15  ;;  %s1776_s16 = sphi %s1806_s16, %s13_s16   ;;  %s1772_s15 = sphi %s1804_s15, %s3069_s15   ;;  %s1768_s14 = sphi %s1802_s14, %s3068_s14   ;;  %s1764_s13 = sphi %s1800_s13, %s3067_s13   ;;  %s1760_s12 = sphi %s1798_s12, %s3066_s12  }
   0x4   : > { %p23_p0 = scmp.ge.s32.totalorder %s22_s17, 4  ;;  %p1377_p1 = scmp.ge.s32.totalorder %s1776_s16, 1 }
   0x5   : > { %p156_p2 = scmp.lt.s32.totalorder %s1776_s16, 9 }
   0x6   : > { %s3071_s17 = smov (%p23_p0, %s22_s17), 0  ;;  %s3073_s18 = smov (!%p23_p0, %s25_s18), %s1772_s15 }
   0x7   : > { %p157_p3 = pnand %p1377_p1, %p156_p2  ;;  %p27_p4 = scmp.ge.s32.totalorder %s3073_s18, 2 }
   0x9   : > { %s3075_s18 = smov (%p27_p4, %s3073_s18), 0  ;;  %160 = sbr.rel (%p157_p3) target bundleno = 408 (0x198), region = 32 }
  0x10   : > { %v272_v0 = vld [vmem:[%s2834_s1] sm:$0xff]  ;;  %v273_v1 = vld [vmem:[%s2834_s1 + $0x8] sm:$0xff]  ;;  %v274_v2 = vld [vmem:[%s2834_s1 + $0x10] sm:$0xff]  ;;  %s184_s25 = smul.u32 72, %s1764_s13  ;;  %p185_p5 = scmp.lt.s32.totalorder %s1760_s12, 3  ;;  %vm289_vm0 = vcmask 654336  }
  0x11   : > { %v1667_v3 = vpack.c.bf16 %v273_v1, %v272_v0  ;;  %v275_v4 = vld [vmem:[%s2834_s1 + $0x18] sm:$0xff]  ;;  %v276_v6 = vld [vmem:[%s2834_s1 + $0x20] sm:$0xff]  ;;  %v277_v7 = vld [vmem:[%s2834_s1 + $0x28] sm:$0xff]  ;;  %p1453_p7 = scmp.ne.s32.totalorder %s1760_s12, 0 }
  0x12   : > { %v1671_v5 = vpack.c.bf16 %v275_v4, %v274_v2  ;;  %s186_s5 = scalar_select %p185_p5, %s1760_s12, 3  ;;  %v1675_v8 = vpack.c.bf16 %v277_v7, %v276_v6  ;;  %v278_v9 = vld [vmem:[%s2834_s1 + $0x30] sm:$0xff]  ;;  %v279_v10 = vld [vmem:[%s2834_s1 + $0x38] sm:$0xff]  ;;  %v280_v12 = vld [vmem:[%s2834_s1 + $0x40] sm:$0xff] }
  0x13   : > { %1668 = vmatprep.subr.bf16.mxu0 %v1667_v3  ;;  %1687 = vmatprep.subr.bf16.mxu1 %v1667_v3  ;;  %p187_p6 = scmp.lt.s32.totalorder %s184_s25, 143  ;;  %v1679_v11 = vpack.c.bf16 %v279_v10, %v278_v9  ;;  %v281_v13 = vld [vmem:[%s2834_s1 + $0x48] sm:$0xff] }
  0x14   : > { %1670 = vmatpush3.bf16.msra.mxu0 %v1667_v3  ;;  %1692 = vmatpush3.bf16.msra.mxu1 %v1667_v3  ;;  %s1697_s6 = smul.u32 144, %s186_s5  ;;  %v1683_v16 = vpack.c.bf16 %v281_v13, %v280_v12 }
  0x15   : > { %1672 = vmatprep.subr.bf16.mxu0 %v1671_v5  ;;  %1688 = vmatprep.subr.bf16.mxu1 %v1671_v5  ;;  %s3077_s25 = smov (!%p187_p6, %s184_s25), 143 }
  0x16   : > { %s190_s11 = sadd.s32 %s1697_s6, %s3077_s25  ;;  %s1379_s13 = sshll.u32 %s3077_s25, 3 }
  0x17   : > { %s1378_s19 = sshll.u32 %s190_s11, 3  ;;  %s1862_s22 = scalar_lea.vmem %s2836_s3, %s1379_s13 }
  0x18   : > { %1674 = vmatpush3.bf16.msra.mxu0 %v1671_v5  ;;  %1693 = vmatpush3.bf16.msra.mxu1 %v1671_v5  ;;  %s1870_s25 = scalar_lea.vmem %s2833_s0, %s1378_s19 }
  0x19   : > { %1676 = vmatprep.subr.bf16.mxu0 %v1675_v8  ;;  %1689 = vmatprep.subr.bf16.mxu1 %v1675_v8  ;;  %v200_v14 = vld [vmem:[%s1870_s25] sm:$0xff]  ;;  %v201_v17 = vld [vmem:[%s1870_s25 + $0x8] sm:$0xff]  ;;  %v202_v19 = vld [vmem:[%s1870_s25 + $0x10] sm:$0xff] }
  0x1a   : > { %v236_v15 = vld [vmem:[%s1870_s25 + $0x120] sm:$0xff]  ;;  %1559 = vmatprep.mubr.msk.f32.mxu0 %vm289_vm0, %v200_v14  ;;  %v237_v18 = vld [vmem:[%s1870_s25 + $0x128] sm:$0xff]  ;;  %v238_v20 = vld [vmem:[%s1870_s25 + $0x130] sm:$0xff] }
  0x1b   : > { %1613 = vmatprep.mubr.msk.f32.mxu1 %vm289_vm0, %v236_v15  ;;  %v203_v21 = vld [vmem:[%s1870_s25 + $0x18] sm:$0xff]  ;;  %v204_v23 = vld [vmem:[%s1870_s25 + $0x20] sm:$0xff]  ;;  %v205_v25 = vld [vmem:[%s1870_s25 + $0x28] sm:$0xff] }
  0x1c   : > { %1678 = vmatpush3.bf16.msra.mxu0 %v1675_v8  ;;  %1694 = vmatpush3.bf16.msra.mxu1 %v1675_v8  ;;  %v239_v22 = vld [vmem:[%s1870_s25 + $0x138] sm:$0xff]  ;;  %v240_v24 = vld [vmem:[%s1870_s25 + $0x140] sm:$0xff]  ;;  %v241_v26 = vld [vmem:[%s1870_s25 + $0x148] sm:$0xff] }
  0x1d   : > { %1680 = vmatprep.subr.bf16.mxu0 %v1679_v11  ;;  %1690 = vmatprep.subr.bf16.mxu1 %v1679_v11  ;;  %v206_v27 = vld [vmem:[%s1870_s25 + $0x30] sm:$0xff]  ;;  %v207_v29 = vld [vmem:[%s1870_s25 + $0x38] sm:$0xff]  ;;  %v208_v31 = vld [vmem:[%s1870_s25 + $0x40] sm:$0xff] }
  0x1e   : > { %v242_v28 = vld [vmem:[%s1870_s25 + $0x150] sm:$0xff]  ;;  %v243_v30 = vld [vmem:[%s1870_s25 + $0x158] sm:$0xff]  ;;  %v244_v32 = vld [vmem:[%s1870_s25 + $0x160] sm:$0xff] }
  0x1f   : > { %v209_v33 = vld [vmem:[%s1870_s25 + $0x48] sm:$0xff]  ;;  %v210_v35 = vld [vmem:[%s1870_s25 + $0x50] sm:$0xff]  ;;  %v211_v37 = vld [vmem:[%s1870_s25 + $0x58] sm:$0xff] }
  0x20   : > { %1682 = vmatpush3.bf16.msra.mxu0 %v1679_v11  ;;  %1695 = vmatpush3.bf16.msra.mxu1 %v1679_v11  ;;  %v245_v34 = vld [vmem:[%s1870_s25 + $0x168] sm:$0xff]  ;;  %v246_v36 = vld [vmem:[%s1870_s25 + $0x170] sm:$0xff]  ;;  %v247_v38 = vld [vmem:[%s1870_s25 + $0x178] sm:$0xff] }
  0x21   : > { %1684 = vmatprep.subr.bf16.mxu0 %v1683_v16  ;;  %1691 = vmatprep.subr.bf16.mxu1 %v1683_v16  ;;  %v212_v39 = vld [vmem:[%s1870_s25 + $0x60] sm:$0xff]  ;;  %v213_v41 = vld [vmem:[%s1870_s25 + $0x68] sm:$0xff]  ;;  %v214_v43 = vld [vmem:[%s1870_s25 + $0x70] sm:$0xff] }
  0x22   : > { %v248_v40 = vld [vmem:[%s1870_s25 + $0x180] sm:$0xff]  ;;  %v249_v42 = vld [vmem:[%s1870_s25 + $0x188] sm:$0xff]  ;;  %v250_v44 = vld [vmem:[%s1870_s25 + $0x190] sm:$0xff] }
  0x23   : > { %v215_v45 = vld [vmem:[%s1870_s25 + $0x78] sm:$0xff]  ;;  %v216_v47 = vld [vmem:[%s1870_s25 + $0x80] sm:$0xff]  ;;  %v217_v49 = vld [vmem:[%s1870_s25 + $0x88] sm:$0xff] }
  0x24   : > { %1686 = vmatpush3.bf16.msra.mxu0 %v1683_v16  ;;  %1696 = vmatpush3.bf16.msra.mxu1 %v1683_v16  ;;  %v251_v46 = vld [vmem:[%s1870_s25 + $0x198] sm:$0xff]  ;;  %v252_v48 = vld [vmem:[%s1870_s25 + $0x1a0] sm:$0xff]  ;;  %v253_v50 = vld [vmem:[%s1870_s25 + $0x1a8] sm:$0xff] }
  0x25   : > { %v218_v51 = vld [vmem:[%s1870_s25 + $0x90] sm:$0xff]  ;;  %v219_v53 = vld [vmem:[%s1870_s25 + $0x98] sm:$0xff]  ;;  %v220_v55 = vld [vmem:[%s1870_s25 + $0xa0] sm:$0xff] }
  0x26   : > { %v254_v52 = vld [vmem:[%s1870_s25 + $0x1b0] sm:$0xff]  ;;  %v255_v54 = vld [vmem:[%s1870_s25 + $0x1b8] sm:$0xff]  ;;  %v256_v56 = vld [vmem:[%s1870_s25 + $0x1c0] sm:$0xff] }
  0x27   : > { %1560 = vmatmul.mubr.msk.f32.vlgmr.msra.gmra.mrb[0].mxu0 %vm289_vm0, %v201_v17  ;;  %1614 = vmatmul.mubr.msk.f32.vlgmr.msra.gmra.mrb[0].mxu1 %vm289_vm0, %v237_v18  ;;  %v221_v57 = vld [vmem:[%s1870_s25 + $0xa8] sm:$0xff]  ;;  %v222_v59 = vld [vmem:[%s1870_s25 + $0xb0] sm:$0xff]  ;;  %v223_v61 = vld [vmem:[%s1870_s25 + $0xb8] sm:$0xff] }
  0x28   : > { %1562 = vmatprep.mubr.msk.f32.mxu0 %vm289_vm0, %v202_v19  ;;  %1616 = vmatprep.mubr.msk.f32.mxu1 %vm289_vm0, %v238_v20  ;;  %v257_v58 = vld [vmem:[%s1870_s25 + $0x1c8] sm:$0xff]  ;;  %v258_v60 = vld [vmem:[%s1870_s25 + $0x1d0] sm:$0xff]  ;;  %v259_v62 = vld [vmem:[%s1870_s25 + $0x1d8] sm:$0xff] }
  0x29   : > { %v224_v63 = vld [vmem:[%s1870_s25 + $0xc0] sm:$0xff]  ;;  %v225_v1 = vld [vmem:[%s1870_s25 + $0xc8] sm:$0xff]  ;;  %v226_v3 = vld [vmem:[%s1870_s25 + $0xd0] sm:$0xff] }
  0x2a   : > { %v260_v0 = vld [vmem:[%s1870_s25 + $0x1e0] sm:$0xff]  ;;  %v261_v2 = vld [vmem:[%s1870_s25 + $0x1e8] sm:$0xff]  ;;  %v262_v4 = vld [vmem:[%s1870_s25 + $0x1f0] sm:$0xff] }
  0x2b   : > { %1563 = vmatmul.mubr.msk.f32.gmra.mrb[2].mxu0 %vm289_vm0, %v203_v21  ;;  %1617 = vmatmul.mubr.msk.f32.gmra.mrb[2].mxu1 %vm289_vm0, %v239_v22  ;;  %v227_v5 = vld [vmem:[%s1870_s25 + $0xd8] sm:$0xff]  ;;  %v228_v7 = vld [vmem:[%s1870_s25 + $0xe0] sm:$0xff]  ;;  %v229_v9 = vld [vmem:[%s1870_s25 + $0xe8] sm:$0xff] }
  0x2c   : > { %1565 = vmatprep.mubr.msk.f32.mxu0 %vm289_vm0, %v204_v23  ;;  %1619 = vmatprep.mubr.msk.f32.mxu1 %vm289_vm0, %v240_v24  ;;  %v263_v6 = vld [vmem:[%s1870_s25 + $0x1f8] sm:$0xff]  ;;  %v264_v8 = vld [vmem:[%s1870_s25 + $0x200] sm:$0xff]  ;;  %v265_v10 = vld [vmem:[%s1870_s25 + $0x208] sm:$0xff] }
  0x2d   : > { %v230_v11 = vld [vmem:[%s1870_s25 + $0xf0] sm:$0xff]  ;;  %v231_v13 = vld [vmem:[%s1870_s25 + $0xf8] sm:$0xff]  ;;  %v232_v15 = vld [vmem:[%s1870_s25 + $0x100] sm:$0xff] }
  0x2e   : > { %v266_v12 = vld [vmem:[%s1870_s25 + $0x210] sm:$0xff]  ;;  %v267_v14 = vld [vmem:[%s1870_s25 + $0x218] sm:$0xff]  ;;  %v268_v16 = vld [vmem:[%s1870_s25 + $0x220] sm:$0xff] }
  0x2f   : > { %1566 = vmatmul.mubr.msk.f32.gmra.mrb[4].mxu0 %vm289_vm0, %v205_v25  ;;  %1620 = vmatmul.mubr.msk.f32.gmra.mrb[4].mxu1 %vm289_vm0, %v241_v26  ;;  %v233_v17 = vld [vmem:[%s1870_s25 + $0x108] sm:$0xff]  ;;  %v234_v19 = vld [vmem:[%s1870_s25 + $0x110] sm:$0xff]  ;;  %v235_v21 = vld [vmem:[%s1870_s25 + $0x118] sm:$0xff] }
  0x30   : > { %1568 = vmatprep.mubr.msk.f32.mxu0 %vm289_vm0, %v206_v27  ;;  %1622 = vmatprep.mubr.msk.f32.mxu1 %vm289_vm0, %v242_v28  ;;  %v269_v18 = vld [vmem:[%s1870_s25 + $0x228] sm:$0xff]  ;;  %v270_v20 = vld [vmem:[%s1870_s25 + $0x230] sm:$0xff]  ;;  %v271_v22 = vld [vmem:[%s1870_s25 + $0x238] sm:$0xff] }
  0x31   : > { %v2022_v23 = vld [vmem:[%s2835_s2] ss:$0 sm:$0xff] }
  0x33   : > { %1569 = vmatmul.mubr.msk.f32.gmra.mrb[6].mxu0 %vm289_vm0, %v207_v29  ;;  %1623 = vmatmul.mubr.msk.f32.gmra.mrb[6].mxu1 %vm289_vm0, %v243_v30 }
  0x34   : > { %1571 = vmatprep.mubr.msk.f32.mxu0 %vm289_vm0, %v208_v31  ;;  %1625 = vmatprep.mubr.msk.f32.mxu1 %vm289_vm0, %v244_v32 }
  0x37   : > { %1572 = vmatmul.mubr.msk.f32.gmra.mrb[8].mxu0 %vm289_vm0, %v209_v33  ;;  %1626 = vmatmul.mubr.msk.f32.gmra.mrb[8].mxu1 %vm289_vm0, %v245_v34 }
  0x38   : > { %1574 = vmatprep.mubr.msk.f32.mxu0 %vm289_vm0, %v210_v35  ;;  %1628 = vmatprep.mubr.msk.f32.mxu1 %vm289_vm0, %v246_v36 }
  0x3b   : > { %1575 = vmatmul.mubr.msk.f32.gmra.mrb[10].mxu0 %vm289_vm0, %v211_v37  ;;  %1629 = vmatmul.mubr.msk.f32.gmra.mrb[10].mxu1 %vm289_vm0, %v247_v38 }
  0x3c   : > { %1577 = vmatprep.mubr.msk.f32.mxu0 %vm289_vm0, %v212_v39  ;;  %1631 = vmatprep.mubr.msk.f32.mxu1 %vm289_vm0, %v248_v40 }
  0x3f   : > { %1578 = vmatmul.mubr.msk.f32.gmra.mrb[12].mxu0 %vm289_vm0, %v213_v41  ;;  %1632 = vmatmul.mubr.msk.f32.gmra.mrb[12].mxu1 %vm289_vm0, %v249_v42 }
  0x40   : > { %1580 = vmatprep.mubr.msk.f32.mxu0 %vm289_vm0, %v214_v43  ;;  %1634 = vmatprep.mubr.msk.f32.mxu1 %vm289_vm0, %v250_v44 }
  0x43   : > { %1581 = vmatmul.mubr.msk.f32.gmra.mrb[14].mxu0 %vm289_vm0, %v215_v45  ;;  %1635 = vmatmul.mubr.msk.f32.gmra.mrb[14].mxu1 %vm289_vm0, %v251_v46 }
  0x44   : > { %1583 = vmatprep.mubr.msk.f32.mxu0 %vm289_vm0, %v216_v47  ;;  %1637 = vmatprep.mubr.msk.f32.mxu1 %vm289_vm0, %v252_v48 }
  0x47   : > { %1584 = vmatmul.mubr.msk.f32.gmra.mrb[16].mxu0 %vm289_vm0, %v217_v49  ;;  %1638 = vmatmul.mubr.msk.f32.gmra.mrb[16].mxu1 %vm289_vm0, %v253_v50 }
  0x48   : > { %1586 = vmatprep.mubr.msk.f32.mxu0 %vm289_vm0, %v218_v51  ;;  %1640 = vmatprep.mubr.msk.f32.mxu1 %vm289_vm0, %v254_v52 }
  0x4b   : > { %1587 = vmatmul.mubr.msk.f32.gmra.mrb[18].mxu0 %vm289_vm0, %v219_v53  ;;  %1641 = vmatmul.mubr.msk.f32.gmra.mrb[18].mxu1 %vm289_vm0, %v255_v54 }
  0x4c   : > { %1589 = vmatprep.mubr.msk.f32.mxu0 %vm289_vm0, %v220_v55  ;;  %1643 = vmatprep.mubr.msk.f32.mxu1 %vm289_vm0, %v256_v56 }
  0x4f   : > { %1590 = vmatmul.mubr.msk.f32.gmra.mrb[20].mxu0 %vm289_vm0, %v221_v57  ;;  %1644 = vmatmul.mubr.msk.f32.gmra.mrb[20].mxu1 %vm289_vm0, %v257_v58 }
  0x50   : > { %1592 = vmatprep.mubr.msk.f32.mxu0 %vm289_vm0, %v222_v59  ;;  %1646 = vmatprep.mubr.msk.f32.mxu1 %vm289_vm0, %v258_v60 }
  0x53   : > { %1593 = vmatmul.mubr.msk.f32.gmra.mrb[22].mxu0 %vm289_vm0, %v223_v61  ;;  %1647 = vmatmul.mubr.msk.f32.gmra.mrb[22].mxu1 %vm289_vm0, %v259_v62 }
  0x54   : > { %1595 = vmatprep.mubr.msk.f32.mxu0 %vm289_vm0, %v224_v63  ;;  %1649 = vmatprep.mubr.msk.f32.mxu1 %vm289_vm0, %v260_v0 }
  0x57   : > { %1596 = vmatmul.mubr.msk.f32.gmra.mrb[24].mxu0 %vm289_vm0, %v225_v1  ;;  %1650 = vmatmul.mubr.msk.f32.gmra.mrb[24].mxu1 %vm289_vm0, %v261_v2 }
  0x58   : > { %1598 = vmatprep.mubr.msk.f32.mxu0 %vm289_vm0, %v226_v3  ;;  %1652 = vmatprep.mubr.msk.f32.mxu1 %vm289_vm0, %v262_v4 }
  0x5b   : > { %1599 = vmatmul.mubr.msk.f32.gmra.mrb[26].mxu0 %vm289_vm0, %v227_v5  ;;  %1653 = vmatmul.mubr.msk.f32.gmra.mrb[26].mxu1 %vm289_vm0, %v263_v6 }
  0x5c   : > { %1601 = vmatprep.mubr.msk.f32.mxu0 %vm289_vm0, %v228_v7  ;;  %1655 = vmatprep.mubr.msk.f32.mxu1 %vm289_vm0, %v264_v8 }
  0x5f   : > { %1602 = vmatmul.mubr.msk.f32.gmra.mrb[28].mxu0 %vm289_vm0, %v229_v9  ;;  %1656 = vmatmul.mubr.msk.f32.gmra.mrb[28].mxu1 %vm289_vm0, %v265_v10 }
  0x60   : > { %1604 = vmatprep.mubr.msk.f32.mxu0 %vm289_vm0, %v230_v11  ;;  %1658 = vmatprep.mubr.msk.f32.mxu1 %vm289_vm0, %v266_v12 }
  0x63   : > { %1605 = vmatmul.mubr.msk.f32.gmra.mrb[30].mxu0 %vm289_vm0, %v231_v13  ;;  %1659 = vmatmul.mubr.msk.f32.gmra.mrb[30].mxu1 %vm289_vm0, %v267_v14 }
  0x64   : > { %1607 = vmatprep.mubr.msk.f32.mxu0 %vm289_vm0, %v232_v15  ;;  %1661 = vmatprep.mubr.msk.f32.mxu1 %vm289_vm0, %v268_v16 }
  0x67   : > { %1608 = vmatmul.mubr.msk.f32.gmra.mrb[32].mxu0 %vm289_vm0, %v233_v17  ;;  %1662 = vmatmul.mubr.msk.f32.gmra.mrb[32].mxu1 %vm289_vm0, %v269_v18 }
  0x68   : > { %1610 = vmatprep.mubr.msk.f32.mxu0 %vm289_vm0, %v234_v19  ;;  %1664 = vmatprep.mubr.msk.f32.mxu1 %vm289_vm0, %v270_v20 }
  0x6b   : > { %1611 = vmatmul.mubr.msk.f32.gmra.mrb[34].mxu0 %vm289_vm0, %v235_v21  ;;  %1665 = vmatmul.mubr.msk.f32.gmra.mrb[34].mxu1 %vm289_vm0, %v271_v22 }
  0xfa   : > { %v1561_v24 = vpop.f32.mrb[0].mxu0  ;;  %v1615_v25 = vpop.f32.mrb[0].mxu1 }
  0xfb   : > { %v2025_v26 = vadd.f32 %v1561_v24, %v2022_v23  ;;  %v2028_v27 = vadd.f32 %v1615_v25, %v2022_v23  ;;  %v572_v28 = vpop.f32.mrb[1].mxu0  ;;  %v752_v29 = vpop.f32.mrb[1].mxu1 }
  0xfc   : > { %v2031_v30 = vadd.f32 %v2022_v23, %v572_v28  ;;  %v2034_v31 = vadd.f32 %v2022_v23, %v752_v29 }
  0xfe   : > { %v1564_v36 = vpop.f32.mrb[2].mxu0  ;;  %v1618_v37 = vpop.f32.mrb[2].mxu1 }
  0xff   : > { %v2041_v38 = vadd.f32 %v1564_v36, %v2022_v23  ;;  %v2044_v39 = vadd.f32 %v1618_v37, %v2022_v23  ;;  %v582_v40 = vpop.f32.mrb[3].mxu0  ;;  %v762_v41 = vpop.f32.mrb[3].mxu1 }
 0x100   : > { %v2047_v42 = vadd.f32 %v2022_v23, %v582_v40  ;;  %v2050_v43 = vadd.f32 %v2022_v23, %v762_v41 }
 0x102   : > { %v1567_v48 = vpop.f32.mrb[4].mxu0  ;;  %v1621_v49 = vpop.f32.mrb[4].mxu1 }
 0x103   : > { %v2057_v50 = vadd.f32 %v1567_v48, %v2022_v23  ;;  %v2060_v51 = vadd.f32 %v1621_v49, %v2022_v23  ;;  %v592_v52 = vpop.f32.mrb[5].mxu0  ;;  %v772_v53 = vpop.f32.mrb[5].mxu1 }
 0x104   : > { %v2063_v54 = vadd.f32 %v2022_v23, %v592_v52  ;;  %v2066_v55 = vadd.f32 %v2022_v23, %v772_v53 }
 0x106   : > { %v1570_v60 = vpop.f32.mrb[6].mxu0  ;;  %v1624_v61 = vpop.f32.mrb[6].mxu1 }
 0x107   : > { %v2073_v62 = vadd.f32 %v1570_v60, %v2022_v23  ;;  %v2076_v63 = vadd.f32 %v1624_v61, %v2022_v23  ;;  %v602_v0 = vpop.f32.mrb[7].mxu0  ;;  %v782_v1 = vpop.f32.mrb[7].mxu1 }
 0x108   : > { %v2079_v2 = vadd.f32 %v2022_v23, %v602_v0  ;;  %v2082_v3 = vadd.f32 %v2022_v23, %v782_v1 }
 0x10a   : > { %v1573_v8 = vpop.f32.mrb[8].mxu0  ;;  %v1627_v9 = vpop.f32.mrb[8].mxu1 }
 0x10b   : > { %v2089_v10 = vadd.f32 %v1573_v8, %v2022_v23  ;;  %v2092_v11 = vadd.f32 %v1627_v9, %v2022_v23  ;;  %v612_v12 = vpop.f32.mrb[9].mxu0  ;;  %v792_v13 = vpop.f32.mrb[9].mxu1 }
 0x10c   : > { %v2095_v14 = vadd.f32 %v2022_v23, %v612_v12  ;;  %v2098_v15 = vadd.f32 %v2022_v23, %v792_v13 }
 0x10e   : > { %v1576_v20 = vpop.f32.mrb[10].mxu0  ;;  %v1630_v21 = vpop.f32.mrb[10].mxu1 }
 0x10f   : > { %v2105_v22 = vadd.f32 %v1576_v20, %v2022_v23  ;;  %v2108_v24 = vadd.f32 %v1630_v21, %v2022_v23  ;;  %v622_v25 = vpop.f32.mrb[11].mxu0  ;;  %v802_v28 = vpop.f32.mrb[11].mxu1 }
 0x110   : > { %v2111_v29 = vadd.f32 %v2022_v23, %v622_v25  ;;  %v2114_v36 = vadd.f32 %v2022_v23, %v802_v28 }
 0x111   : > { %2862 = vst [vmem:[#allocation2_spill] sm:$0xff] %v2108_v24 }
 0x112   : > { %2863 = vst [vmem:[#allocation3_spill] sm:$0xff] %v2114_v36  ;;  %v1579_v49 = vpop.f32.mrb[12].mxu0  ;;  %v1633_v52 = vpop.f32.mrb[12].mxu1 }
 0x113   : > { %v2121_v53 = vadd.f32 %v1579_v49, %v2022_v23  ;;  %v2124_v60 = vadd.f32 %v1633_v52, %v2022_v23  ;;  %v632_v61 = vpop.f32.mrb[13].mxu0  ;;  %v812_v0 = vpop.f32.mrb[13].mxu1 }
 0x114   : > { %v2127_v1 = vadd.f32 %v2022_v23, %v632_v61  ;;  %v2130_v8 = vadd.f32 %v2022_v23, %v812_v0 }
 0x115   : > { %2864 = vst [vmem:[#allocation4_spill] sm:$0xff] %v2124_v60 }
 0x116   : > { %2865 = vst [vmem:[#allocation5_spill] sm:$0xff] %v2130_v8  ;;  %v1582_v21 = vpop.f32.mrb[14].mxu0  ;;  %v1636_v25 = vpop.f32.mrb[14].mxu1 }
 0x117   : > { %v2137_v28 = vadd.f32 %v1582_v21, %v2022_v23  ;;  %v2140_v49 = vadd.f32 %v1636_v25, %v2022_v23  ;;  %v642_v52 = vpop.f32.mrb[15].mxu0  ;;  %v822_v61 = vpop.f32.mrb[15].mxu1 }
 0x118   : > { %v2143_v0 = vadd.f32 %v2022_v23, %v642_v52  ;;  %v2146_v40 = vadd.f32 %v2022_v23, %v822_v61 }
 0x119   : > { %2866 = vst [vmem:[#allocation6_spill] sm:$0xff] %v2140_v49 }
 0x11a   : > { %2867 = vst [vmem:[#allocation7_spill] sm:$0xff] %v2146_v40  ;;  %v1585_v17 = vpop.f32.mrb[16].mxu0  ;;  %v1639_v19 = vpop.f32.mrb[16].mxu1 }
 0x11b   : > { %v2153_v25 = vadd.f32 %v1585_v17, %v2022_v23  ;;  %v2156_v5 = vadd.f32 %v1639_v19, %v2022_v23  ;;  %v652_v52 = vpop.f32.mrb[17].mxu0  ;;  %v832_v7 = vpop.f32.mrb[17].mxu1 }
 0x11c   : > { %v2159_v61 = vadd.f32 %v2022_v23, %v652_v52  ;;  %v2162_v57 = vadd.f32 %v2022_v23, %v832_v7 }
 0x11d   : > { %2868 = vst [vmem:[#allocation8_spill] sm:$0xff] %v2156_v5 }
 0x11e   : > { %2869 = vst [vmem:[#allocation9_spill] sm:$0xff] %v2162_v57  ;;  %v1588_v45 = vpop.f32.mrb[18].mxu0  ;;  %v1642_v47 = vpop.f32.mrb[18].mxu1 }
 0x11f   : > { %v2169_v19 = vadd.f32 %v1588_v45, %v2022_v23  ;;  %v2172_v33 = vadd.f32 %v1642_v47, %v2022_v23  ;;  %v662_v52 = vpop.f32.mrb[19].mxu0  ;;  %v842_v35 = vpop.f32.mrb[19].mxu1 }
 0x120   : > { %v2175_v7 = vadd.f32 %v2022_v23, %v662_v52  ;;  %v2178_v20 = vadd.f32 %v2022_v23, %v842_v35 }
 0x121   : > { %2870 = vst [vmem:[#allocation10_spill] sm:$0xff] %v2172_v33 }
 0x122   : > { %2871 = vst [vmem:[#allocation11_spill] sm:$0xff] %v2178_v20  ;;  %v1591_v12 = vpop.f32.mrb[20].mxu0  ;;  %v1645_v48 = vpop.f32.mrb[20].mxu1 }
 0x123   : > { %v2185_v47 = vadd.f32 %v1591_v12, %v2022_v23  ;;  %v2188_v9 = vadd.f32 %v1645_v48, %v2022_v23  ;;  %v672_v52 = vpop.f32.mrb[21].mxu0  ;;  %v852_v13 = vpop.f32.mrb[21].mxu1 }
 0x124   : > { %v2191_v35 = vadd.f32 %v2022_v23, %v672_v52  ;;  %v2194_v21 = vadd.f32 %v2022_v23, %v852_v13 }
 0x125   : > { %2872 = vst [vmem:[#allocation12_spill] sm:$0xff] %v2188_v9 }
 0x126   : > { %2873 = vst [vmem:[#allocation13_spill] sm:$0xff] %v2194_v21  ;;  %v1594_v37 = vpop.f32.mrb[22].mxu0  ;;  %v1648_v41 = vpop.f32.mrb[22].mxu1 }
 0x127   : > { %v2201_v48 = vadd.f32 %v1594_v37, %v2022_v23  ;;  %v2204_v16 = vadd.f32 %v1648_v41, %v2022_v23  ;;  %v682_v52 = vpop.f32.mrb[23].mxu0  ;;  %v862_v18 = vpop.f32.mrb[23].mxu1 }
 0x128   : > { %v2207_v13 = vadd.f32 %v2022_v23, %v682_v52  ;;  %v2210_v17 = vadd.f32 %v2022_v23, %v862_v18 }
 0x129   : > { %2874 = vst [vmem:[#allocation14_spill] sm:$0xff] %v2204_v16 }
 0x12a   : > { %2875 = vst [vmem:[#allocation15_spill] sm:$0xff] %v2210_v17  ;;  %v1597_v4 = vpop.f32.mrb[24].mxu0  ;;  %v1651_v6 = vpop.f32.mrb[24].mxu1 }
 0x12b   : > { %v2217_v41 = vadd.f32 %v1597_v4, %v2022_v23  ;;  %v2220_v56 = vadd.f32 %v1651_v6, %v2022_v23  ;;  %v692_v52 = vpop.f32.mrb[25].mxu0  ;;  %v872_v58 = vpop.f32.mrb[25].mxu1 }
 0x12c   : > { %v2223_v18 = vadd.f32 %v2022_v23, %v692_v52  ;;  %v2226_v45 = vadd.f32 %v2022_v23, %v872_v58 }
 0x12d   : > { %2876 = vst [vmem:[#allocation16_spill] sm:$0xff] %v2220_v56 }
 0x12e   : > { %2877 = vst [vmem:[#allocation17_spill] sm:$0xff] %v2226_v45  ;;  %v1600_v44 = vpop.f32.mrb[26].mxu0  ;;  %v1654_v46 = vpop.f32.mrb[26].mxu1 }
 0x12f   : > { %v2233_v6 = vadd.f32 %v1600_v44, %v2022_v23  ;;  %v2236_v32 = vadd.f32 %v1654_v46, %v2022_v23  ;;  %v702_v52 = vpop.f32.mrb[27].mxu0  ;;  %v882_v34 = vpop.f32.mrb[27].mxu1 }
 0x130   : > { %v2239_v58 = vadd.f32 %v2022_v23, %v702_v52  ;;  %v2242_v12 = vadd.f32 %v2022_v23, %v882_v34 }
 0x131   : > { %2878 = vst [vmem:[#allocation18_spill] sm:$0xff] %v2236_v32 }
 0x132   : > { %2879 = vst [vmem:[#allocation19_spill] sm:$0xff] %v2242_v12  ;;  %v1603_v56 = vpop.f32.mrb[28].mxu0  ;;  %v1657_v45 = vpop.f32.mrb[28].mxu1 }
 0x133   : > { %v2249_v46 = vadd.f32 %v1603_v56, %v2022_v23  ;;  %v2252_v16 = vadd.f32 %v1657_v45, %v2022_v23  ;;  %v712_v52 = vpop.f32.mrb[29].mxu0  ;;  %v892_v17 = vpop.f32.mrb[29].mxu1 }
 0x134   : > { %v2255_v34 = vadd.f32 %v2022_v23, %v712_v52  ;;  %v2258_v37 = vadd.f32 %v2022_v23, %v892_v17 }
 0x135   : > { %2880 = vst [vmem:[#allocation20_spill] sm:$0xff] %v2252_v16 }
 0x136   : > { %2881 = vst [vmem:[#allocation21_spill] sm:$0xff] %v2258_v37  ;;  %v1606_v32 = vpop.f32.mrb[30].mxu0  ;;  %v1660_v12 = vpop.f32.mrb[30].mxu1 }
 0x137   : > { %v2265_v45 = vadd.f32 %v1606_v32, %v2022_v23  ;;  %v2268_v9 = vadd.f32 %v1660_v12, %v2022_v23  ;;  %v722_v52 = vpop.f32.mrb[31].mxu0  ;;  %v902_v21 = vpop.f32.mrb[31].mxu1 }
 0x138   : > { %v2271_v17 = vadd.f32 %v2022_v23, %v722_v52  ;;  %v2274_v4 = vadd.f32 %v2022_v23, %v902_v21 }
 0x139   : > { %2882 = vst [vmem:[#allocation22_spill] sm:$0xff] %v2268_v9 }
 0x13a   : > { %2883 = vst [vmem:[#allocation23_spill] sm:$0xff] %v2274_v4  ;;  %v1609_v16 = vpop.f32.mrb[32].mxu0  ;;  %v1663_v37 = vpop.f32.mrb[32].mxu1 }
 0x13b   : > { %v2281_v12 = vadd.f32 %v1609_v16, %v2022_v23  ;;  %v2284_v33 = vadd.f32 %v1663_v37, %v2022_v23  ;;  %v732_v52 = vpop.f32.mrb[33].mxu0  ;;  %v912_v20 = vpop.f32.mrb[33].mxu1  ;;  %v2889_v16 = vmax.f32 (!%p1453_p7), %v2063_v54, 0.0 }
 0x13c   : > { %v2287_v21 = vadd.f32 %v2022_v23, %v732_v52  ;;  %v2290_v44 = vadd.f32 %v2022_v23, %v912_v20  ;;  %1006 = sbr.rel (%p1453_p7) target bundleno = 357 (0x165), region = 36 }
 0x13d   : > { %1011 = vst [vmem:[%s1862_s22 + $0x20] sm:$0xff] (!%p1453_p7), %v2889_v16  ;;  %v2895_v16 = vmax.f32 (!%p1453_p7), %v2111_v29, 0.0 }
 0x13e   : > { %v1612_v9 = vpop.f32.mrb[34].mxu0  ;;  %v1666_v4 = vpop.f32.mrb[34].mxu1 }
 0x13f   : > { %v2297_v37 = vadd.f32 %v1612_v9, %v2022_v23  ;;  %v2300_v5 = vadd.f32 %v1666_v4, %v2022_v23  ;;  %v742_v52 = vpop.f32.mrb[35].mxu0  ;;  %v922_v57 = vpop.f32.mrb[35].mxu1  ;;  %v2885_v4 = vmax.f32 (!%p1453_p7), %v2031_v30, 0.0  ;;  %v2890_v9 = vmax.f32 (!%p1453_p7), %v2057_v50, 0.0  ;;  %1017 = vst [vmem:[%s1862_s22 + $0x50] sm:$0xff] (!%p1453_p7), %v2895_v16 }
 0x140   : > { %v2303_v20 = vadd.f32 %v2022_v23, %v742_v52  ;;  %v2306_v56 = vadd.f32 %v2022_v23, %v922_v57  ;;  %v2886_v23 = vmax.f32 (!%p1453_p7), %v2025_v26, 0.0  ;;  %v2887_v57 = vmax.f32 (!%p1453_p7), %v2047_v42, 0.0 }
 0x141   : > { %2884 = vst [vmem:[#allocation24_spill] sm:$0xff] %v2300_v5  ;;  %v2853_v32 = vmax.f32 %v2297_v37, 0.0  ;;  %1007 = vst [vmem:[%s1862_s22] sm:$0xff] (!%p1453_p7), %v2885_v4  ;;  %v2888_v52 = vmax.f32 (!%p1453_p7), %v2041_v38, 0.0  ;;  %v2891_v4 = vmax.f32 (!%p1453_p7), %v2079_v2, 0.0  ;;  %v2901_v16 = vmax.f32 (!%p1453_p7), %v2159_v61, 0.0 }
 0x142   : > { %v2854_v59 = vmax.f32 %v2303_v20, 0.0  ;;  %1008 = vst [vmem:[%s1862_s22 + $0x8] sm:$0xff] (!%p1453_p7), %v2886_v23  ;;  %1009 = vst [vmem:[%s1862_s22 + $0x10] sm:$0xff] (!%p1453_p7), %v2887_v57  ;;  %v2892_v23 = vmax.f32 (!%p1453_p7), %v2073_v62, 0.0  ;;  %v2893_v57 = vmax.f32 (!%p1453_p7), %v2095_v14, 0.0 }
 0x143   : > { %1010 = vst [vmem:[%s1862_s22 + $0x18] sm:$0xff] %v2888_v52  ;;  %1012 = vst [vmem:[%s1862_s22 + $0x28] sm:$0xff] %v2890_v9  ;;  %v2894_v52 = vmax.f32 %v2089_v10, 0.0  ;;  %v2896_v9 = vmax.f32 %v2105_v22, 0.0 }
 0x144   : > { %1013 = vst [vmem:[%s1862_s22 + $0x30] sm:$0xff] %v2891_v4  ;;  %1014 = vst [vmem:[%s1862_s22 + $0x38] sm:$0xff] %v2892_v23  ;;  %v2897_v4 = vmax.f32 %v2127_v1, 0.0  ;;  %v2898_v23 = vmax.f32 %v2121_v53, 0.0 }
 0x145   : > { %1015 = vst [vmem:[%s1862_s22 + $0x40] sm:$0xff] %v2893_v57  ;;  %1016 = vst [vmem:[%s1862_s22 + $0x48] sm:$0xff] %v2894_v52  ;;  %v2899_v57 = vmax.f32 %v2143_v0, 0.0  ;;  %v2900_v52 = vmax.f32 %v2137_v28, 0.0 }
 0x146   : > { %1018 = vst [vmem:[%s1862_s22 + $0x58] sm:$0xff] %v2896_v9  ;;  %1019 = vst [vmem:[%s1862_s22 + $0x60] sm:$0xff] %v2897_v4  ;;  %v2902_v9 = vmax.f32 %v2153_v25, 0.0  ;;  %v2903_v4 = vmax.f32 %v2175_v7, 0.0 }
 0x147   : > { %1020 = vst [vmem:[%s1862_s22 + $0x68] sm:$0xff] %v2898_v23  ;;  %1021 = vst [vmem:[%s1862_s22 + $0x70] sm:$0xff] %v2899_v57  ;;  %v2904_v23 = vmax.f32 %v2169_v19, 0.0  ;;  %v2905_v57 = vmax.f32 %v2191_v35, 0.0 }
 0x148   : > { %1022 = vst [vmem:[%s1862_s22 + $0x78] sm:$0xff] %v2900_v52  ;;  %1023 = vst [vmem:[%s1862_s22 + $0x80] sm:$0xff] %v2901_v16  ;;  %v2906_v52 = vmax.f32 %v2185_v47, 0.0  ;;  %v2907_v16 = vmax.f32 %v2207_v13, 0.0 }
 0x149   : > { %1024 = vst [vmem:[%s1862_s22 + $0x88] sm:$0xff] %v2902_v9  ;;  %1025 = vst [vmem:[%s1862_s22 + $0x90] sm:$0xff] %v2903_v4  ;;  %v2908_v9 = vmax.f32 %v2201_v48, 0.0  ;;  %v2909_v4 = vmax.f32 %v2223_v18, 0.0 }
 0x14a   : > { %1026 = vst [vmem:[%s1862_s22 + $0x98] sm:$0xff] %v2904_v23  ;;  %1027 = vst [vmem:[%s1862_s22 + $0xa0] sm:$0xff] %v2905_v57  ;;  %v2910_v23 = vmax.f32 %v2217_v41, 0.0  ;;  %v2911_v57 = vmax.f32 %v2239_v58, 0.0 }
 0x14b   : > { %1028 = vst [vmem:[%s1862_s22 + $0xa8] sm:$0xff] %v2906_v52  ;;  %1029 = vst [vmem:[%s1862_s22 + $0xb0] sm:$0xff] %v2907_v16  ;;  %v2912_v52 = vmax.f32 %v2233_v6, 0.0  ;;  %v2913_v16 = vmax.f32 %v2255_v34, 0.0 }
 0x14c   : > { %1030 = vst [vmem:[%s1862_s22 + $0xb8] sm:$0xff] %v2908_v9  ;;  %1031 = vst [vmem:[%s1862_s22 + $0xc0] sm:$0xff] %v2909_v4  ;;  %v2914_v9 = vmax.f32 %v2249_v46, 0.0  ;;  %v2915_v4 = vmax.f32 %v2271_v17, 0.0 }
 0x14d   : > { %1032 = vst [vmem:[%s1862_s22 + $0xc8] sm:$0xff] %v2910_v23  ;;  %1033 = vst [vmem:[%s1862_s22 + $0xd0] sm:$0xff] %v2911_v57  ;;  %v2916_v23 = vmax.f32 %v2265_v45, 0.0  ;;  %v2917_v57 = vmax.f32 %v2287_v21, 0.0 }
 0x14e   : > { %1034 = vst [vmem:[%s1862_s22 + $0xd8] sm:$0xff] %v2912_v52  ;;  %1035 = vst [vmem:[%s1862_s22 + $0xe0] sm:$0xff] %v2913_v16  ;;  %v2918_v52 = vmax.f32 %v2281_v12, 0.0  ;;  %v2919_v16 = vmax.f32 %v2034_v31, 0.0 }
 0x14f   : > { %1036 = vst [vmem:[%s1862_s22 + $0xe8] sm:$0xff] %v2914_v9  ;;  %1037 = vst [vmem:[%s1862_s22 + $0xf0] sm:$0xff] %v2915_v4  ;;  %v2920_v9 = vmax.f32 %v2028_v27, 0.0  ;;  %v2921_v4 = vmax.f32 %v2050_v43, 0.0 }
 0x150   : > { %1038 = vst [vmem:[%s1862_s22 + $0xf8] sm:$0xff] %v2916_v23  ;;  %1039 = vst [vmem:[%s1862_s22 + $0x100] sm:$0xff] %v2917_v57  ;;  %v2922_v23 = vmax.f32 %v2044_v39, 0.0  ;;  %v2923_v57 = vmax.f32 %v2066_v55, 0.0 }
 0x151   : > { %1040 = vst [vmem:[%s1862_s22 + $0x108] sm:$0xff] %v2918_v52  ;;  %1041 = vst [vmem:[%s1862_s22 + $0x110] sm:$0xff] %v2854_v59  ;;  %v2924_v52 = vmax.f32 %v2060_v51, 0.0 }
 0x152   : > { %1042 = vst [vmem:[%s1862_s22 + $0x118] sm:$0xff] %v2853_v32  ;;  %1043 = vst [vmem:[%s1862_s22 + $0x120] sm:$0xff] %v2919_v16  ;;  %v2925_v16 = vmax.f32 %v2082_v3, 0.0 }
 0x153   : > { %1044 = vst [vmem:[%s1862_s22 + $0x128] sm:$0xff] %v2920_v9  ;;  %1045 = vst [vmem:[%s1862_s22 + $0x130] sm:$0xff] %v2921_v4  ;;  %v2926_v9 = vmax.f32 %v2076_v63, 0.0  ;;  %v2927_v4 = vmax.f32 %v2098_v15, 0.0 }
 0x154   : > { %1046 = vst [vmem:[%s1862_s22 + $0x138] sm:$0xff] %v2922_v23  ;;  %1047 = vst [vmem:[%s1862_s22 + $0x140] sm:$0xff] %v2923_v57  ;;  %v2928_v23 = vmax.f32 %v2092_v11, 0.0  ;;  %v2929_v57 = vmax.f32 %v2114_v36, 0.0 }
 0x155   : > { %1048 = vst [vmem:[%s1862_s22 + $0x148] sm:$0xff] %v2924_v52  ;;  %1049 = vst [vmem:[%s1862_s22 + $0x150] sm:$0xff] %v2925_v16  ;;  %v2930_v52 = vmax.f32 %v2108_v24, 0.0  ;;  %v2931_v16 = vmax.f32 %v2130_v8, 0.0 }
 0x156   : > { %1050 = vst [vmem:[%s1862_s22 + $0x158] sm:$0xff] %v2926_v9  ;;  %1051 = vst [vmem:[%s1862_s22 + $0x160] sm:$0xff] %v2927_v4  ;;  %v2932_v9 = vmax.f32 %v2124_v60, 0.0  ;;  %v2933_v4 = vmax.f32 %v2146_v40, 0.0 }
 0x157   : > { %1052 = vst [vmem:[%s1862_s22 + $0x168] sm:$0xff] %v2928_v23  ;;  %1053 = vst [vmem:[%s1862_s22 + $0x170] sm:$0xff] %v2929_v57  ;;  %v2934_v23 = vmax.f32 %v2140_v49, 0.0  ;;  %v2935_v57 = vld [vmem:[#allocation9_spill] sm:$0xff] }
 0x158   : > { %1054 = vst [vmem:[%s1862_s22 + $0x178] sm:$0xff] %v2930_v52  ;;  %1055 = vst [vmem:[%s1862_s22 + $0x180] sm:$0xff] %v2931_v16  ;;  %v2936_v32 = vmax.f32 %v2935_v57, 0.0  ;;  %v2937_v52 = vld [vmem:[#allocation8_spill] sm:$0xff]  ;;  %v2939_v16 = vld [vmem:[#allocation11_spill] sm:$0xff] }
 0x159   : > { %1056 = vst [vmem:[%s1862_s22 + $0x188] sm:$0xff] %v2932_v9  ;;  %1057 = vst [vmem:[%s1862_s22 + $0x190] sm:$0xff] %v2933_v4  ;;  %v2938_v59 = vmax.f32 %v2937_v52, 0.0  ;;  %v2940_v60 = vmax.f32 %v2939_v16, 0.0  ;;  %v2941_v9 = vld [vmem:[#allocation10_spill] sm:$0xff]  ;;  %v2943_v4 = vld [vmem:[#allocation13_spill] sm:$0xff] }
 0x15a   : > { %1058 = vst [vmem:[%s1862_s22 + $0x198] sm:$0xff] %v2934_v23  ;;  %1059 = vst [vmem:[%s1862_s22 + $0x1a0] sm:$0xff] %v2936_v32  ;;  %v2942_v40 = vmax.f32 %v2941_v9, 0.0  ;;  %v2944_v49 = vmax.f32 %v2943_v4, 0.0  ;;  %v2945_v23 = vld [vmem:[#allocation12_spill] sm:$0xff]  ;;  %v2947_v32 = vld [vmem:[#allocation15_spill] sm:$0xff] }
 0x15b   : > { %1060 = vst [vmem:[%s1862_s22 + $0x1a8] sm:$0xff] %v2938_v59  ;;  %1061 = vst [vmem:[%s1862_s22 + $0x1b0] sm:$0xff] %v2940_v60  ;;  %v2946_v57 = vmax.f32 %v2945_v23, 0.0  ;;  %v2948_v8 = vmax.f32 %v2947_v32, 0.0  ;;  %v2949_v52 = vld [vmem:[#allocation14_spill] sm:$0xff]  ;;  %v2951_v16 = vld [vmem:[#allocation17_spill] sm:$0xff] }
 0x15c   : > { %1062 = vst [vmem:[%s1862_s22 + $0x1b8] sm:$0xff] %v2942_v40  ;;  %1063 = vst [vmem:[%s1862_s22 + $0x1c0] sm:$0xff] %v2944_v49  ;;  %v2950_v59 = vmax.f32 %v2949_v52, 0.0  ;;  %v2952_v24 = vmax.f32 %v2951_v16, 0.0  ;;  %v2953_v60 = vld [vmem:[#allocation16_spill] sm:$0xff]  ;;  %v2955_v40 = vld [vmem:[#allocation19_spill] sm:$0xff] }
 0x15d   : > { %1064 = vst [vmem:[%s1862_s22 + $0x1c8] sm:$0xff] %v2946_v57  ;;  %1065 = vst [vmem:[%s1862_s22 + $0x1d0] sm:$0xff] %v2948_v8  ;;  %v2954_v9 = vmax.f32 %v2953_v60, 0.0  ;;  %v2956_v36 = vmax.f32 %v2955_v40, 0.0  ;;  %v2957_v4 = vld [vmem:[#allocation18_spill] sm:$0xff]  ;;  %v2959_v23 = vld [vmem:[#allocation21_spill] sm:$0xff] }
 0x15e   : > { %1066 = vst [vmem:[%s1862_s22 + $0x1d8] sm:$0xff] %v2950_v59  ;;  %1067 = vst [vmem:[%s1862_s22 + $0x1e0] sm:$0xff] %v2952_v24  ;;  %v2958_v49 = vmax.f32 %v2957_v4, 0.0  ;;  %v2960_v57 = vmax.f32 %v2959_v23, 0.0  ;;  %v2961_v32 = vld [vmem:[#allocation20_spill] sm:$0xff]  ;;  %v2963_v52 = vld [vmem:[#allocation23_spill] sm:$0xff] }
 0x15f   : > { %1068 = vst [vmem:[%s1862_s22 + $0x1e8] sm:$0xff] %v2954_v9  ;;  %1069 = vst [vmem:[%s1862_s22 + $0x1f0] sm:$0xff] %v2956_v36  ;;  %v2962_v8 = vmax.f32 %v2961_v32, 0.0  ;;  %v2964_v59 = vmax.f32 %v2963_v52, 0.0  ;;  %v2965_v16 = vld [vmem:[#allocation22_spill] sm:$0xff]  ;;  %v2967_v60 = vmax.f32 %v2290_v44, 0.0 }
 0x160   : > { %1070 = vst [vmem:[%s1862_s22 + $0x1f8] sm:$0xff] %v2958_v49  ;;  %1071 = vst [vmem:[%s1862_s22 + $0x200] sm:$0xff] %v2960_v57  ;;  %v2966_v24 = vmax.f32 %v2965_v16, 0.0  ;;  %v2968_v36 = vmax.f32 %v2284_v33, 0.0  ;;  %v2969_v9 = vmax.f32 %v2306_v56, 0.0  ;;  %v2970_v40 = vmax.f32 %v2300_v5, 0.0 }
 0x161   : > { %1072 = vst [vmem:[%s1862_s22 + $0x208] sm:$0xff] %v2962_v8  ;;  %1073 = vst [vmem:[%s1862_s22 + $0x210] sm:$0xff] %v2964_v59 }
 0x162   : > { %1074 = vst [vmem:[%s1862_s22 + $0x218] sm:$0xff] %v2966_v24  ;;  %1075 = vst [vmem:[%s1862_s22 + $0x220] sm:$0xff] %v2967_v60 }
 0x163   : > { %1076 = vst [vmem:[%s1862_s22 + $0x228] sm:$0xff] %v2968_v36  ;;  %1077 = vst [vmem:[%s1862_s22 + $0x230] sm:$0xff] %v2969_v9 }
 0x164   : > { %1078 = vst [vmem:[%s1862_s22 + $0x238] sm:$0xff] %v2970_v40 }
 0x165 PF: > { %p1454_p8 = scmp.le.s32.totalorder %s1760_s12, 0 }
 0x166   : > { %v2971_v57 = vmax.f32 (!%p1454_p8), %v2031_v30, 0.0  ;;  %v2972_v8 = vmax.f32 (!%p1454_p8), %v2025_v26, 0.0  ;;  %v2973_v59 = vmax.f32 (!%p1454_p8), %v2047_v42, 0.0  ;;  %v1087_v60 = vld [vmem:[%s1862_s22 + $0x20] sm:$0xff] (!%p1454_p8)  ;;  %v2974_v9 = vmax.f32 (!%p1454_p8), %v2041_v38, 0.0  ;;  %v1089_v42 = vld [vmem:[%s1862_s22 + $0x30] sm:$0xff] (!%p1454_p8) }
 0x167   : > { %1082 = sbr.rel (%p1454_p8) target bundleno = 408 (0x198), region = 40  ;;  %v2975_v5 = vmax.f32 (!%p1454_p8), %v2063_v54, 0.0  ;;  %v2976_v26 = vmax.f32 (!%p1454_p8), %v2057_v50, 0.0  ;;  %v2977_v38 = vmax.f32 (!%p1454_p8), %v2079_v2, 0.0  ;;  %v2978_v54 = vmax.f32 (!%p1454_p8), %v2073_v62, 0.0 }
 0x168   : > { %v2979_v50 = vmax.f32 (!%p1454_p8), %v2095_v14, 0.0  ;;  %v2980_v2 = vmax.f32 (!%p1454_p8), %v2089_v10, 0.0  ;;  %v2981_v62 = vmax.f32 (!%p1454_p8), %v2111_v29, 0.0  ;;  %v2982_v14 = vmax.f32 (!%p1454_p8), %v2105_v22, 0.0 }
 0x169   : > { %v1159_v30 = vmax.f32 (!%p1454_p8), %v1087_v60, %v2975_v5  ;;  %v1094_v60 = vld [vmem:[%s1862_s22 + $0x58] sm:$0xff] (!%p1454_p8)  ;;  %v2983_v10 = vmax.f32 (!%p1454_p8), %v2127_v1, 0.0  ;;  %v2984_v29 = vmax.f32 (!%p1454_p8), %v2121_v53, 0.0  ;;  %v2985_v22 = vmax.f32 (!%p1454_p8), %v2143_v0, 0.0 }
 0x16a   : > { %v1083_v4 = vld [vmem:[%s1862_s22] sm:$0xff] (!%p1454_p8)  ;;  %v2986_v1 = vmax.f32 (!%p1454_p8), %v2137_v28, 0.0  ;;  %v2987_v53 = vmax.f32 (!%p1454_p8), %v2159_v61, 0.0  ;;  %v2988_v0 = vmax.f32 (!%p1454_p8), %v2153_v25, 0.0  ;;  %v2989_v28 = vmax.f32 (!%p1454_p8), %v2175_v7, 0.0 }
 0x16b   : > { %v1084_v49 = vld [vmem:[%s1862_s22 + $0x8] sm:$0xff] (!%p1454_p8)  ;;  %v1085_v23 = vld [vmem:[%s1862_s22 + $0x10] sm:$0xff] (!%p1454_p8)  ;;  %v1155_v32 = vmax.f32 (!%p1454_p8), %v1083_v4, %v2971_v57  ;;  %v1161_v57 = vmax.f32 (!%p1454_p8), %v1089_v42, %v2977_v38  ;;  %1231 = vst [vmem:[%s1862_s22 + $0x20] sm:$0xff] (!%p1454_p8), %v1159_v30  ;;  %v1098_v42 = vld [vmem:[%s1862_s22 + $0x78] sm:$0xff] (!%p1454_p8)  ;;  %v2990_v61 = vmax.f32 (!%p1454_p8), %v2169_v19, 0.0  ;;  %v2991_v25 = vmax.f32 (!%p1454_p8), %v2191_v35, 0.0 }
 0x16c   : > { %v1156_v52 = vmax.f32 (!%p1454_p8), %v1084_v49, %v2972_v8  ;;  %v1157_v16 = vmax.f32 (!%p1454_p8), %v1085_v23, %v2973_v59  ;;  %v1086_v24 = vld [vmem:[%s1862_s22 + $0x18] sm:$0xff] (!%p1454_p8)  ;;  %v1088_v36 = vld [vmem:[%s1862_s22 + $0x28] sm:$0xff] (!%p1454_p8)  ;;  %v1091_v23 = vld [vmem:[%s1862_s22 + $0x40] sm:$0xff] (!%p1454_p8)  ;;  %v1170_v38 = vmax.f32 (!%p1454_p8), %v1098_v42, %v2986_v1  ;;  %v2992_v7 = vmax.f32 (!%p1454_p8), %v2185_v47, 0.0 }
 0x16d   : > { %v1158_v40 = vmax.f32 (!%p1454_p8), %v1086_v24, %v2974_v9  ;;  %v1160_v4 = vmax.f32 (!%p1454_p8), %v1088_v36, %v2976_v26  ;;  %v1090_v49 = vld [vmem:[%s1862_s22 + $0x38] sm:$0xff] (!%p1454_p8)  ;;  %1227 = vst [vmem:[%s1862_s22] sm:$0xff] (!%p1454_p8), %v1155_v32  ;;  %v1163_v8 = vmax.f32 (!%p1454_p8), %v1091_v23, %v2979_v50  ;;  %v1092_v59 = vld [vmem:[%s1862_s22 + $0x48] sm:$0xff] (!%p1454_p8)  ;;  %v1093_v24 = vld [vmem:[%s1862_s22 + $0x50] sm:$0xff] (!%p1454_p8)  ;;  %v2993_v19 = vmax.f32 (!%p1454_p8), %v2207_v13, 0.0 }
 0x16e   : > { %1228 = vst [vmem:[%s1862_s22 + $0x8] sm:$0xff] %v1156_v52  ;;  %1229 = vst [vmem:[%s1862_s22 + $0x10] sm:$0xff] %v1157_v16  ;;  %v1162_v5 = vmax.f32 %v1090_v49, %v2978_v54  ;;  %v1164_v32 = vmax.f32 %v1092_v59, %v2980_v2  ;;  %v1165_v52 = vmax.f32 %v1093_v24, %v2981_v62  ;;  %v1095_v36 = vld [vmem:[%s1862_s22 + $0x60] sm:$0xff]  ;;  %v1096_v9 = vld [vmem:[%s1862_s22 + $0x68] sm:$0xff]  ;;  %v2994_v35 = vmax.f32 %v2201_v48, 0.0 }
 0x16f   : > { %1230 = vst [vmem:[%s1862_s22 + $0x18] sm:$0xff] %v1158_v40  ;;  %1232 = vst [vmem:[%s1862_s22 + $0x28] sm:$0xff] %v1160_v4  ;;  %v1166_v16 = vmax.f32 %v1094_v60, %v2982_v14  ;;  %v1097_v26 = vld [vmem:[%s1862_s22 + $0x70] sm:$0xff]  ;;  %v1167_v40 = vmax.f32 %v1095_v36, %v2983_v10  ;;  %v1168_v30 = vmax.f32 %v1096_v9, %v2984_v29  ;;  %v1099_v49 = vld [vmem:[%s1862_s22 + $0x80] sm:$0xff]  ;;  %v2995_v47 = vmax.f32 %v2223_v18, 0.0 }
 0x170   : > { %1233 = vst [vmem:[%s1862_s22 + $0x30] sm:$0xff] %v1161_v57  ;;  %1234 = vst [vmem:[%s1862_s22 + $0x38] sm:$0xff] %v1162_v5  ;;  %v1169_v4 = vmax.f32 %v1097_v26, %v2985_v22  ;;  %v1100_v23 = vld [vmem:[%s1862_s22 + $0x88] sm:$0xff]  ;;  %v1171_v57 = vmax.f32 %v1099_v49, %v2987_v53  ;;  %v1101_v5 = vld [vmem:[%s1862_s22 + $0x90] sm:$0xff]  ;;  %v2996_v13 = vmax.f32 %v2217_v41, 0.0  ;;  %v2997_v48 = vmax.f32 %v2239_v58, 0.0 }
 0x171   : > { %1235 = vst [vmem:[%s1862_s22 + $0x40] sm:$0xff] %v1163_v8  ;;  %1236 = vst [vmem:[%s1862_s22 + $0x48] sm:$0xff] %v1164_v32  ;;  %v1172_v54 = vmax.f32 %v1100_v23, %v2988_v0  ;;  %v1102_v50 = vld [vmem:[%s1862_s22 + $0x98] sm:$0xff]  ;;  %v1103_v8 = vld [vmem:[%s1862_s22 + $0xa0] sm:$0xff]  ;;  %v1173_v59 = vmax.f32 %v1101_v5, %v2989_v28  ;;  %v2998_v18 = vmax.f32 %v2233_v6, 0.0  ;;  %v2999_v41 = vmax.f32 %v2255_v34, 0.0 }
 0x172   : > { %1237 = vst [vmem:[%s1862_s22 + $0x50] sm:$0xff] %v1165_v52  ;;  %1238 = vst [vmem:[%s1862_s22 + $0x58] sm:$0xff] %v1166_v16  ;;  %v1174_v24 = vmax.f32 %v1102_v50, %v2990_v61  ;;  %v1175_v60 = vmax.f32 %v1103_v8, %v2991_v25  ;;  %v1104_v2 = vld [vmem:[%s1862_s22 + $0xa8] sm:$0xff]  ;;  %v1105_v32 = vld [vmem:[%s1862_s22 + $0xb0] sm:$0xff]  ;;  %v3000_v58 = vmax.f32 %v2249_v46, 0.0  ;;  %v3001_v6 = vmax.f32 %v2271_v17, 0.0 }
 0x173   : > { %1239 = vst [vmem:[%s1862_s22 + $0x60] sm:$0xff] %v1167_v40  ;;  %1240 = vst [vmem:[%s1862_s22 + $0x68] sm:$0xff] %v1168_v30  ;;  %v1106_v62 = vld [vmem:[%s1862_s22 + $0xb8] sm:$0xff]  ;;  %v1176_v52 = vmax.f32 %v1104_v2, %v2992_v7  ;;  %v1177_v14 = vmax.f32 %v1105_v32, %v2993_v19  ;;  %v1107_v36 = vld [vmem:[%s1862_s22 + $0xc0] sm:$0xff]  ;;  %v3002_v34 = vmax.f32 %v2265_v45, 0.0  ;;  %v3003_v46 = vmax.f32 %v2287_v21, 0.0 }
 0x174   : > { %1241 = vst [vmem:[%s1862_s22 + $0x70] sm:$0xff] %v1169_v4  ;;  %1242 = vst [vmem:[%s1862_s22 + $0x78] sm:$0xff] %v1170_v38  ;;  %v1178_v16 = vmax.f32 %v1106_v62, %v2994_v35  ;;  %v1108_v9 = vld [vmem:[%s1862_s22 + $0xc8] sm:$0xff]  ;;  %v1109_v26 = vld [vmem:[%s1862_s22 + $0xd0] sm:$0xff]  ;;  %v1179_v10 = vmax.f32 %v1107_v36, %v2995_v47  ;;  %v3004_v17 = vmax.f32 %v2281_v12, 0.0  ;;  %v3005_v45 = vmax.f32 %v2303_v20, 0.0 }
 0x175   : > { %1243 = vst [vmem:[%s1862_s22 + $0x80] sm:$0xff] %v1171_v57  ;;  %1244 = vst [vmem:[%s1862_s22 + $0x88] sm:$0xff] %v1172_v54  ;;  %v1180_v40 = vmax.f32 %v1108_v9, %v2996_v13  ;;  %v1181_v29 = vmax.f32 %v1109_v26, %v2997_v48  ;;  %v1110_v30 = vld [vmem:[%s1862_s22 + $0xd8] sm:$0xff]  ;;  %v1111_v22 = vld [vmem:[%s1862_s22 + $0xe0] sm:$0xff]  ;;  %v3006_v21 = vmax.f32 %v2297_v37, 0.0  ;;  %v3007_v12 = vmax.f32 %v2034_v31, 0.0 }
 0x176   : > { %1245 = vst [vmem:[%s1862_s22 + $0x90] sm:$0xff] %v1173_v59  ;;  %1246 = vst [vmem:[%s1862_s22 + $0x98] sm:$0xff] %v1174_v24  ;;  %v1112_v4 = vld [vmem:[%s1862_s22 + $0xe8] sm:$0xff]  ;;  %v1182_v42 = vmax.f32 %v1110_v30, %v2998_v18  ;;  %v1183_v49 = vmax.f32 %v1111_v22, %v2999_v41  ;;  %v1113_v1 = vld [vmem:[%s1862_s22 + $0xf0] sm:$0xff]  ;;  %v3008_v20 = vmax.f32 %v2028_v27, 0.0  ;;  %v3009_v37 = vmax.f32 %v2050_v43, 0.0 }
 0x177   : > { %1247 = vst [vmem:[%s1862_s22 + $0xa0] sm:$0xff] %v1175_v60  ;;  %1248 = vst [vmem:[%s1862_s22 + $0xa8] sm:$0xff] %v1176_v52  ;;  %v1184_v23 = vmax.f32 %v1112_v4, %v3000_v58  ;;  %v1114_v38 = vld [vmem:[%s1862_s22 + $0xf8] sm:$0xff]  ;;  %v1115_v53 = vld [vmem:[%s1862_s22 + $0x100] sm:$0xff]  ;;  %v1185_v57 = vmax.f32 %v1113_v1, %v3001_v6  ;;  %v3010_v31 = vmax.f32 %v2044_v39, 0.0  ;;  %v3011_v27 = vmax.f32 %v2066_v55, 0.0 }
 0x178   : > { %1249 = vst [vmem:[%s1862_s22 + $0xb0] sm:$0xff] %v1177_v14  ;;  %1250 = vst [vmem:[%s1862_s22 + $0xb8] sm:$0xff] %v1178_v16  ;;  %v1186_v0 = vmax.f32 %v1114_v38, %v3002_v34  ;;  %v1187_v54 = vmax.f32 %v1115_v53, %v3003_v46  ;;  %v1116_v5 = vld [vmem:[%s1862_s22 + $0x108] sm:$0xff]  ;;  %v1117_v50 = vld [vmem:[%s1862_s22 + $0x110] sm:$0xff]  ;;  %v3012_v43 = vmax.f32 %v2060_v51, 0.0  ;;  %v3013_v39 = vmax.f32 %v2082_v3, 0.0 }
 0x179   : > { %1251 = vst [vmem:[%s1862_s22 + $0xc0] sm:$0xff] %v1179_v10  ;;  %1252 = vst [vmem:[%s1862_s22 + $0xc8] sm:$0xff] %v1180_v40  ;;  %v1118_v8 = vld [vmem:[%s1862_s22 + $0x118] sm:$0xff]  ;;  %v1188_v28 = vmax.f32 %v1116_v5, %v3004_v17  ;;  %v1189_v59 = vmax.f32 %v1117_v50, %v3005_v45  ;;  %v1119_v24 = vld [vmem:[%s1862_s22 + $0x120] sm:$0xff]  ;;  %v3014_v55 = vmax.f32 %v2076_v63, 0.0  ;;  %v3015_v51 = vmax.f32 %v2098_v15, 0.0 }
 0x17a   : > { %1253 = vst [vmem:[%s1862_s22 + $0xd0] sm:$0xff] %v1181_v29  ;;  %1254 = vst [vmem:[%s1862_s22 + $0xd8] sm:$0xff] %v1182_v42  ;;  %v1190_v61 = vmax.f32 %v1118_v8, %v3006_v21  ;;  %v1120_v25 = vld [vmem:[%s1862_s22 + $0x128] sm:$0xff]  ;;  %v1121_v60 = vld [vmem:[%s1862_s22 + $0x130] sm:$0xff]  ;;  %v1191_v2 = vmax.f32 %v1119_v24, %v3007_v12  ;;  %v3016_v3 = vmax.f32 %v2092_v11, 0.0 }
 0x17b   : > { %1255 = vst [vmem:[%s1862_s22 + $0xe0] sm:$0xff] %v1183_v49  ;;  %1256 = vst [vmem:[%s1862_s22 + $0xe8] sm:$0xff] %v1184_v23  ;;  %v1192_v32 = vmax.f32 %v1120_v25, %v3008_v20  ;;  %v1193_v62 = vmax.f32 %v1121_v60, %v3009_v37  ;;  %v1122_v7 = vld [vmem:[%s1862_s22 + $0x138] sm:$0xff]  ;;  %v1123_v52 = vld [vmem:[%s1862_s22 + $0x140] sm:$0xff] }
 0x17c   : > { %1257 = vst [vmem:[%s1862_s22 + $0xf0] sm:$0xff] %v1185_v57  ;;  %1258 = vst [vmem:[%s1862_s22 + $0xf8] sm:$0xff] %v1186_v0  ;;  %v1124_v19 = vld [vmem:[%s1862_s22 + $0x148] sm:$0xff]  ;;  %v1194_v14 = vmax.f32 %v1122_v7, %v3010_v31  ;;  %v1195_v35 = vmax.f32 %v1123_v52, %v3011_v27  ;;  %v1125_v36 = vld [vmem:[%s1862_s22 + $0x150] sm:$0xff] }
 0x17d   : > { %1259 = vst [vmem:[%s1862_s22 + $0x100] sm:$0xff] %v1187_v54  ;;  %1260 = vst [vmem:[%s1862_s22 + $0x108] sm:$0xff] %v1188_v28  ;;  %v1196_v16 = vmax.f32 %v1124_v19, %v3012_v43  ;;  %v1126_v9 = vld [vmem:[%s1862_s22 + $0x158] sm:$0xff]  ;;  %v1127_v26 = vld [vmem:[%s1862_s22 + $0x160] sm:$0xff]  ;;  %v1197_v47 = vmax.f32 %v1125_v36, %v3013_v39 }
 0x17e   : > { %1261 = vst [vmem:[%s1862_s22 + $0x110] sm:$0xff] %v1189_v59  ;;  %1262 = vst [vmem:[%s1862_s22 + $0x118] sm:$0xff] %v1190_v61  ;;  %v1198_v10 = vmax.f32 %v1126_v9, %v3014_v55  ;;  %v1199_v13 = vmax.f32 %v1127_v26, %v3015_v51  ;;  %v1128_v40 = vld [vmem:[%s1862_s22 + $0x168] sm:$0xff]  ;;  %v1129_v48 = vld [vmem:[%s1862_s22 + $0x170] sm:$0xff] }
 0x17f   : > { %1263 = vst [vmem:[%s1862_s22 + $0x120] sm:$0xff] %v1191_v2  ;;  %1264 = vst [vmem:[%s1862_s22 + $0x128] sm:$0xff] %v1192_v32  ;;  %v1130_v29 = vld [vmem:[%s1862_s22 + $0x178] sm:$0xff]  ;;  %v1200_v30 = vmax.f32 %v1128_v40, %v3016_v3  ;;  %v3017_v63 = vld [vmem:[#allocation3_spill] sm:$0xff] }
 0x180   : > { %1265 = vst [vmem:[%s1862_s22 + $0x130] sm:$0xff] %v1193_v62  ;;  %1266 = vst [vmem:[%s1862_s22 + $0x138] sm:$0xff] %v1194_v14  ;;  %v3018_v22 = vmax.f32 %v3017_v63, 0.0  ;;  %v3019_v15 = vld [vmem:[#allocation2_spill] sm:$0xff]  ;;  %v1132_v49 = vld [vmem:[%s1862_s22 + $0x188] sm:$0xff] }
 0x181   : > { %1267 = vst [vmem:[%s1862_s22 + $0x140] sm:$0xff] %v1195_v35  ;;  %1268 = vst [vmem:[%s1862_s22 + $0x148] sm:$0xff] %v1196_v16  ;;  %v3020_v18 = vmax.f32 %v3019_v15, 0.0  ;;  %v1131_v41 = vld [vmem:[%s1862_s22 + $0x180] sm:$0xff]  ;;  %v1133_v58 = vld [vmem:[%s1862_s22 + $0x190] sm:$0xff] }
 0x182   : > { %v1201_v4 = vmax.f32 %v1129_v48, %v3018_v22  ;;  %1269 = vst [vmem:[%s1862_s22 + $0x150] sm:$0xff] %v1197_v47  ;;  %1270 = vst [vmem:[%s1862_s22 + $0x158] sm:$0xff] %v1198_v10  ;;  %v3021_v11 = vld [vmem:[#allocation5_spill] sm:$0xff]  ;;  %v3023_v38 = vld [vmem:[#allocation4_spill] sm:$0xff] }
 0x183   : > { %v1202_v42 = vmax.f32 %v1130_v29, %v3020_v18  ;;  %1271 = vst [vmem:[%s1862_s22 + $0x160] sm:$0xff] %v1199_v13  ;;  %v3022_v23 = vmax.f32 %v3021_v11, 0.0  ;;  %v3024_v53 = vmax.f32 %v3023_v38, 0.0  ;;  %v3025_v57 = vld [vmem:[#allocation7_spill] sm:$0xff]  ;;  %v1134_v46 = vld [vmem:[%s1862_s22 + $0x198] sm:$0xff]  ;;  %v1135_v54 = vld [vmem:[%s1862_s22 + $0x1a0] sm:$0xff] }
 0x184   : > { %v3026_v34 = vmax.f32 %v3025_v57, 0.0  ;;  %v1136_v5 = vld [vmem:[%s1862_s22 + $0x1a8] sm:$0xff]  ;;  %1272 = vst [vmem:[%s1862_s22 + $0x168] sm:$0xff] %v1200_v30  ;;  %1273 = vst [vmem:[%s1862_s22 + $0x170] sm:$0xff] %v1201_v4  ;;  %v3027_v50 = vld [vmem:[#allocation6_spill] sm:$0xff] }
 0x185   : > { %v1203_v1 = vmax.f32 %v1131_v41, %v3022_v23  ;;  %v1204_v6 = vmax.f32 %v1132_v49, %v3024_v53  ;;  %1274 = vst [vmem:[%s1862_s22 + $0x178] sm:$0xff] %v1202_v42  ;;  %v3028_v8 = vmax.f32 %v3027_v50, 0.0  ;;  %v3029_v28 = vld [vmem:[#allocation9_spill] sm:$0xff]  ;;  %v3031_v21 = vld [vmem:[#allocation8_spill] sm:$0xff]  ;;  %v1139_v12 = vld [vmem:[%s1862_s22 + $0x1c0] sm:$0xff] }
 0x186   : > { %v1205_v0 = vmax.f32 %v1133_v58, %v3026_v34  ;;  %v3030_v45 = vmax.f32 %v3029_v28, 0.0  ;;  %v3032_v61 = vmax.f32 %v3031_v21, 0.0  ;;  %v1137_v25 = vld [vmem:[%s1862_s22 + $0x1b0] sm:$0xff]  ;;  %v1138_v60 = vld [vmem:[%s1862_s22 + $0x1b8] sm:$0xff]  ;;  %v3033_v2 = vld [vmem:[#allocation11_spill] sm:$0xff] }
 0x187   : > { %v1206_v17 = vmax.f32 %v1134_v46, %v3028_v8  ;;  %1275 = vst [vmem:[%s1862_s22 + $0x180] sm:$0xff] %v1203_v1  ;;  %1276 = vst [vmem:[%s1862_s22 + $0x188] sm:$0xff] %v1204_v6  ;;  %v3034_v20 = vmax.f32 %v3033_v2, 0.0  ;;  %v3035_v37 = vld [vmem:[#allocation10_spill] sm:$0xff]  ;;  %v3037_v52 = vld [vmem:[#allocation13_spill] sm:$0xff]  ;;  %v3063_v2 = vmax.f32 %v2306_v56, 0.0 }
 0x188   : > { %v1207_v59 = vmax.f32 %v1135_v54, %v3030_v45  ;;  %v1208_v24 = vmax.f32 %v1136_v5, %v3032_v61  ;;  %1277 = vst [vmem:[%s1862_s22 + $0x190] sm:$0xff] %v1205_v0  ;;  %v3036_v62 = vmax.f32 %v3035_v37, 0.0  ;;  %v3038_v19 = vmax.f32 %v3037_v52, 0.0  ;;  %v1140_v14 = vld [vmem:[%s1862_s22 + $0x1c8] sm:$0xff]  ;;  %v1141_v27 = vld [vmem:[%s1862_s22 + $0x1d0] sm:$0xff]  ;;  %v1142_v35 = vld [vmem:[%s1862_s22 + $0x1d8] sm:$0xff] }
 0x189   : > { %v1209_v32 = vmax.f32 %v1137_v25, %v3034_v20  ;;  %1278 = vst [vmem:[%s1862_s22 + $0x198] sm:$0xff] %v1206_v17  ;;  %v3039_v43 = vld [vmem:[#allocation12_spill] sm:$0xff]  ;;  %v3041_v9 = vld [vmem:[#allocation15_spill] sm:$0xff]  ;;  %v3043_v47 = vld [vmem:[#allocation14_spill] sm:$0xff] }
 0x18a   : > { %v1210_v7 = vmax.f32 %v1138_v60, %v3036_v62  ;;  %v1211_v31 = vmax.f32 %v1139_v12, %v3038_v19  ;;  %1279 = vst [vmem:[%s1862_s22 + $0x1a0] sm:$0xff] %v1207_v59  ;;  %1280 = vst [vmem:[%s1862_s22 + $0x1a8] sm:$0xff] %v1208_v24  ;;  %v3040_v16 = vmax.f32 %v3039_v43, 0.0  ;;  %v3042_v26 = vmax.f32 %v3041_v9, 0.0  ;;  %v1143_v51 = vld [vmem:[%s1862_s22 + $0x1e0] sm:$0xff]  ;;  %v1144_v13 = vld [vmem:[%s1862_s22 + $0x1e8] sm:$0xff] }
 0x18b   : > { %v3044_v55 = vmax.f32 %v3043_v47, 0.0  ;;  %v1145_v40 = vld [vmem:[%s1862_s22 + $0x1f0] sm:$0xff]  ;;  %1281 = vst [vmem:[%s1862_s22 + $0x1b0] sm:$0xff] %v1209_v32  ;;  %v3045_v48 = vld [vmem:[#allocation17_spill] sm:$0xff]  ;;  %v3049_v4 = vld [vmem:[#allocation19_spill] sm:$0xff]  ;;  %v3061_v59 = vmax.f32 %v2290_v44, 0.0 }
 0x18c   : > { %v1212_v36 = vmax.f32 %v1140_v14, %v3040_v16  ;;  %v1213_v39 = vmax.f32 %v1141_v27, %v3042_v26  ;;  %1282 = vst [vmem:[%s1862_s22 + $0x1b8] sm:$0xff] %v1210_v7  ;;  %1283 = vst [vmem:[%s1862_s22 + $0x1c0] sm:$0xff] %v1211_v31  ;;  %v3046_v29 = vmax.f32 %v3045_v48, 0.0  ;;  %v3047_v30 = vld [vmem:[#allocation16_spill] sm:$0xff]  ;;  %v3050_v15 = vmax.f32 %v3049_v4, 0.0  ;;  %v1146_v42 = vld [vmem:[%s1862_s22 + $0x1f8] sm:$0xff] }
 0x18d   : > { %v1214_v10 = vmax.f32 %v1142_v35, %v3044_v55  ;;  %v3048_v63 = vmax.f32 %v3047_v30, 0.0  ;;  %v1147_v41 = vld [vmem:[%s1862_s22 + $0x200] sm:$0xff]  ;;  %v1148_v49 = vld [vmem:[%s1862_s22 + $0x208] sm:$0xff]  ;;  %v3053_v1 = vld [vmem:[#allocation21_spill] sm:$0xff]  ;;  %v3062_v60 = vmax.f32 %v2284_v33, 0.0 }
 0x18e   : > { %v1215_v3 = vmax.f32 %v1143_v51, %v3046_v29  ;;  %v1217_v18 = vmax.f32 %v1145_v40, %v3050_v15  ;;  %1284 = vst [vmem:[%s1862_s22 + $0x1c8] sm:$0xff] %v1212_v36  ;;  %1285 = vst [vmem:[%s1862_s22 + $0x1d0] sm:$0xff] %v1213_v39  ;;  %v3051_v58 = vld [vmem:[#allocation18_spill] sm:$0xff]  ;;  %v3054_v38 = vmax.f32 %v3053_v1, 0.0  ;;  %v3055_v6 = vld [vmem:[#allocation20_spill] sm:$0xff] }
 0x18f   : > { %v1216_v22 = vmax.f32 %v1144_v13, %v3048_v63  ;;  %1286 = vst [vmem:[%s1862_s22 + $0x1d8] sm:$0xff] %v1214_v10  ;;  %v3052_v11 = vmax.f32 %v3051_v58, 0.0  ;;  %v3056_v57 = vmax.f32 %v3055_v6, 0.0  ;;  %v1149_v0 = vld [vmem:[%s1862_s22 + $0x210] sm:$0xff]  ;;  %v1150_v46 = vld [vmem:[%s1862_s22 + $0x218] sm:$0xff]  ;;  %v1151_v54 = vld [vmem:[%s1862_s22 + $0x220] sm:$0xff] }
 0x190   : > { %v1219_v53 = vmax.f32 %v1147_v41, %v3054_v38  ;;  %1287 = vst [vmem:[%s1862_s22 + $0x1e0] sm:$0xff] %v1215_v3  ;;  %1289 = vst [vmem:[%s1862_s22 + $0x1f0] sm:$0xff] %v1217_v18  ;;  %v3057_v5 = vld [vmem:[#allocation23_spill] sm:$0xff]  ;;  %v3059_v17 = vld [vmem:[#allocation22_spill] sm:$0xff]  ;;  %v1223_v21 = vmax.f32 %v1151_v54, %v3061_v59 }
 0x191   : > { %v1218_v23 = vmax.f32 %v1146_v42, %v3052_v11  ;;  %v1220_v34 = vmax.f32 %v1148_v49, %v3056_v57  ;;  %1288 = vst [vmem:[%s1862_s22 + $0x1e8] sm:$0xff] %v1216_v22  ;;  %v3058_v50 = vmax.f32 %v3057_v5, 0.0  ;;  %v3060_v28 = vmax.f32 %v3059_v17, 0.0  ;;  %v1152_v61 = vld [vmem:[%s1862_s22 + $0x228] sm:$0xff]  ;;  %v1153_v24 = vld [vmem:[%s1862_s22 + $0x230] sm:$0xff]  ;;  %v1154_v25 = vld [vmem:[%s1862_s22 + $0x238] sm:$0xff] }
 0x192   : > { %1291 = vst [vmem:[%s1862_s22 + $0x200] sm:$0xff] %v1219_v53  ;;  %v1224_v12 = vmax.f32 %v1152_v61, %v3062_v60  ;;  %v1225_v20 = vmax.f32 %v1153_v24, %v3063_v2  ;;  %v3064_v32 = vld [vmem:[#allocation24_spill] sm:$0xff]  ;;  %1295 = vst [vmem:[%s1862_s22 + $0x220] sm:$0xff] %v1223_v21 }
 0x193   : > { %v1221_v8 = vmax.f32 %v1149_v0, %v3058_v50  ;;  %v1222_v45 = vmax.f32 %v1150_v46, %v3060_v28  ;;  %1290 = vst [vmem:[%s1862_s22 + $0x1f8] sm:$0xff] %v1218_v23  ;;  %1292 = vst [vmem:[%s1862_s22 + $0x208] sm:$0xff] %v1220_v34  ;;  %v3065_v37 = vmax.f32 %v3064_v32, 0.0 }
 0x194   : > { %1296 = vst [vmem:[%s1862_s22 + $0x228] sm:$0xff] %v1224_v12  ;;  %1297 = vst [vmem:[%s1862_s22 + $0x230] sm:$0xff] %v1225_v20 }
 0x195   : > { %v1226_v62 = vmax.f32 %v1154_v25, %v3065_v37  ;;  %1293 = vst [vmem:[%s1862_s22 + $0x210] sm:$0xff] %v1221_v8  ;;  %1294 = vst [vmem:[%s1862_s22 + $0x218] sm:$0xff] %v1222_v45 }
 0x197   : > { %1298 = vst [vmem:[%s1862_s22 + $0x238] sm:$0xff] %v1226_v62 }
 0x198 PF: > { %s13_s16 = sadd.s32 1, %s1776_s16   ;;  %s3066_s12 = smov %s1768_s14 }
 0x199   : > { %p10_p9 = scmp.ge.s32.totalorder %s13_s16, 10   ;;  %s3067_s13 = smov %s1772_s15 }
 0x19a   : > { %s3068_s14 = smov %s3071_s17  ;;  %s3069_s15 = smov %s3075_s18 }
 0x19b   :  { %12 = sbr.rel (!%p10_p9) target bundleno = 3 (0x3), region = 70 }

// kernel: lfw_convnet_forward.4
= control target key start
LH: loop header
LB: loop body
LE: loop exit
PB: predicated region body
PF: predicated region fallthrough
CT: control target
= control target key end

     0   :  { %s2013_s12 = smov 0   ;;  %s2015_s13 = smov 0   ;;  %s2827_s0 = inlined_call_operand.vmem [shape: f32[4,50,1600], index: 0, kind: input, shape index: {}]   ;;  %s2828_s1 = inlined_call_operand.vmem [shape: f32[1600,128], index: 1, kind: input, shape index: {}]   ;;  %s2829_s2 = inlined_call_operand.vmem [shape: f32[1,128], index: 2, kind: input, shape index: {}]   ;;  %s2830_s3 = inlined_call_operand.vmem [shape: f32[50,128], index: 3, kind: output, shape index: {}]  }
   0x1   :  { %s2017_s14 = smov 0  }
   0x2 LB: > { %s22_s15 = sadd.s32 1, %s1984_s13  ;;  %p1340_p0 = scmp.ge.s32.totalorder %s1988_s14, 1  ;;  %s1988_s14 = sphi %s2017_s14, %s13_s14   ;;  %s1984_s13 = sphi %s2015_s13, %s2832_s13   ;;  %s1980_s12 = sphi %s2013_s12, %s2831_s12  }
   0x3   : > { %p23_p1 = scmp.ge.s32.totalorder %s22_s15, 4  ;;  %p157_p2 = scmp.lt.s32.totalorder %s1988_s14, 5 }
   0x5   : > { %s2834_s15 = smov (%p23_p1, %s22_s15), 0  ;;  %p158_p3 = pnand %p1340_p0, %p157_p2 }
   0x6   : > { %v310_v0 = vld [vmem:[%s2828_s1 + $0x80] sm:$0xff] (!%p158_p3)  ;;  %v311_v1 = vld [vmem:[%s2828_s1 + $0x88] sm:$0xff] (!%p158_p3)  ;;  %v312_v11 = vld [vmem:[%s2828_s1 + $0x90] sm:$0xff] (!%p158_p3)  ;;  %p187_p4 = scmp.lt.s32.totalorder (!%p158_p3), %s1980_s12, 3  ;;  %vm1991_vm0 = vmmov (!%p158_p3), 0   ;;  %vm501_vm1 = vcmask (!%p158_p3), 523264  }
   0x7   : > { %161 = sbr.rel (%p158_p3) target bundleno = 373 (0x175), region = 32  ;;  %v342_v2 = vld [vmem:[%s2828_s1 + $0x180] sm:$0xff] (!%p158_p3)  ;;  %v1726_v3 = vpack.c.bf16 (!%p158_p3), %v311_v1, %v310_v0  ;;  %v343_v4 = vld [vmem:[%s2828_s1 + $0x188] sm:$0xff] (!%p158_p3)  ;;  %v313_v13 = vld [vmem:[%s2828_s1 + $0x98] sm:$0xff] (!%p158_p3)  ;;  %p1350_p5 = scmp.ne.s32.totalorder (!%p158_p3), %s1980_s12, 0 }
   0x8   : > { %v294_v5 = vld [vmem:[%s2828_s1] sm:$0xff] (!%p158_p3)  ;;  %v295_v6 = vld [vmem:[%s2828_s1 + $0x8] sm:$0xff] (!%p158_p3)  ;;  %v1758_v7 = vpack.c.bf16 (!%p158_p3), %v343_v4, %v342_v2  ;;  %v344_v14 = vld [vmem:[%s2828_s1 + $0x190] sm:$0xff] (!%p158_p3)  ;;  %v1730_v16 = vpack.c.bf16 (!%p158_p3), %v313_v13, %v312_v11 }
   0x9   : > { %v1728_v8 = vpack.c.bf16 (!%p158_p3), %v295_v6, %v294_v5  ;;  %v326_v9 = vld [vmem:[%s2828_s1 + $0x100] sm:$0xff] (!%p158_p3)  ;;  %v327_v10 = vld [vmem:[%s2828_s1 + $0x108] sm:$0xff] (!%p158_p3)  ;;  %1727 = vmatprep.subr.bf16.mxu0 (!%p158_p3), %v1726_v3  ;;  %v345_v15 = vld [vmem:[%s2828_s1 + $0x198] sm:$0xff] (!%p158_p3) }
   0xa   : > { %v1760_v12 = vpack.c.bf16 (!%p158_p3), %v327_v10, %v326_v9  ;;  %1759 = vmatprep.subr.bf16.mxu1 (!%p158_p3), %v1758_v7  ;;  %v1762_v17 = vpack.c.bf16 (!%p158_p3), %v345_v15, %v344_v14  ;;  %v296_v18 = vld [vmem:[%s2828_s1 + $0x10] sm:$0xff] (!%p158_p3)  ;;  %v297_v19 = vld [vmem:[%s2828_s1 + $0x18] sm:$0xff] (!%p158_p3)  ;;  %v314_v23 = vld [vmem:[%s2828_s1 + $0xa0] sm:$0xff] (!%p158_p3) }
   0xb   : > { %1729 = vmatpush3.bf16.msra.mxu0 (!%p158_p3), %v1728_v8  ;;  %v328_v20 = vld [vmem:[%s2828_s1 + $0x110] sm:$0xff] (!%p158_p3)  ;;  %v1732_v21 = vpack.c.bf16 (!%p158_p3), %v297_v19, %v296_v18  ;;  %v329_v22 = vld [vmem:[%s2828_s1 + $0x118] sm:$0xff] (!%p158_p3)  ;;  %v315_v24 = vld [vmem:[%s2828_s1 + $0xa8] sm:$0xff] (!%p158_p3) }
   0xc   : > { %1761 = vmatpush3.bf16.msra.mxu1 (!%p158_p3), %v1760_v12  ;;  %1731 = vmatprep.subr.bf16.mxu0 (!%p158_p3), %v1730_v16  ;;  %v1764_v25 = vpack.c.bf16 (!%p158_p3), %v329_v22, %v328_v20  ;;  %v1734_v26 = vpack.c.bf16 (!%p158_p3), %v315_v24, %v314_v23  ;;  %v346_v27 = vld [vmem:[%s2828_s1 + $0x1a0] sm:$0xff] (!%p158_p3)  ;;  %v347_v28 = vld [vmem:[%s2828_s1 + $0x1a8] sm:$0xff] (!%p158_p3)  ;;  %v316_v35 = vld [vmem:[%s2828_s1 + $0xb0] sm:$0xff] (!%p158_p3) }
   0xd   : > { %1763 = vmatprep.subr.bf16.mxu1 (!%p158_p3), %v1762_v17  ;;  %v298_v29 = vld [vmem:[%s2828_s1 + $0x20] sm:$0xff] (!%p158_p3)  ;;  %v1766_v30 = vpack.c.bf16 (!%p158_p3), %v347_v28, %v346_v27  ;;  %v299_v31 = vld [vmem:[%s2828_s1 + $0x28] sm:$0xff] (!%p158_p3)  ;;  %v317_v36 = vld [vmem:[%s2828_s1 + $0xb8] sm:$0xff] (!%p158_p3) }
   0xe   : > { %v330_v32 = vld [vmem:[%s2828_s1 + $0x120] sm:$0xff]  ;;  %v331_v33 = vld [vmem:[%s2828_s1 + $0x128] sm:$0xff]  ;;  %v1736_v34 = vpack.c.bf16 %v299_v31, %v298_v29  ;;  %v348_v37 = vld [vmem:[%s2828_s1 + $0x1b0] sm:$0xff]  ;;  %v1738_v39 = vpack.c.bf16 %v317_v36, %v316_v35  ;;  %s2136_s9 = scalar_select %p187_p4, %s1980_s12, 3 }
   0xf   : > { %1733 = vmatpush3.bf16.msra.mxu0 %v1732_v21  ;;  %v1768_v38 = vpack.c.bf16 %v331_v33, %v330_v32  ;;  %v349_v40 = vld [vmem:[%s2828_s1 + $0x1b8] sm:$0xff]  ;;  %v300_v41 = vld [vmem:[%s2828_s1 + $0x30] sm:$0xff]  ;;  %v318_v46 = vld [vmem:[%s2828_s1 + $0xc0] sm:$0xff] }
  0x10   : > { %1765 = vmatpush3.bf16.msra.mxu1 %v1764_v25  ;;  %1735 = vmatprep.subr.bf16.mxu0 %v1734_v26  ;;  %v301_v42 = vld [vmem:[%s2828_s1 + $0x38] sm:$0xff]  ;;  %v1770_v43 = vpack.c.bf16 %v349_v40, %v348_v37  ;;  %v332_v44 = vld [vmem:[%s2828_s1 + $0x130] sm:$0xff]  ;;  %v319_v47 = vld [vmem:[%s2828_s1 + $0xc8] sm:$0xff]  ;;  %s1938_s5 = smul.u32 728, %s2136_s9 }
  0x11   : > { %1767 = vmatprep.subr.bf16.mxu1 %v1766_v30  ;;  %v333_v45 = vld [vmem:[%s2828_s1 + $0x138] sm:$0xff]  ;;  %v350_v48 = vld [vmem:[%s2828_s1 + $0x1c0] sm:$0xff]  ;;  %v351_v49 = vld [vmem:[%s2828_s1 + $0x1c8] sm:$0xff]  ;;  %v1740_v50 = vpack.c.bf16 %v301_v42, %v300_v41  ;;  %v1742_v52 = vpack.c.bf16 %v319_v47, %v318_v46 }
  0x12   : > { %v1772_v51 = vpack.c.bf16 %v333_v45, %v332_v44  ;;  %v302_v53 = vld [vmem:[%s2828_s1 + $0x40] sm:$0xff]  ;;  %v303_v54 = vld [vmem:[%s2828_s1 + $0x48] sm:$0xff]  ;;  %v1774_v56 = vpack.c.bf16 %v351_v49, %v350_v48  ;;  %v320_v58 = vld [vmem:[%s2828_s1 + $0xd0] sm:$0xff]  ;;  %s2193_s28 = scalar_lea.vmem %s2827_s0, %s1938_s5 }
  0x13   : > { %1737 = vmatpush3.bf16.msra.mxu0 %v1736_v34  ;;  %v334_v55 = vld [vmem:[%s2828_s1 + $0x140] sm:$0xff]  ;;  %v335_v57 = vld [vmem:[%s2828_s1 + $0x148] sm:$0xff]  ;;  %v321_v59 = vld [vmem:[%s2828_s1 + $0xd8] sm:$0xff]  ;;  %v1744_v62 = vpack.c.bf16 %v303_v54, %v302_v53 }
  0x14   : > { %1769 = vmatpush3.bf16.msra.mxu1 %v1768_v38  ;;  %1739 = vmatprep.subr.bf16.mxu0 %v1738_v39  ;;  %v352_v60 = vld [vmem:[%s2828_s1 + $0x1d0] sm:$0xff]  ;;  %v353_v61 = vld [vmem:[%s2828_s1 + $0x1d8] sm:$0xff]  ;;  %v1776_v63 = vpack.c.bf16 %v335_v57, %v334_v55  ;;  %v1746_v0 = vpack.c.bf16 %v321_v59, %v320_v58  ;;  %v322_v6 = vld [vmem:[%s2828_s1 + $0xe0] sm:$0xff] }
  0x15   : > { %1771 = vmatprep.subr.bf16.mxu1 %v1770_v43  ;;  %v304_v1 = vld [vmem:[%s2828_s1 + $0x50] sm:$0xff]  ;;  %v305_v2 = vld [vmem:[%s2828_s1 + $0x58] sm:$0xff]  ;;  %v1778_v4 = vpack.c.bf16 %v353_v61, %v352_v60  ;;  %v323_v7 = vld [vmem:[%s2828_s1 + $0xe8] sm:$0xff] }
  0x16   : > { %v336_v3 = vld [vmem:[%s2828_s1 + $0x150] sm:$0xff]  ;;  %v337_v5 = vld [vmem:[%s2828_s1 + $0x158] sm:$0xff]  ;;  %v354_v8 = vld [vmem:[%s2828_s1 + $0x1e0] sm:$0xff]  ;;  %v1748_v10 = vpack.c.bf16 %v305_v2, %v304_v1  ;;  %v1750_v14 = vpack.c.bf16 %v323_v7, %v322_v6 }
  0x17   : > { %1741 = vmatpush3.bf16.msra.mxu0 %v1740_v50  ;;  %v355_v9 = vld [vmem:[%s2828_s1 + $0x1e8] sm:$0xff]  ;;  %v306_v11 = vld [vmem:[%s2828_s1 + $0x60] sm:$0xff]  ;;  %v1780_v13 = vpack.c.bf16 %v337_v5, %v336_v3  ;;  %v324_v19 = vld [vmem:[%s2828_s1 + $0xf0] sm:$0xff] }
  0x18   : > { %1773 = vmatpush3.bf16.msra.mxu1 %v1772_v51  ;;  %1743 = vmatprep.subr.bf16.mxu0 %v1742_v52  ;;  %v307_v12 = vld [vmem:[%s2828_s1 + $0x68] sm:$0xff]  ;;  %v338_v15 = vld [vmem:[%s2828_s1 + $0x160] sm:$0xff]  ;;  %v1782_v18 = vpack.c.bf16 %v355_v9, %v354_v8  ;;  %v325_v20 = vld [vmem:[%s2828_s1 + $0xf8] sm:$0xff] }
  0x19   : > { %1775 = vmatprep.subr.bf16.mxu1 %v1774_v56  ;;  %v339_v16 = vld [vmem:[%s2828_s1 + $0x168] sm:$0xff]  ;;  %v206_v21 = vld [vmem:[%s2193_s28 + $0x18] sm:$0xff]  ;;  %v356_v22 = vld [vmem:[%s2828_s1 + $0x1f0] sm:$0xff]  ;;  %v1752_v24 = vpack.c.bf16 %v307_v12, %v306_v11  ;;  %v1754_v26 = vpack.c.bf16 %v325_v20, %v324_v19 }
  0x1a   : > { %v204_v17 = vld [vmem:[%s2193_s28 + $0x8] sm:$0xff]  ;;  %v357_v23 = vld [vmem:[%s2828_s1 + $0x1f8] sm:$0xff]  ;;  %687 = vmatprep.mubr.f32.mxu1 %v206_v21  ;;  %v1784_v25 = vpack.c.bf16 %v339_v16, %v338_v15  ;;  %v308_v27 = vld [vmem:[%s2828_s1 + $0x70] sm:$0xff] }
  0x1b   : > { %1745 = vmatpush3.bf16.msra.mxu0 %v1744_v62  ;;  %587 = vmatprep.mubr.f32.mxu0 %v204_v17  ;;  %v309_v28 = vld [vmem:[%s2828_s1 + $0x78] sm:$0xff]  ;;  %v340_v29 = vld [vmem:[%s2828_s1 + $0x170] sm:$0xff]  ;;  %v1786_v30 = vpack.c.bf16 %v357_v23, %v356_v22  ;;  %v374_v32 = vld [vmem:[%s2828_s1 + $0x280] sm:$0xff] }
  0x1c   : > { %1777 = vmatpush3.bf16.msra.mxu1 %v1776_v63  ;;  %1747 = vmatprep.subr.bf16.mxu0 %v1746_v0  ;;  %v341_v31 = vld [vmem:[%s2828_s1 + $0x178] sm:$0xff]  ;;  %v375_v33 = vld [vmem:[%s2828_s1 + $0x288] sm:$0xff]  ;;  %v406_v34 = vld [vmem:[%s2828_s1 + $0x380] sm:$0xff]  ;;  %v1756_v36 = vpack.c.bf16 %v309_v28, %v308_v27 }
  0x1d   : > { %1779 = vmatprep.subr.bf16.mxu1 %v1778_v4  ;;  %v407_v35 = vld [vmem:[%s2828_s1 + $0x388] sm:$0xff]  ;;  %v1788_v37 = vpack.c.bf16 %v341_v31, %v340_v29  ;;  %v1790_v38 = vpack.c.bf16 %v375_v33, %v374_v32  ;;  %v358_v39 = vld [vmem:[%s2828_s1 + $0x200] sm:$0xff]  ;;  %v376_v44 = vld [vmem:[%s2828_s1 + $0x290] sm:$0xff] }
  0x1e   : > { %v359_v40 = vld [vmem:[%s2828_s1 + $0x208] sm:$0xff]  ;;  %v390_v41 = vld [vmem:[%s2828_s1 + $0x300] sm:$0xff]  ;;  %v1822_v42 = vpack.c.bf16 %v407_v35, %v406_v34  ;;  %v377_v45 = vld [vmem:[%s2828_s1 + $0x298] sm:$0xff] }
  0x1f   : > { %1749 = vmatpush3.bf16.msra.mxu0 %v1748_v10  ;;  %v391_v43 = vld [vmem:[%s2828_s1 + $0x308] sm:$0xff]  ;;  %v408_v46 = vld [vmem:[%s2828_s1 + $0x390] sm:$0xff]  ;;  %v409_v47 = vld [vmem:[%s2828_s1 + $0x398] sm:$0xff]  ;;  %v1792_v50 = vpack.c.bf16 %v359_v40, %v358_v39  ;;  %v1794_v52 = vpack.c.bf16 %v377_v45, %v376_v44 }
  0x20   : > { %1781 = vmatpush3.bf16.msra.mxu1 %v1780_v13  ;;  %1751 = vmatprep.subr.bf16.mxu0 %v1750_v14  ;;  %v203_v48 = vld [vmem:[%s2193_s28] sm:$0xff]  ;;  %v205_v49 = vld [vmem:[%s2193_s28 + $0x10] sm:$0xff]  ;;  %v1824_v51 = vpack.c.bf16 %v391_v43, %v390_v41  ;;  %v361_v54 = vld [vmem:[%s2828_s1 + $0x218] sm:$0xff]  ;;  %v1826_v56 = vpack.c.bf16 %v409_v47, %v408_v46 }
  0x21   : > { %1783 = vmatprep.subr.bf16.mxu1 %v1782_v18  ;;  %v360_v53 = vld [vmem:[%s2828_s1 + $0x210] sm:$0xff]  ;;  %v393_v57 = vld [vmem:[%s2828_s1 + $0x318] sm:$0xff]  ;;  %v378_v58 = vld [vmem:[%s2828_s1 + $0x2a0] sm:$0xff] }
  0x22   : > { %v392_v55 = vld [vmem:[%s2828_s1 + $0x310] sm:$0xff]  ;;  %v379_v59 = vld [vmem:[%s2828_s1 + $0x2a8] sm:$0xff]  ;;  %v410_v61 = vld [vmem:[%s2828_s1 + $0x3a0] sm:$0xff]  ;;  %v1796_v63 = vpack.c.bf16 %v361_v54, %v360_v53 }
  0x23   : > { %1753 = vmatpush3.bf16.msra.mxu0 %v1752_v24  ;;  %v217_v60 = vld [vmem:[%s2193_s28 + $0x70] sm:$0xff]  ;;  %v411_v62 = vld [vmem:[%s2828_s1 + $0x3a8] sm:$0xff]  ;;  %v219_v1 = vld [vmem:[%s2193_s28 + $0x80] sm:$0xff]  ;;  %v1828_v3 = vpack.c.bf16 %v393_v57, %v392_v55  ;;  %v1798_v4 = vpack.c.bf16 %v379_v59, %v378_v58 }
  0x24   : > { %1785 = vmatpush3.bf16.msra.mxu1 %v1784_v25  ;;  %1755 = vmatprep.subr.bf16.mxu0 %v1754_v26  ;;  %v216_v0 = vld [vmem:[%s2193_s28 + $0x68] sm:$0xff]  ;;  %v218_v2 = vld [vmem:[%s2193_s28 + $0x78] sm:$0xff]  ;;  %v362_v5 = vld [vmem:[%s2828_s1 + $0x220] sm:$0xff]  ;;  %v1830_v8 = vpack.c.bf16 %v411_v62, %v410_v61 }
  0x25   : > { %1787 = vmatprep.subr.bf16.mxu1 %v1786_v30  ;;  %v363_v6 = vld [vmem:[%s2828_s1 + $0x228] sm:$0xff]  ;;  %v394_v7 = vld [vmem:[%s2828_s1 + $0x320] sm:$0xff]  ;;  %v380_v10 = vld [vmem:[%s2828_s1 + $0x2b0] sm:$0xff] }
  0x26   : > { %v395_v9 = vld [vmem:[%s2828_s1 + $0x328] sm:$0xff]  ;;  %v381_v11 = vld [vmem:[%s2828_s1 + $0x2b8] sm:$0xff]  ;;  %v412_v13 = vld [vmem:[%s2828_s1 + $0x3b0] sm:$0xff]  ;;  %v1800_v15 = vpack.c.bf16 %v363_v6, %v362_v5 }
  0x27   : > { %1757 = vmatpush3.bf16.msra.mxu0 %v1756_v36  ;;  %v230_v12 = vld [vmem:[%s2193_s28 + $0xd8] sm:$0xff]  ;;  %v229_v16 = vld [vmem:[%s2193_s28 + $0xd0] sm:$0xff]  ;;  %v232_v17 = vld [vmem:[%s2193_s28 + $0xe8] sm:$0xff]  ;;  %v1832_v19 = vpack.c.bf16 %v395_v9, %v394_v7  ;;  %v1802_v20 = vpack.c.bf16 %v381_v11, %v380_v10 }
  0x28   : > { %1789 = vmatpush3.bf16.msra.mxu1 %v1788_v37  ;;  %1791 = vmatprep.subr.bf16.mxu0 %v1790_v38  ;;  %v413_v14 = vld [vmem:[%s2828_s1 + $0x3b8] sm:$0xff]  ;;  %v231_v18 = vld [vmem:[%s2193_s28 + $0xe0] sm:$0xff]  ;;  %v364_v21 = vld [vmem:[%s2828_s1 + $0x230] sm:$0xff] }
  0x29   : > { %1823 = vmatprep.subr.bf16.mxu1 %v1822_v42  ;;  %v365_v22 = vld [vmem:[%s2828_s1 + $0x238] sm:$0xff]  ;;  %v396_v23 = vld [vmem:[%s2828_s1 + $0x330] sm:$0xff]  ;;  %v1834_v24 = vpack.c.bf16 %v413_v14, %v412_v13  ;;  %v382_v26 = vld [vmem:[%s2828_s1 + $0x2c0] sm:$0xff] }
  0x2a   : > { %588 = vmatmul.mubr.f32.vlgmr.msra.gmra.mrb[0].mxu0 %v203_v48  ;;  %v397_v25 = vld [vmem:[%s2828_s1 + $0x338] sm:$0xff]  ;;  %v383_v27 = vld [vmem:[%s2828_s1 + $0x2c8] sm:$0xff]  ;;  %v243_v28 = vld [vmem:[%s2193_s28 + $0x140] sm:$0xff]  ;;  %v1804_v31 = vpack.c.bf16 %v365_v22, %v364_v21 }
  0x2b   : > { %688 = vmatmul.mubr.f32.vlgmr.msra.gmra.mrb[0].mxu1 %v205_v49  ;;  %1793 = vmatpush3.bf16.msra.mxu0 %v1792_v50  ;;  %v414_v29 = vld [vmem:[%s2828_s1 + $0x3c0] sm:$0xff]  ;;  %v415_v30 = vld [vmem:[%s2828_s1 + $0x3c8] sm:$0xff]  ;;  %v242_v32 = vld [vmem:[%s2193_s28 + $0x138] sm:$0xff]  ;;  %v1836_v35 = vpack.c.bf16 %v397_v25, %v396_v23  ;;  %v1806_v36 = vpack.c.bf16 %v383_v27, %v382_v26 }
  0x2c   : > { %1825 = vmatpush3.bf16.msra.mxu1 %v1824_v51  ;;  %1795 = vmatprep.subr.bf16.mxu0 %v1794_v52  ;;  %v245_v33 = vld [vmem:[%s2193_s28 + $0x150] sm:$0xff]  ;;  %v244_v34 = vld [vmem:[%s2193_s28 + $0x148] sm:$0xff]  ;;  %v366_v37 = vld [vmem:[%s2828_s1 + $0x240] sm:$0xff]  ;;  %v1838_v40 = vpack.c.bf16 %v415_v30, %v414_v29 }
  0x2d   : > { %1827 = vmatprep.subr.bf16.mxu1 %v1826_v56  ;;  %592 = vmatprep.mubr.f32.mxu0 %v217_v60  ;;  %v367_v38 = vld [vmem:[%s2828_s1 + $0x248] sm:$0xff]  ;;  %v398_v39 = vld [vmem:[%s2828_s1 + $0x340] sm:$0xff]  ;;  %v384_v42 = vld [vmem:[%s2828_s1 + $0x2d0] sm:$0xff] }
  0x2e   : > { %593 = vmatmul.mubr.f32.gmra.mrb[2].mxu0 %v216_v0  ;;  %692 = vmatprep.mubr.f32.mxu1 %v219_v1  ;;  %v399_v41 = vld [vmem:[%s2828_s1 + $0x348] sm:$0xff]  ;;  %v385_v43 = vld [vmem:[%s2828_s1 + $0x2d8] sm:$0xff]  ;;  %v416_v45 = vld [vmem:[%s2828_s1 + $0x3d0] sm:$0xff]  ;;  %v1808_v47 = vpack.c.bf16 %v367_v38, %v366_v37 }
  0x2f   : > { %1797 = vmatpush3.bf16.msra.mxu0 %v1796_v63  ;;  %693 = vmatmul.mubr.f32.gmra.mrb[2].mxu1 %v218_v2  ;;  %v256_v44 = vld [vmem:[%s2193_s28 + $0x1a8] sm:$0xff]  ;;  %v417_v46 = vld [vmem:[%s2828_s1 + $0x3d8] sm:$0xff]  ;;  %v255_v48 = vld [vmem:[%s2193_s28 + $0x1a0] sm:$0xff]  ;;  %v1840_v51 = vpack.c.bf16 %v399_v41, %v398_v39  ;;  %v1810_v52 = vpack.c.bf16 %v385_v43, %v384_v42 }
  0x30   : > { %1829 = vmatpush3.bf16.msra.mxu1 %v1828_v3  ;;  %1799 = vmatprep.subr.bf16.mxu0 %v1798_v4  ;;  %v258_v49 = vld [vmem:[%s2193_s28 + $0x1b8] sm:$0xff]  ;;  %v257_v50 = vld [vmem:[%s2193_s28 + $0x1b0] sm:$0xff]  ;;  %v1842_v56 = vpack.c.bf16 %v417_v46, %v416_v45  ;;  %v386_v58 = vld [vmem:[%s2828_s1 + $0x2e0] sm:$0xff] }
  0x31   : > { %1831 = vmatprep.subr.bf16.mxu1 %v1830_v8  ;;  %597 = vmatprep.mubr.f32.mxu0 %v230_v12  ;;  %v368_v53 = vld [vmem:[%s2828_s1 + $0x250] sm:$0xff]  ;;  %v369_v54 = vld [vmem:[%s2828_s1 + $0x258] sm:$0xff]  ;;  %v387_v59 = vld [vmem:[%s2828_s1 + $0x2e8] sm:$0xff] }
  0x32   : > { %598 = vmatmul.mubr.f32.gmra.mrb[4].mxu0 %v229_v16  ;;  %697 = vmatprep.mubr.f32.mxu1 %v232_v17  ;;  %v400_v55 = vld [vmem:[%s2828_s1 + $0x350] sm:$0xff]  ;;  %v401_v57 = vld [vmem:[%s2828_s1 + $0x358] sm:$0xff]  ;;  %v418_v61 = vld [vmem:[%s2828_s1 + $0x3e0] sm:$0xff]  ;;  %v1812_v63 = vpack.c.bf16 %v369_v54, %v368_v53  ;;  %v1814_v4 = vpack.c.bf16 %v387_v59, %v386_v58 }
  0x33   : > { %1801 = vmatpush3.bf16.msra.mxu0 %v1800_v15  ;;  %698 = vmatmul.mubr.f32.gmra.mrb[4].mxu1 %v231_v18  ;;  %v269_v60 = vld [vmem:[%s2193_s28 + $0x210] sm:$0xff]  ;;  %v419_v62 = vld [vmem:[%s2828_s1 + $0x3e8] sm:$0xff]  ;;  %v271_v1 = vld [vmem:[%s2193_s28 + $0x220] sm:$0xff]  ;;  %v1844_v3 = vpack.c.bf16 %v401_v57, %v400_v55 }
  0x34   : > { %1833 = vmatpush3.bf16.msra.mxu1 %v1832_v19  ;;  %1803 = vmatprep.subr.bf16.mxu0 %v1802_v20  ;;  %v268_v0 = vld [vmem:[%s2193_s28 + $0x208] sm:$0xff]  ;;  %v270_v2 = vld [vmem:[%s2193_s28 + $0x218] sm:$0xff]  ;;  %v370_v5 = vld [vmem:[%s2828_s1 + $0x260] sm:$0xff]  ;;  %v1846_v8 = vpack.c.bf16 %v419_v62, %v418_v61 }
  0x35   : > { %1835 = vmatprep.subr.bf16.mxu1 %v1834_v24  ;;  %602 = vmatprep.mubr.f32.mxu0 %v243_v28  ;;  %v371_v6 = vld [vmem:[%s2828_s1 + $0x268] sm:$0xff]  ;;  %v402_v7 = vld [vmem:[%s2828_s1 + $0x360] sm:$0xff]  ;;  %v388_v10 = vld [vmem:[%s2828_s1 + $0x2f0] sm:$0xff] }
  0x36   : > { %603 = vmatmul.mubr.f32.gmra.mrb[6].mxu0 %v242_v32  ;;  %702 = vmatprep.mubr.f32.mxu1 %v245_v33  ;;  %v403_v9 = vld [vmem:[%s2828_s1 + $0x368] sm:$0xff]  ;;  %v389_v11 = vld [vmem:[%s2828_s1 + $0x2f8] sm:$0xff]  ;;  %v420_v13 = vld [vmem:[%s2828_s1 + $0x3f0] sm:$0xff]  ;;  %v1816_v15 = vpack.c.bf16 %v371_v6, %v370_v5 }
  0x37   : > { %1805 = vmatpush3.bf16.msra.mxu0 %v1804_v31  ;;  %703 = vmatmul.mubr.f32.gmra.mrb[6].mxu1 %v244_v34  ;;  %v282_v12 = vld [vmem:[%s2193_s28 + $0x278] sm:$0x3]  ;;  %v281_v16 = vld [vmem:[%s2193_s28 + $0x270] sm:$0x3]  ;;  %v284_v17 = vld [vmem:[%s2193_s28 + $0x288] sm:$0x3]  ;;  %v1848_v19 = vpack.c.bf16 %v403_v9, %v402_v7  ;;  %v1818_v20 = vpack.c.bf16 %v389_v11, %v388_v10 }
  0x38   : > { %1837 = vmatpush3.bf16.msra.mxu1 %v1836_v35  ;;  %1807 = vmatprep.subr.bf16.mxu0 %v1806_v36  ;;  %v421_v14 = vld [vmem:[%s2828_s1 + $0x3f8] sm:$0xff]  ;;  %v283_v18 = vld [vmem:[%s2193_s28 + $0x280] sm:$0x3]  ;;  %v372_v21 = vld [vmem:[%s2828_s1 + $0x270] sm:$0xff] }
  0x39   : > { %1839 = vmatprep.subr.bf16.mxu1 %v1838_v40  ;;  %607 = vmatprep.mubr.f32.mxu0 %v256_v44  ;;  %v373_v22 = vld [vmem:[%s2828_s1 + $0x278] sm:$0xff]  ;;  %v404_v23 = vld [vmem:[%s2828_s1 + $0x370] sm:$0xff]  ;;  %v1850_v24 = vpack.c.bf16 %v421_v14, %v420_v13  ;;  %v438_v26 = vld [vmem:[%s2828_s1 + $0x480] sm:$0xff] }
  0x3a   : > { %608 = vmatmul.mubr.f32.gmra.mrb[8].mxu0 %v255_v48  ;;  %707 = vmatprep.mubr.f32.mxu1 %v258_v49  ;;  %v405_v25 = vld [vmem:[%s2828_s1 + $0x378] sm:$0xff]  ;;  %v439_v27 = vld [vmem:[%s2828_s1 + $0x488] sm:$0xff]  ;;  %v470_v29 = vld [vmem:[%s2828_s1 + $0x580] sm:$0xff]  ;;  %v1820_v31 = vpack.c.bf16 %v373_v22, %v372_v21 }
  0x3b   : > { %1809 = vmatpush3.bf16.msra.mxu0 %v1808_v47  ;;  %708 = vmatmul.mubr.f32.gmra.mrb[8].mxu1 %v257_v50  ;;  %v208_v28 = vld [vmem:[%s2193_s28 + $0x28] sm:$0xff]  ;;  %v210_v32 = vld [vmem:[%s2193_s28 + $0x38] sm:$0xff]  ;;  %v1852_v33 = vpack.c.bf16 %v405_v25, %v404_v23  ;;  %v1854_v34 = vpack.c.bf16 %v439_v27, %v438_v26  ;;  %v422_v35 = vld [vmem:[%s2828_s1 + $0x400] sm:$0xff] }
  0x3c   : > { %1841 = vmatpush3.bf16.msra.mxu1 %v1840_v51  ;;  %1811 = vmatprep.subr.bf16.mxu0 %v1810_v52  ;;  %v471_v30 = vld [vmem:[%s2828_s1 + $0x588] sm:$0xff]  ;;  %v454_v38 = vld [vmem:[%s2828_s1 + $0x500] sm:$0xff]  ;;  %v440_v40 = vld [vmem:[%s2828_s1 + $0x490] sm:$0xff] }
  0x3d   : > { %1843 = vmatprep.subr.bf16.mxu1 %v1842_v56  ;;  %612 = vmatprep.mubr.f32.mxu0 %v269_v60  ;;  %v423_v36 = vld [vmem:[%s2828_s1 + $0x408] sm:$0xff]  ;;  %v1886_v37 = vpack.c.bf16 %v471_v30, %v470_v29  ;;  %v441_v41 = vld [vmem:[%s2828_s1 + $0x498] sm:$0xff]  ;;  %v472_v42 = vld [vmem:[%s2828_s1 + $0x590] sm:$0xff] }
  0x3e   : > { %613 = vmatmul.mubr.f32.gmra.mrb[10].mxu0 %v268_v0  ;;  %712 = vmatprep.mubr.f32.mxu1 %v271_v1  ;;  %v455_v39 = vld [vmem:[%s2828_s1 + $0x508] sm:$0xff]  ;;  %v473_v43 = vld [vmem:[%s2828_s1 + $0x598] sm:$0xff]  ;;  %v207_v44 = vld [vmem:[%s2193_s28 + $0x20] sm:$0xff]  ;;  %v1856_v46 = vpack.c.bf16 %v423_v36, %v422_v35  ;;  %v1858_v51 = vpack.c.bf16 %v441_v41, %v440_v40 }
  0x3f   : > { %1813 = vmatpush3.bf16.msra.mxu0 %v1812_v63  ;;  %713 = vmatmul.mubr.f32.gmra.mrb[10].mxu1 %v270_v2  ;;  %v209_v45 = vld [vmem:[%s2193_s28 + $0x30] sm:$0xff]  ;;  %v1888_v47 = vpack.c.bf16 %v455_v39, %v454_v38  ;;  %v425_v50 = vld [vmem:[%s2828_s1 + $0x418] sm:$0xff]  ;;  %v1890_v52 = vpack.c.bf16 %v473_v43, %v472_v42  ;;  %v442_v55 = vld [vmem:[%s2828_s1 + $0x4a0] sm:$0xff] }
  0x40   : > { %1845 = vmatpush3.bf16.msra.mxu1 %v1844_v3  ;;  %1815 = vmatprep.subr.bf16.mxu0 %v1814_v4  ;;  %v221_v48 = vld [vmem:[%s2193_s28 + $0x90] sm:$0xff]  ;;  %v457_v54 = vld [vmem:[%s2828_s1 + $0x518] sm:$0xff]  ;;  %v443_v56 = vld [vmem:[%s2828_s1 + $0x4a8] sm:$0xff] }
  0x41   : > { %1847 = vmatprep.subr.bf16.mxu1 %v1846_v8  ;;  %617 = vmatprep.mubr.f32.mxu0 %v282_v12  ;;  %v424_v49 = vld [vmem:[%s2828_s1 + $0x410] sm:$0xff]  ;;  %v474_v57 = vld [vmem:[%s2828_s1 + $0x5a0] sm:$0xff]  ;;  %v475_v58 = vld [vmem:[%s2828_s1 + $0x5a8] sm:$0xff]  ;;  %v1862_v3 = vpack.c.bf16 %v443_v56, %v442_v55 }
  0x42   : > { %618 = vmatmul.mubr.f32.gmra.mrb[12].mxu0 %v281_v16  ;;  %717 = vmatprep.mubr.f32.mxu1 %v284_v17  ;;  %v456_v53 = vld [vmem:[%s2828_s1 + $0x510] sm:$0xff]  ;;  %v220_v59 = vld [vmem:[%s2193_s28 + $0x88] sm:$0xff]  ;;  %v223_v60 = vld [vmem:[%s2193_s28 + $0xa0] sm:$0xff]  ;;  %v1860_v61 = vpack.c.bf16 %v425_v50, %v424_v49  ;;  %v1894_v4 = vpack.c.bf16 %v475_v58, %v474_v57 }
  0x43   : > { %1817 = vmatpush3.bf16.msra.mxu0 %v1816_v15  ;;  %718 = vmatmul.mubr.f32.gmra.mrb[12].mxu1 %v283_v18  ;;  %v222_v62 = vld [vmem:[%s2193_s28 + $0x98] sm:$0xff]  ;;  %v1892_v63 = vpack.c.bf16 %v457_v54, %v456_v53  ;;  %v426_v1 = vld [vmem:[%s2828_s1 + $0x420] sm:$0xff]  ;;  %v427_v2 = vld [vmem:[%s2828_s1 + $0x428] sm:$0xff] }
  0x44   : > { %1849 = vmatpush3.bf16.msra.mxu1 %v1848_v19  ;;  %1819 = vmatprep.subr.bf16.mxu0 %v1818_v20  ;;  %v234_v0 = vld [vmem:[%s2193_s28 + $0xf8] sm:$0xff]  ;;  %v458_v5 = vld [vmem:[%s2828_s1 + $0x520] sm:$0xff]  ;;  %v459_v6 = vld [vmem:[%s2828_s1 + $0x528] sm:$0xff]  ;;  %v1864_v13 = vpack.c.bf16 %v427_v2, %v426_v1 }
  0x45   : > { %1851 = vmatprep.subr.bf16.mxu1 %v1850_v24  ;;  %787 = vmatprep.mubr.f32.mxu0 %v208_v28  ;;  %v444_v7 = vld [vmem:[%s2828_s1 + $0x4b0] sm:$0xff]  ;;  %v445_v8 = vld [vmem:[%s2828_s1 + $0x4b8] sm:$0xff]  ;;  %v236_v12 = vld [vmem:[%s2193_s28 + $0x108] sm:$0xff]  ;;  %v1896_v15 = vpack.c.bf16 %v459_v6, %v458_v5 }
  0x46   : > { %887 = vmatprep.mubr.f32.mxu1 %v210_v32  ;;  %v476_v9 = vld [vmem:[%s2828_s1 + $0x5b0] sm:$0xff]  ;;  %v477_v10 = vld [vmem:[%s2828_s1 + $0x5b8] sm:$0xff]  ;;  %v235_v14 = vld [vmem:[%s2193_s28 + $0x100] sm:$0xff]  ;;  %v1866_v19 = vpack.c.bf16 %v445_v8, %v444_v7 }
  0x47   : > { %1821 = vmatpush3.bf16.msra.mxu0 %v1820_v31  ;;  %v233_v11 = vld [vmem:[%s2193_s28 + $0xf0] sm:$0xff]  ;;  %v247_v16 = vld [vmem:[%s2193_s28 + $0x160] sm:$0xff]  ;;  %v429_v18 = vld [vmem:[%s2828_s1 + $0x438] sm:$0xff]  ;;  %v1898_v20 = vpack.c.bf16 %v477_v10, %v476_v9 }
  0x48   : > { %1853 = vmatpush3.bf16.msra.mxu1 %v1852_v33  ;;  %1855 = vmatprep.subr.bf16.mxu0 %v1854_v34  ;;  %v428_v17 = vld [vmem:[%s2828_s1 + $0x430] sm:$0xff]  ;;  %v461_v22 = vld [vmem:[%s2828_s1 + $0x538] sm:$0xff]  ;;  %v446_v23 = vld [vmem:[%s2828_s1 + $0x4c0] sm:$0xff] }
  0x49   : > { %1887 = vmatprep.subr.bf16.mxu1 %v1886_v37  ;;  %v460_v21 = vld [vmem:[%s2828_s1 + $0x530] sm:$0xff]  ;;  %v447_v24 = vld [vmem:[%s2828_s1 + $0x4c8] sm:$0xff]  ;;  %v478_v25 = vld [vmem:[%s2828_s1 + $0x5c0] sm:$0xff]  ;;  %v1868_v29 = vpack.c.bf16 %v429_v18, %v428_v17 }
  0x4a   : > { %788 = vmatmul.mubr.f32.vlgmr.msra.gmra.mrb[14].mxu0 %v207_v44  ;;  %v479_v26 = vld [vmem:[%s2828_s1 + $0x5c8] sm:$0xff]  ;;  %v246_v27 = vld [vmem:[%s2193_s28 + $0x158] sm:$0xff]  ;;  %v249_v28 = vld [vmem:[%s2193_s28 + $0x170] sm:$0xff]  ;;  %v1900_v31 = vpack.c.bf16 %v461_v22, %v460_v21  ;;  %v1870_v35 = vpack.c.bf16 %v447_v24, %v446_v23 }
  0x4b   : > { %888 = vmatmul.mubr.f32.vlgmr.msra.gmra.mrb[14].mxu1 %v209_v45  ;;  %1857 = vmatpush3.bf16.msra.mxu0 %v1856_v46  ;;  %v248_v30 = vld [vmem:[%s2193_s28 + $0x168] sm:$0xff]  ;;  %v430_v33 = vld [vmem:[%s2828_s1 + $0x440] sm:$0xff]  ;;  %v1902_v36 = vpack.c.bf16 %v479_v26, %v478_v25  ;;  %v448_v39 = vld [vmem:[%s2828_s1 + $0x4d0] sm:$0xff] }
  0x4c   : > { %1889 = vmatpush3.bf16.msra.mxu1 %v1888_v47  ;;  %792 = vmatprep.mubr.f32.mxu0 %v221_v48  ;;  %v260_v32 = vld [vmem:[%s2193_s28 + $0x1c8] sm:$0xff]  ;;  %v462_v37 = vld [vmem:[%s2828_s1 + $0x540] sm:$0xff]  ;;  %v449_v40 = vld [vmem:[%s2828_s1 + $0x4d8] sm:$0xff] }
  0x4d   : > { %1859 = vmatprep.subr.bf16.mxu0 %v1858_v51  ;;  %1891 = vmatprep.subr.bf16.mxu1 %v1890_v52  ;;  %v431_v34 = vld [vmem:[%s2828_s1 + $0x448] sm:$0xff]  ;;  %v480_v41 = vld [vmem:[%s2828_s1 + $0x5d0] sm:$0xff]  ;;  %v481_v42 = vld [vmem:[%s2828_s1 + $0x5d8] sm:$0xff]  ;;  %v1874_v52 = vpack.c.bf16 %v449_v40, %v448_v39 }
  0x4e   : > { %793 = vmatmul.mubr.f32.gmra.mrb[16].mxu0 %v220_v59  ;;  %892 = vmatprep.mubr.f32.mxu1 %v223_v60  ;;  %v463_v38 = vld [vmem:[%s2828_s1 + $0x548] sm:$0xff]  ;;  %v259_v43 = vld [vmem:[%s2193_s28 + $0x1c0] sm:$0xff]  ;;  %v262_v44 = vld [vmem:[%s2193_s28 + $0x1d8] sm:$0xff]  ;;  %v1872_v45 = vpack.c.bf16 %v431_v34, %v430_v33  ;;  %v1906_v53 = vpack.c.bf16 %v481_v42, %v480_v41 }
  0x4f   : > { %1861 = vmatpush3.bf16.msra.mxu0 %v1860_v61  ;;  %893 = vmatmul.mubr.f32.gmra.mrb[16].mxu1 %v222_v62  ;;  %v261_v46 = vld [vmem:[%s2193_s28 + $0x1d0] sm:$0xff]  ;;  %v1904_v47 = vpack.c.bf16 %v463_v38, %v462_v37  ;;  %v433_v50 = vld [vmem:[%s2828_s1 + $0x458] sm:$0xff]  ;;  %v272_v51 = vld [vmem:[%s2193_s28 + $0x228] sm:$0xff] }
  0x50   : > { %1893 = vmatpush3.bf16.msra.mxu1 %v1892_v63  ;;  %797 = vmatprep.mubr.f32.mxu0 %v234_v0  ;;  %v273_v48 = vld [vmem:[%s2193_s28 + $0x230] sm:$0xff]  ;;  %v465_v55 = vld [vmem:[%s2828_s1 + $0x558] sm:$0xff]  ;;  %v450_v56 = vld [vmem:[%s2828_s1 + $0x4e0] sm:$0xff] }
  0x51   : > { %1863 = vmatprep.subr.bf16.mxu0 %v1862_v3  ;;  %1895 = vmatprep.subr.bf16.mxu1 %v1894_v4  ;;  %v432_v49 = vld [vmem:[%s2828_s1 + $0x450] sm:$0xff]  ;;  %v451_v57 = vld [vmem:[%s2828_s1 + $0x4e8] sm:$0xff]  ;;  %v482_v58 = vld [vmem:[%s2828_s1 + $0x5e0] sm:$0xff] }
  0x52   : > { %798 = vmatmul.mubr.f32.gmra.mrb[18].mxu0 %v233_v11  ;;  %897 = vmatprep.mubr.f32.mxu1 %v236_v12  ;;  %v464_v54 = vld [vmem:[%s2828_s1 + $0x550] sm:$0xff]  ;;  %v483_v59 = vld [vmem:[%s2828_s1 + $0x5e8] sm:$0xff]  ;;  %v275_v60 = vld [vmem:[%s2193_s28 + $0x240] sm:$0xff]  ;;  %v1876_v61 = vpack.c.bf16 %v433_v50, %v432_v49  ;;  %v1878_v4 = vpack.c.bf16 %v451_v57, %v450_v56 }
  0x53   : > { %1865 = vmatpush3.bf16.msra.mxu0 %v1864_v13  ;;  %898 = vmatmul.mubr.f32.gmra.mrb[18].mxu1 %v235_v14  ;;  %v274_v62 = vld [vmem:[%s2193_s28 + $0x238] sm:$0xff]  ;;  %v1908_v0 = vpack.c.bf16 %v465_v55, %v464_v54  ;;  %v434_v1 = vld [vmem:[%s2828_s1 + $0x460] sm:$0xff]  ;;  %v435_v2 = vld [vmem:[%s2828_s1 + $0x468] sm:$0xff]  ;;  %v1910_v5 = vpack.c.bf16 %v483_v59, %v482_v58 }
  0x54   : > { %1897 = vmatpush3.bf16.msra.mxu1 %v1896_v15  ;;  %802 = vmatprep.mubr.f32.mxu0 %v247_v16  ;;  %v286_v63 = vld [vmem:[%s2193_s28 + $0x298] sm:$0x3]  ;;  %v466_v3 = vld [vmem:[%s2828_s1 + $0x560] sm:$0xff]  ;;  %v467_v6 = vld [vmem:[%s2828_s1 + $0x568] sm:$0xff]  ;;  %v1880_v13 = vpack.c.bf16 %v435_v2, %v434_v1  ;;  %v1992_v1 = vmov 0.0  }
  0x55   : > { %1867 = vmatprep.subr.bf16.mxu0 %v1866_v19  ;;  %1899 = vmatprep.subr.bf16.mxu1 %v1898_v20  ;;  %v452_v7 = vld [vmem:[%s2828_s1 + $0x4f0] sm:$0xff]  ;;  %v453_v8 = vld [vmem:[%s2828_s1 + $0x4f8] sm:$0xff]  ;;  %v288_v12 = vld [vmem:[%s2193_s28 + $0x2a8] sm:$0x3]  ;;  %v1912_v14 = vpack.c.bf16 %v467_v6, %v466_v3 }
  0x56   : > { %803 = vmatmul.mubr.f32.gmra.mrb[20].mxu0 %v246_v27  ;;  %902 = vmatprep.mubr.f32.mxu1 %v249_v28  ;;  %v484_v9 = vld [vmem:[%s2828_s1 + $0x5f0] sm:$0xff]  ;;  %v485_v10 = vld [vmem:[%s2828_s1 + $0x5f8] sm:$0xff]  ;;  %v287_v15 = vld [vmem:[%s2193_s28 + $0x2a0] sm:$0x3]  ;;  %v1882_v16 = vpack.c.bf16 %v453_v8, %v452_v7 }
  0x57   : > { %1869 = vmatpush3.bf16.msra.mxu0 %v1868_v29  ;;  %903 = vmatmul.mubr.f32.gmra.mrb[20].mxu1 %v248_v30  ;;  %v285_v11 = vld [vmem:[%s2193_s28 + $0x290] sm:$0x3]  ;;  %v437_v18 = vld [vmem:[%s2828_s1 + $0x478] sm:$0xff]  ;;  %v1914_v19 = vpack.c.bf16 %v485_v10, %v484_v9  ;;  %v212_v22 = vld [vmem:[%s2193_s28 + $0x48] sm:$0xff] }
  0x58   : > { %1901 = vmatpush3.bf16.msra.mxu1 %v1900_v31  ;;  %807 = vmatprep.mubr.f32.mxu0 %v260_v32  ;;  %v436_v17 = vld [vmem:[%s2828_s1 + $0x470] sm:$0xff]  ;;  %v469_v21 = vld [vmem:[%s2828_s1 + $0x578] sm:$0xff]  ;;  %v486_v26 = vld [vmem:[%s2828_s1 + $0x600] sm:$0xff]  ;;  %v1990_v31 = vmov 0.0|0.0  }
  0x59   : > { %1871 = vmatprep.subr.bf16.mxu0 %v1870_v35  ;;  %1903 = vmatprep.subr.bf16.mxu1 %v1902_v36  ;;  %v468_v20 = vld [vmem:[%s2828_s1 + $0x570] sm:$0xff]  ;;  %v1884_v23 = vpack.c.bf16 %v437_v18, %v436_v17  ;;  %v214_v24 = vld [vmem:[%s2193_s28 + $0x58] sm:$0xff]  ;;  %v487_v27 = vld [vmem:[%s2828_s1 + $0x608] sm:$0xff] }
  0x5a   : > { %808 = vmatmul.mubr.f32.gmra.mrb[22].mxu0 %v259_v43  ;;  %907 = vmatprep.mubr.f32.mxu1 %v262_v44  ;;  %v1916_v25 = vpack.c.bf16 %v469_v21, %v468_v20  ;;  %v211_v28 = vld [vmem:[%s2193_s28 + $0x40] sm:$0xff]  ;;  %v1919_v29 = vpack.c.bf16 %v487_v27, %v486_v26  ;;  %v213_v30 = vld [vmem:[%s2193_s28 + $0x50] sm:$0xff]  ;;  %v489_v35 = vld [vmem:[%s2828_s1 + $0x618] sm:$0xff] }
  0x5b   : > { %1873 = vmatpush3.bf16.msra.mxu0 %v1872_v45  ;;  %908 = vmatmul.mubr.f32.gmra.mrb[22].mxu1 %v261_v46  ;;  %v225_v32 = vld [vmem:[%s2193_s28 + $0xb0] sm:$0xff]  ;;  %v227_v33 = vld [vmem:[%s2193_s28 + $0xc0] sm:$0xff]  ;;  %v224_v36 = vld [vmem:[%s2193_s28 + $0xa8] sm:$0xff] }
  0x5c   : > { %1905 = vmatpush3.bf16.msra.mxu1 %v1904_v47  ;;  %812 = vmatprep.mubr.f32.mxu0 %v273_v48  ;;  %v488_v34 = vld [vmem:[%s2828_s1 + $0x610] sm:$0xff]  ;;  %v226_v37 = vld [vmem:[%s2193_s28 + $0xb8] sm:$0xff]  ;;  %v240_v40 = vld [vmem:[%s2193_s28 + $0x128] sm:$0xff] }
  0x5d   : > { %1875 = vmatprep.subr.bf16.mxu0 %v1874_v52  ;;  %1907 = vmatprep.subr.bf16.mxu1 %v1906_v53  ;;  %v238_v38 = vld [vmem:[%s2193_s28 + $0x118] sm:$0xff]  ;;  %v1922_v39 = vpack.c.bf16 %v489_v35, %v488_v34  ;;  %v490_v41 = vld [vmem:[%s2828_s1 + $0x620] sm:$0xff]  ;;  %v491_v42 = vld [vmem:[%s2828_s1 + $0x628] sm:$0xff] }
  0x5e   : > { %813 = vmatmul.mubr.f32.gmra.mrb[24].mxu0 %v272_v51  ;;  %912 = vmatprep.mubr.f32.mxu1 %v275_v60  ;;  %v237_v43 = vld [vmem:[%s2193_s28 + $0x110] sm:$0xff]  ;;  %v239_v44 = vld [vmem:[%s2193_s28 + $0x120] sm:$0xff]  ;;  %v1925_v46 = vpack.c.bf16 %v491_v42, %v490_v41  ;;  %v493_v49 = vld [vmem:[%s2828_s1 + $0x638] sm:$0xff] }
  0x5f   : > { %1877 = vmatpush3.bf16.msra.mxu0 %v1876_v61  ;;  %913 = vmatmul.mubr.f32.gmra.mrb[24].mxu1 %v274_v62  ;;  %v251_v45 = vld [vmem:[%s2193_s28 + $0x180] sm:$0xff]  ;;  %v253_v47 = vld [vmem:[%s2193_s28 + $0x190] sm:$0xff]  ;;  %v250_v50 = vld [vmem:[%s2193_s28 + $0x178] sm:$0xff] }
  0x60   : > { %1909 = vmatpush3.bf16.msra.mxu1 %v1908_v0  ;;  %817 = vmatprep.mubr.f32.mxu0 %v286_v63  ;;  %v492_v48 = vld [vmem:[%s2828_s1 + $0x630] sm:$0xff]  ;;  %v252_v51 = vld [vmem:[%s2193_s28 + $0x188] sm:$0xff]  ;;  %v266_v54 = vld [vmem:[%s2193_s28 + $0x1f8] sm:$0xff] }
  0x61   : > { %1879 = vmatprep.subr.bf16.mxu0 %v1878_v4  ;;  %1911 = vmatprep.subr.bf16.mxu1 %v1910_v5  ;;  %v264_v52 = vld [vmem:[%s2193_s28 + $0x1e8] sm:$0xff]  ;;  %v1928_v53 = vpack.c.bf16 %v493_v49, %v492_v48  ;;  %v263_v55 = vld [vmem:[%s2193_s28 + $0x1e0] sm:$0xff]  ;;  %v265_v56 = vld [vmem:[%s2193_s28 + $0x1f0] sm:$0xff] }
  0x62   : > { %818 = vmatmul.mubr.f32.gmra.mrb[26].mxu0 %v285_v11  ;;  %917 = vmatprep.mubr.f32.mxu1 %v288_v12  ;;  %v277_v57 = vld [vmem:[%s2193_s28 + $0x250] sm:$0xff]  ;;  %v279_v58 = vld [vmem:[%s2193_s28 + $0x260] sm:$0xff]  ;;  %v276_v59 = vld [vmem:[%s2193_s28 + $0x248] sm:$0xff] }
  0x63   : > { %1881 = vmatpush3.bf16.msra.mxu0 %v1880_v13  ;;  %918 = vmatmul.mubr.f32.gmra.mrb[26].mxu1 %v287_v15  ;;  %v278_v60 = vld [vmem:[%s2193_s28 + $0x258] sm:$0xff]  ;;  %v292_v62 = vld [vmem:[%s2193_s28 + $0x2c8] sm:$0x3]  ;;  %v289_v63 = vld [vmem:[%s2193_s28 + $0x2b0] sm:$0x3] }
  0x64   : > { %1913 = vmatpush3.bf16.msra.mxu1 %v1912_v14  ;;  %1883 = vmatprep.subr.bf16.mxu0 %v1882_v16  ;;  %v290_v61 = vld [vmem:[%s2193_s28 + $0x2b8] sm:$0x3]  ;;  %v291_v0 = vld [vmem:[%s2193_s28 + $0x2c0] sm:$0x3]  ;;  %v228_v4 = vld [vmem:[%s2193_s28 + $0xc8] sm:$0xff] }
  0x65   : > { %1915 = vmatprep.subr.bf16.mxu1 %v1914_v19  ;;  %987 = vmatprep.mubr.f32.mxu0 %v212_v22  ;;  %v215_v2 = vld [vmem:[%s2193_s28 + $0x60] sm:$0xff]  ;;  %v280_v5 = vld [vmem:[%s2193_s28 + $0x268] sm:$0xff]  ;;  %v241_v6 = vld [vmem:[%s2193_s28 + $0x130] sm:$0xff] }
  0x66   : > { %1087 = vmatprep.mubr.f32.mxu1 %v214_v24  ;;  %v267_v3 = vld [vmem:[%s2193_s28 + $0x200] sm:$0xff]  ;;  %v293_v7 = vld [vmem:[%s2193_s28 + $0x2d0] sm:$0x3]  ;;  %v254_v8 = vld [vmem:[%s2193_s28 + $0x198] sm:$0xff] }
  0x67   : > { %1885 = vmatpush3.bf16.msra.mxu0 %v1884_v23  ;;  %v1342_v10 = vld [vmem:[%s2829_s2] ss:$0 sm:$0xff] }
  0x68   : > { %1917 = vmatpush3.bf16.msra.mxu1 %v1916_v25  ;;  %1918 = vmatprep.subr.bf16.mxu0 %v1990_v31 }
  0x69   : > { %1930 = vmatprep.subr.bf16.mxu1 %v1990_v31 }
  0x6a   : > { %988 = vmatmul.mubr.f32.vlgmr.msra.gmra.mrb[28].mxu0 %v211_v28 }
  0x6b   : > { %1088 = vmatmul.mubr.f32.vlgmr.msra.gmra.mrb[28].mxu1 %v213_v30  ;;  %1920 = vmatpush3.bf16.msra.mxu0 %v1919_v29 }
  0x6c   : > { %992 = vmatprep.mubr.f32.mxu0 %v225_v32  ;;  %1092 = vmatprep.mubr.f32.mxu1 %v227_v33 }
  0x6d   : > { %1934 = vmatpush3.bf16.msra.mxu1 %v1919_v29  ;;  %1921 = vmatprep.subr.bf16.mxu0 %v1990_v31 }
  0x6e   : > { %993 = vmatmul.mubr.f32.gmra.mrb[30].mxu0 %v224_v36  ;;  %1931 = vmatprep.subr.bf16.mxu1 %v1990_v31 }
  0x6f   : > { %1093 = vmatmul.mubr.f32.gmra.mrb[30].mxu1 %v226_v37  ;;  %997 = vmatprep.mubr.f32.mxu0 %v238_v38 }
  0x70   : > { %1097 = vmatprep.mubr.f32.mxu1 %v240_v40  ;;  %1923 = vmatpush3.bf16.msra.mxu0 %v1922_v39 }
  0x71   : > { %1935 = vmatpush3.bf16.msra.mxu1 %v1922_v39  ;;  %1924 = vmatprep.subr.bf16.mxu0 %v1990_v31 }
  0x72   : > { %998 = vmatmul.mubr.f32.gmra.mrb[32].mxu0 %v237_v43  ;;  %1932 = vmatprep.subr.bf16.mxu1 %v1990_v31 }
  0x73   : > { %1098 = vmatmul.mubr.f32.gmra.mrb[32].mxu1 %v239_v44  ;;  %1002 = vmatprep.mubr.f32.mxu0 %v251_v45 }
  0x74   : > { %1102 = vmatprep.mubr.f32.mxu1 %v253_v47  ;;  %1926 = vmatpush3.bf16.msra.mxu0 %v1925_v46 }
  0x75   : > { %1936 = vmatpush3.bf16.msra.mxu1 %v1925_v46  ;;  %1927 = vmatprep.subr.bf16.mxu0 %v1990_v31 }
  0x76   : > { %1003 = vmatmul.mubr.f32.gmra.mrb[34].mxu0 %v250_v50  ;;  %1933 = vmatprep.subr.bf16.mxu1 %v1990_v31 }
  0x77   : > { %1103 = vmatmul.mubr.f32.gmra.mrb[34].mxu1 %v252_v51  ;;  %1007 = vmatprep.mubr.f32.mxu0 %v264_v52 }
  0x78   : > { %1107 = vmatprep.mubr.f32.mxu1 %v266_v54  ;;  %1929 = vmatpush3.bf16.msra.mxu0 %v1928_v53 }
  0x79   : > { %1937 = vmatpush3.bf16.msra.mxu1 %v1928_v53 }
  0x7a   : > { %1008 = vmatmul.mubr.f32.gmra.mrb[36].mxu0 %v263_v55 }
  0x7b   : > { %1108 = vmatmul.mubr.f32.gmra.mrb[36].mxu1 %v265_v56  ;;  %1012 = vmatprep.mubr.f32.mxu0 %v277_v57 }
  0x7c   : > { %1112 = vmatprep.mubr.f32.mxu1 %v279_v58 }
  0x7e   : > { %1013 = vmatmul.mubr.f32.gmra.mrb[38].mxu0 %v276_v59 }
  0x7f   : > { %1113 = vmatmul.mubr.f32.gmra.mrb[38].mxu1 %v278_v60  ;;  %1017 = vmatprep.mubr.f32.mxu0 %v290_v61 }
  0x80   : > { %1117 = vmatprep.mubr.f32.mxu1 %v292_v62 }
  0x82   : > { %1018 = vmatmul.mubr.f32.gmra.mrb[40].mxu0 %v289_v63 }
  0x83   : > { %1118 = vmatmul.mubr.f32.gmra.mrb[40].mxu1 %v291_v0  ;;  %1705 = vmatprep.mubr.msk.f32.mxu0 %vm1991_vm0, %v1992_v1 }
  0x84   : > { %1717 = vmatprep.mubr.msk.f32.mxu1 %vm1991_vm0, %v1992_v1 }
  0x86   : > { %1706 = vmatmul.mubr.msk.f32.vlgmr.msra.gmra.mrb[42].mxu0 %vm501_vm1, %v215_v2 }
  0x87   : > { %1718 = vmatmul.mubr.msk.f32.vlgmr.msra.gmra.mrb[42].mxu1 %vm501_vm1, %v267_v3  ;;  %1708 = vmatprep.mubr.msk.f32.mxu0 %vm1991_vm0, %v1992_v1 }
  0x88   : > { %1720 = vmatprep.mubr.msk.f32.mxu1 %vm1991_vm0, %v1992_v1 }
  0x8a   : > { %1709 = vmatmul.mubr.msk.f32.gmra.mrb[44].mxu0 %vm501_vm1, %v228_v4 }
  0x8b   : > { %1721 = vmatmul.mubr.msk.f32.gmra.mrb[44].mxu1 %vm501_vm1, %v280_v5  ;;  %1711 = vmatprep.mubr.msk.f32.mxu0 %vm1991_vm0, %v1992_v1 }
  0x8c   : > { %1723 = vmatprep.mubr.msk.f32.mxu1 %vm1991_vm0, %v1992_v1 }
  0x8e   : > { %1712 = vmatmul.mubr.msk.f32.gmra.mrb[46].mxu0 %vm501_vm1, %v241_v6 }
  0x8f   : > { %1724 = vmatmul.mubr.msk.f32.gmra.mrb[46].mxu1 %vm501_vm1, %v293_v7  ;;  %1714 = vmatprep.mubr.msk.f32.mxu0 %vm1991_vm0, %v1992_v1 }
  0x92   : > { %1715 = vmatmul.mubr.msk.f32.gmra.mrb[48].mxu0 %vm501_vm1, %v254_v8 }
  0xfd   : > { %v1388_v9 = vpop.f32.mrb[0].mxu0 }
  0xfe   : > { %v1389_v11 = vpop.f32.mrb[1].mxu0  ;;  %v1441_v12 = vpop.f32.mrb[0].mxu1 }
  0xff   : > { %v1390_v13 = vadd.f32 %v1389_v11, %v1388_v9  ;;  %v1442_v14 = vpop.f32.mrb[1].mxu1 }
 0x100   : > { %v1443_v15 = vadd.f32 %v1442_v14, %v1441_v12 }
 0x101   : > { %v590_v16 = vadd.f32 %v1390_v13, %v1342_v10  ;;  %v1391_v17 = vpop.f32.mrb[2].mxu0 }
 0x102   : > { %v1392_v18 = vpop.f32.mrb[3].mxu0  ;;  %v1444_v19 = vpop.f32.mrb[2].mxu1 }
 0x103   : > { %v690_v20 = vadd.f32 %v1443_v15, %v590_v16  ;;  %v1393_v21 = vadd.f32 %v1392_v18, %v1391_v17  ;;  %v1445_v22 = vpop.f32.mrb[3].mxu1 }
 0x104   : > { %v1446_v23 = vadd.f32 %v1445_v22, %v1444_v19 }
 0x105   : > { %v595_v24 = vadd.f32 %v1393_v21, %v1342_v10  ;;  %v1394_v25 = vpop.f32.mrb[4].mxu0 }
 0x106   : > { %v1395_v26 = vpop.f32.mrb[5].mxu0  ;;  %v1447_v27 = vpop.f32.mrb[4].mxu1 }
 0x107   : > { %v695_v28 = vadd.f32 %v1446_v23, %v595_v24  ;;  %v1396_v29 = vadd.f32 %v1395_v26, %v1394_v25  ;;  %v1448_v30 = vpop.f32.mrb[5].mxu1 }
 0x108   : > { %v1449_v31 = vadd.f32 %v1448_v30, %v1447_v27 }
 0x109   : > { %v600_v32 = vadd.f32 %v1396_v29, %v1342_v10  ;;  %v1397_v33 = vpop.f32.mrb[6].mxu0 }
 0x10a   : > { %v1398_v34 = vpop.f32.mrb[7].mxu0  ;;  %v1450_v35 = vpop.f32.mrb[6].mxu1 }
 0x10b   : > { %v700_v36 = vadd.f32 %v1449_v31, %v600_v32  ;;  %v1399_v37 = vadd.f32 %v1398_v34, %v1397_v33  ;;  %v1451_v38 = vpop.f32.mrb[7].mxu1 }
 0x10c   : > { %v1452_v39 = vadd.f32 %v1451_v38, %v1450_v35 }
 0x10d   : > { %v605_v40 = vadd.f32 %v1399_v37, %v1342_v10  ;;  %v1400_v41 = vpop.f32.mrb[8].mxu0 }
 0x10e   : > { %v1401_v42 = vpop.f32.mrb[9].mxu0  ;;  %v1453_v43 = vpop.f32.mrb[8].mxu1 }
 0x10f   : > { %v705_v44 = vadd.f32 %v1452_v39, %v605_v40  ;;  %v1402_v45 = vadd.f32 %v1401_v42, %v1400_v41  ;;  %v1454_v46 = vpop.f32.mrb[9].mxu1 }
 0x110   : > { %v1455_v47 = vadd.f32 %v1454_v46, %v1453_v43 }
 0x111   : > { %v610_v48 = vadd.f32 %v1402_v45, %v1342_v10  ;;  %v1403_v49 = vpop.f32.mrb[10].mxu0 }
 0x112   : > { %v1404_v50 = vpop.f32.mrb[11].mxu0  ;;  %v1456_v51 = vpop.f32.mrb[10].mxu1 }
 0x113   : > { %v710_v52 = vadd.f32 %v1455_v47, %v610_v48  ;;  %v1405_v53 = vadd.f32 %v1404_v50, %v1403_v49  ;;  %v1457_v54 = vpop.f32.mrb[11].mxu1 }
 0x114   : > { %v1458_v55 = vadd.f32 %v1457_v54, %v1456_v51 }
 0x115   : > { %v615_v56 = vadd.f32 %v1405_v53, %v1342_v10  ;;  %v1406_v57 = vpop.f32.mrb[12].mxu0 }
 0x116   : > { %v1407_v58 = vpop.f32.mrb[13].mxu0  ;;  %v1459_v59 = vpop.f32.mrb[12].mxu1 }
 0x117   : > { %v715_v60 = vadd.f32 %v1458_v55, %v615_v56  ;;  %v1408_v61 = vadd.f32 %v1407_v58, %v1406_v57  ;;  %v1460_v62 = vpop.f32.mrb[13].mxu1 }
 0x118   : > { %v1461_v63 = vadd.f32 %v1460_v62, %v1459_v59 }
 0x119   : > { %v620_v0 = vadd.f32 %v1408_v61, %v1342_v10 }
 0x11b   : > { %v720_v1 = vadd.f32 %v1461_v63, %v620_v0 }
 0x11d   : > { %v1494_v2 = vpop.f32.mrb[14].mxu0 }
 0x11e   : > { %v1495_v3 = vpop.f32.mrb[15].mxu0  ;;  %v1547_v4 = vpop.f32.mrb[14].mxu1 }
 0x11f   : > { %v1496_v5 = vadd.f32 %v1495_v3, %v1494_v2  ;;  %v1548_v6 = vpop.f32.mrb[15].mxu1 }
 0x120   : > { %v1549_v7 = vadd.f32 %v1548_v6, %v1547_v4 }
 0x121   : > { %v790_v8 = vadd.f32 %v1496_v5, %v690_v20  ;;  %v1497_v9 = vpop.f32.mrb[16].mxu0 }
 0x122   : > { %v1498_v11 = vpop.f32.mrb[17].mxu0  ;;  %v1550_v12 = vpop.f32.mrb[16].mxu1 }
 0x123   : > { %v890_v13 = vadd.f32 %v1549_v7, %v790_v8  ;;  %v1499_v14 = vadd.f32 %v1498_v11, %v1497_v9  ;;  %v1551_v15 = vpop.f32.mrb[17].mxu1 }
 0x124   : > { %v1552_v16 = vadd.f32 %v1551_v15, %v1550_v12 }
 0x125   : > { %v795_v17 = vadd.f32 %v1499_v14, %v695_v28  ;;  %v1500_v18 = vpop.f32.mrb[18].mxu0 }
 0x126   : > { %v1501_v19 = vpop.f32.mrb[19].mxu0  ;;  %v1553_v21 = vpop.f32.mrb[18].mxu1 }
 0x127   : > { %v895_v10 = vadd.f32 %v1552_v16, %v795_v17  ;;  %v1502_v22 = vadd.f32 %v1501_v19, %v1500_v18  ;;  %v1554_v23 = vpop.f32.mrb[19].mxu1 }
 0x128   : > { %v1555_v24 = vadd.f32 %v1554_v23, %v1553_v21 }
 0x129   : > { %v800_v25 = vadd.f32 %v1502_v22, %v700_v36  ;;  %v1503_v26 = vpop.f32.mrb[20].mxu0 }
 0x12a   : > { %v1504_v27 = vpop.f32.mrb[21].mxu0  ;;  %v1556_v29 = vpop.f32.mrb[20].mxu1 }
 0x12b   : > { %v900_v20 = vadd.f32 %v1555_v24, %v800_v25  ;;  %v1505_v30 = vadd.f32 %v1504_v27, %v1503_v26  ;;  %v1557_v31 = vpop.f32.mrb[21].mxu1 }
 0x12c   : > { %v1558_v32 = vadd.f32 %v1557_v31, %v1556_v29 }
 0x12d   : > { %v805_v33 = vadd.f32 %v1505_v30, %v705_v44  ;;  %v1506_v34 = vpop.f32.mrb[22].mxu0 }
 0x12e   : > { %v1507_v35 = vpop.f32.mrb[23].mxu0  ;;  %v1559_v37 = vpop.f32.mrb[22].mxu1 }
 0x12f   : > { %v905_v28 = vadd.f32 %v1558_v32, %v805_v33  ;;  %v1508_v38 = vadd.f32 %v1507_v35, %v1506_v34  ;;  %v1560_v39 = vpop.f32.mrb[23].mxu1 }
 0x130   : > { %v1561_v40 = vadd.f32 %v1560_v39, %v1559_v37 }
 0x131   : > { %v810_v41 = vadd.f32 %v1508_v38, %v710_v52  ;;  %v1509_v42 = vpop.f32.mrb[24].mxu0 }
 0x132   : > { %v1510_v43 = vpop.f32.mrb[25].mxu0  ;;  %v1562_v45 = vpop.f32.mrb[24].mxu1 }
 0x133   : > { %v910_v36 = vadd.f32 %v1561_v40, %v810_v41  ;;  %v1511_v46 = vadd.f32 %v1510_v43, %v1509_v42  ;;  %v1563_v47 = vpop.f32.mrb[25].mxu1 }
 0x134   : > { %v1564_v48 = vadd.f32 %v1563_v47, %v1562_v45 }
 0x135   : > { %v815_v49 = vadd.f32 %v1511_v46, %v715_v60  ;;  %v1512_v50 = vpop.f32.mrb[26].mxu0 }
 0x136   : > { %v1513_v51 = vpop.f32.mrb[27].mxu0  ;;  %v1565_v53 = vpop.f32.mrb[26].mxu1 }
 0x137   : > { %v915_v44 = vadd.f32 %v1564_v48, %v815_v49  ;;  %v1514_v54 = vadd.f32 %v1513_v51, %v1512_v50  ;;  %v1566_v55 = vpop.f32.mrb[27].mxu1 }
 0x138   : > { %v1567_v56 = vadd.f32 %v1566_v55, %v1565_v53 }
 0x139   : > { %v820_v57 = vadd.f32 %v1514_v54, %v720_v1 }
 0x13b   : > { %v920_v58 = vadd.f32 %v1567_v56, %v820_v57 }
 0x13d   : > { %v1600_v59 = vpop.f32.mrb[28].mxu0 }
 0x13e   : > { %v1601_v61 = vpop.f32.mrb[29].mxu0  ;;  %v1653_v52 = vpop.f32.mrb[28].mxu1 }
 0x13f   : > { %v1602_v62 = vadd.f32 %v1601_v61, %v1600_v59  ;;  %v1654_v63 = vpop.f32.mrb[29].mxu1 }
 0x140   : > { %v1655_v0 = vadd.f32 %v1654_v63, %v1653_v52 }
 0x141   : > { %v990_v2 = vadd.f32 %v1602_v62, %v890_v13  ;;  %v1603_v3 = vpop.f32.mrb[30].mxu0 }
 0x142   : > { %v1604_v4 = vpop.f32.mrb[31].mxu0  ;;  %v1656_v5 = vpop.f32.mrb[30].mxu1 }
 0x143   : > { %v1605_v60 = vadd.f32 %v1604_v4, %v1603_v3  ;;  %v1657_v6 = vpop.f32.mrb[31].mxu1  ;;  %v1090_v7 = vadd.f32 %v1655_v0, %v990_v2 }
 0x144   : > { %v1658_v8 = vadd.f32 %v1657_v6, %v1656_v5 }
 0x145   : > { %v995_v9 = vadd.f32 %v1605_v60, %v895_v10  ;;  %v1606_v11 = vpop.f32.mrb[32].mxu0 }
 0x146   : > { %v1607_v12 = vpop.f32.mrb[33].mxu0  ;;  %v1659_v14 = vpop.f32.mrb[32].mxu1 }
 0x147   : > { %v1608_v1 = vadd.f32 %v1607_v12, %v1606_v11  ;;  %v1660_v15 = vpop.f32.mrb[33].mxu1  ;;  %v1095_v16 = vadd.f32 %v1658_v8, %v995_v9 }
 0x148   : > { %v1661_v17 = vadd.f32 %v1660_v15, %v1659_v14 }
 0x149   : > { %v1000_v18 = vadd.f32 %v1608_v1, %v900_v20  ;;  %v1609_v19 = vpop.f32.mrb[34].mxu0 }
 0x14a   : > { %v1610_v21 = vpop.f32.mrb[35].mxu0  ;;  %v1662_v22 = vpop.f32.mrb[34].mxu1 }
 0x14b   : > { %v1611_v13 = vadd.f32 %v1610_v21, %v1609_v19  ;;  %v1663_v23 = vpop.f32.mrb[35].mxu1  ;;  %v1100_v24 = vadd.f32 %v1661_v17, %v1000_v18 }
 0x14c   : > { %v1664_v25 = vadd.f32 %v1663_v23, %v1662_v22 }
 0x14d   : > { %v1005_v26 = vadd.f32 %v1611_v13, %v905_v28  ;;  %v1612_v27 = vpop.f32.mrb[36].mxu0 }
 0x14e   : > { %v1613_v29 = vpop.f32.mrb[37].mxu0  ;;  %v1665_v30 = vpop.f32.mrb[36].mxu1 }
 0x14f   : > { %v1614_v10 = vadd.f32 %v1613_v29, %v1612_v27  ;;  %v1666_v31 = vpop.f32.mrb[37].mxu1  ;;  %v1105_v32 = vadd.f32 %v1664_v25, %v1005_v26 }
 0x150   : > { %v1667_v33 = vadd.f32 %v1666_v31, %v1665_v30 }
 0x151   : > { %v1010_v34 = vadd.f32 %v1614_v10, %v910_v36  ;;  %v1615_v35 = vpop.f32.mrb[38].mxu0 }
 0x152   : > { %v1616_v37 = vpop.f32.mrb[39].mxu0  ;;  %v1668_v38 = vpop.f32.mrb[38].mxu1 }
 0x153   : > { %v1617_v20 = vadd.f32 %v1616_v37, %v1615_v35  ;;  %v1669_v39 = vpop.f32.mrb[39].mxu1  ;;  %v1110_v40 = vadd.f32 %v1667_v33, %v1010_v34 }
 0x154   : > { %v1670_v41 = vadd.f32 %v1669_v39, %v1668_v38 }
 0x155   : > { %v1015_v42 = vadd.f32 %v1617_v20, %v915_v44  ;;  %v1618_v43 = vpop.f32.mrb[40].mxu0 }
 0x156   : > { %v1619_v45 = vpop.f32.mrb[41].mxu0  ;;  %v1671_v46 = vpop.f32.mrb[40].mxu1 }
 0x157   : > { %v1620_v28 = vadd.f32 %v1619_v45, %v1618_v43  ;;  %v1672_v47 = vpop.f32.mrb[41].mxu1  ;;  %v1115_v48 = vadd.f32 %v1670_v41, %v1015_v42 }
 0x158   : > { %v1673_v49 = vadd.f32 %v1672_v47, %v1671_v46 }
 0x159   : > { %v1020_v50 = vadd.f32 %v1620_v28, %v920_v58  ;;  %v1189_v51 = vpop.f32.mrb[42].mxu0 }
 0x15a   : > { %v1190_v53 = vadd.f32 %v1189_v51, %v1090_v7  ;;  %v1209_v54 = vpop.f32.mrb[42].mxu1  ;;  %v1707_v36 = vpop.f32.mrb[43].mxu0 }
 0x15b   : > { %v1210_v55 = vadd.f32 %v1209_v54, %v1110_v40  ;;  %v1719_v56 = vpop.f32.mrb[43].mxu1  ;;  %v1120_v57 = vadd.f32 %v1673_v49, %v1020_v50 }
 0x15c   : > { %v1223_v59 = vmax.f32 %v1190_v53, 0.0 }
 0x15d   : > { %v1227_v61 = vmax.f32 %v1210_v55, 0.0  ;;  %v1194_v52 = vpop.f32.mrb[44].mxu0 }
 0x15e   : > { %v1195_v62 = vadd.f32 %v1194_v52, %v1095_v16  ;;  %v1214_v44 = vpop.f32.mrb[44].mxu1  ;;  %v1710_v63 = vpop.f32.mrb[45].mxu0  ;;  %1234 = vst [vmem:[%s2830_s3] sm:$0xff] (!%p1350_p5), %v1223_v59 }
 0x15f   : > { %v1215_v0 = vadd.f32 %v1214_v44, %v1115_v48  ;;  %v1722_v2 = vpop.f32.mrb[45].mxu1  ;;  %1238 = vst [vmem:[%s2830_s3 + $0x20] sm:$0xff] (!%p1350_p5), %v1227_v61 }
 0x160   : > { %v1224_v3 = vmax.f32 %v1195_v62, 0.0 }
 0x161   : > { %v1228_v4 = vmax.f32 %v1215_v0, 0.0  ;;  %v1199_v5 = vpop.f32.mrb[46].mxu0 }
 0x162   : > { %v1200_v60 = vadd.f32 %v1199_v5, %v1100_v24  ;;  %v1219_v58 = vpop.f32.mrb[46].mxu1  ;;  %v1713_v6 = vpop.f32.mrb[47].mxu0  ;;  %1233 = sbr.rel (%p1350_p5) target bundleno = 363 (0x16b), region = 36  ;;  %1235 = vst [vmem:[%s2830_s3 + $0x8] sm:$0xff] (!%p1350_p5), %v1224_v3 }
 0x163   : > { %v1220_v7 = vadd.f32 %v1219_v58, %v1120_v57  ;;  %v1725_v8 = vpop.f32.mrb[47].mxu1  ;;  %1239 = vst [vmem:[%s2830_s3 + $0x28] sm:$0xff] (!%p1350_p5), %v1228_v4 }
 0x164   : > { %v1225_v9 = vmax.f32 %v1200_v60, 0.0 }
 0x165   : > { %v1229_v11 = vmax.f32 %v1220_v7, 0.0  ;;  %v1204_v12 = vpop.f32.mrb[48].mxu0 }
 0x166   : > { %v1205_v14 = vadd.f32 %v1204_v12, %v1105_v32  ;;  %v1716_v1 = vpop.f32.mrb[49].mxu0  ;;  %1236 = vst [vmem:[%s2830_s3 + $0x10] sm:$0xff] (!%p1350_p5), %v1225_v9 }
 0x167   : > { %1240 = vst [vmem:[%s2830_s3 + $0x30] sm:$0x3] (!%p1350_p5), %v1229_v11 }
 0x168   : > { %v1226_v15 = vmax.f32 %v1205_v14, 0.0 }
 0x16a   : > { %1237 = vst [vmem:[%s2830_s3 + $0x18] sm:$0xff] %v1226_v15 }
 0x16b PF: > { %p1351_p6 = scmp.le.s32.totalorder %s1980_s12, 0 }
 0x16c   : > { %v1245_v16 = vld [vmem:[%s2830_s3] sm:$0xff] (!%p1351_p6)  ;;  %v1246_v17 = vld [vmem:[%s2830_s3 + $0x8] sm:$0xff] (!%p1351_p6) }
 0x16d   : > { %1244 = sbr.rel (%p1351_p6) target bundleno = 373 (0x175), region = 40  ;;  %v1252_v19 = vmax.f32 (!%p1351_p6), %v1245_v16, %v1223_v59  ;;  %v1253_v21 = vmax.f32 (!%p1351_p6), %v1246_v17, %v1224_v3  ;;  %v1249_v23 = vld [vmem:[%s2830_s3 + $0x20] sm:$0xff] (!%p1351_p6)  ;;  %v1250_v24 = vld [vmem:[%s2830_s3 + $0x28] sm:$0xff] (!%p1351_p6) }
 0x16e   : > { %v1256_v26 = vmax.f32 (!%p1351_p6), %v1249_v23, %v1227_v61  ;;  %v1257_v27 = vmax.f32 (!%p1351_p6), %v1250_v24, %v1228_v4 }
 0x16f   : > { %v1247_v18 = vld [vmem:[%s2830_s3 + $0x10] sm:$0xff] (!%p1351_p6)  ;;  %1259 = vst [vmem:[%s2830_s3] sm:$0xff] (!%p1351_p6), %v1252_v19  ;;  %1260 = vst [vmem:[%s2830_s3 + $0x8] sm:$0xff] (!%p1351_p6), %v1253_v21 }
 0x170   : > { %v1254_v22 = vmax.f32 (!%p1351_p6), %v1247_v18, %v1225_v9  ;;  %v1251_v29 = vld [vmem:[%s2830_s3 + $0x30] sm:$0x3] (!%p1351_p6)  ;;  %1263 = vst [vmem:[%s2830_s3 + $0x20] sm:$0xff] (!%p1351_p6), %v1256_v26  ;;  %1264 = vst [vmem:[%s2830_s3 + $0x28] sm:$0xff] (!%p1351_p6), %v1257_v27 }
 0x171   : > { %v1248_v13 = vld [vmem:[%s2830_s3 + $0x18] sm:$0xff] (!%p1351_p6)  ;;  %v1258_v30 = vmax.f32 (!%p1351_p6), %v1251_v29, %v1229_v11 }
 0x172   : > { %v1255_v25 = vmax.f32 (!%p1351_p6), %v1248_v13, %v1226_v15  ;;  %1261 = vst [vmem:[%s2830_s3 + $0x10] sm:$0xff] (!%p1351_p6), %v1254_v22 }
 0x173   : > { %1265 = vst [vmem:[%s2830_s3 + $0x30] sm:$0x3] (!%p1351_p6), %v1258_v30 }
 0x174   : > { %1262 = vst [vmem:[%s2830_s3 + $0x18] sm:$0xff] %v1255_v25 }
 0x175 PF: > { %s13_s14 = sadd.s32 1, %s1988_s14   ;;  %s2831_s12 = smov %s1984_s13 }
 0x176   : > { %p10_p7 = scmp.ge.s32.totalorder %s13_s14, 6   ;;  %s2832_s13 = smov %s2834_s15 }
 0x178   :  { %12 = sbr.rel (!%p10_p7) target bundleno = 2 (0x2), region = 70 }

// kernel: lfw_convnet_forward.5
= control target key start
LH: loop header
LB: loop body
LE: loop exit
PB: predicated region body
PF: predicated region fallthrough
CT: control target
= control target key end

     0   :  { %v3661_v7 = vmov 0.0   ;;  %v633_v60 = vlaneseq  ;;  %v3662_v61 = vmov 1983009808   ;;  %vm722_vm0 = vcmask 523264   ;;  %s6282_s0 = inlined_call_operand.vmem [shape: f32[2,1600], index: 0, kind: input, shape index: {}]   ;;  %s6283_s1 = inlined_call_operand.vmem [shape: f32[1600,384], index: 1, kind: input, shape index: {}]   ;;  %s6284_s2 = inlined_call_operand.vmem [shape: f32[1,384], index: 2, kind: input, shape index: {}]   ;;  %s6285_s3 = inlined_call_operand.vmem [shape: f32[384,384], index: 3, kind: input, shape index: {}]   ;;  %s6286_s4 = inlined_call_operand.vmem [shape: f32[1,384], index: 4, kind: input, shape index: {}]   ;;  %s6287_s5 = inlined_call_operand.vmem [shape: f32[384,128], index: 5, kind: input, shape index: {}]   ;;  %s6288_s6 = inlined_call_operand.vmem [shape: f32[1,128], index: 6, kind: input, shape index: {}]   ;;  %s6289_s7 = inlined_call_operand.hbm [shape: f32[2,128], index: 7, kind: output, shape index: {}]  }
   0x1   :  { %v32_v0 = vld [vmem:[%s6283_s1 + $0x8] sm:$0xff]  ;;  %v35_v1 = vld [vmem:[%s6283_s1 + $0x20] sm:$0xff]  ;;  %v34_v4 = vld [vmem:[%s6283_s1 + $0x18] sm:$0xff]  ;;  %1215 = vmatprep.mubr.f32.mxu1 %v3661_v7  ;;  %v654_v62 = vunpack.c.l.s4 %v3662_v61 }
   0x2   :  { %v31_v2 = vld [vmem:[%s6283_s1] sm:$0xff]  ;;  %v2794_v3 = vpack.c.bf16 %v35_v1, %v32_v0  ;;  %v38_v5 = vld [vmem:[%s6283_s1 + $0x38] sm:$0xff]  ;;  %v41_v6 = vld [vmem:[%s6283_s1 + $0x50] sm:$0xff] }
   0x3   :  { %v2796_v8 = vpack.c.bf16 %v34_v4, %v31_v2  ;;  %v2798_v9 = vpack.c.bf16 %v41_v6, %v38_v5  ;;  %v37_v10 = vld [vmem:[%s6283_s1 + $0x30] sm:$0xff]  ;;  %v40_v11 = vld [vmem:[%s6283_s1 + $0x48] sm:$0xff]  ;;  %v47_v13 = vld [vmem:[%s6283_s1 + $0x80] sm:$0xff] }
   0x4   :  { %v44_v12 = vld [vmem:[%s6283_s1 + $0x68] sm:$0xff]  ;;  %2795 = vmatprep.subr.bf16.mxu0 %v2794_v3  ;;  %v2800_v14 = vpack.c.bf16 %v40_v11, %v37_v10  ;;  %v43_v16 = vld [vmem:[%s6283_s1 + $0x60] sm:$0xff]  ;;  %v46_v17 = vld [vmem:[%s6283_s1 + $0x78] sm:$0xff] }
   0x5   :  { %2797 = vmatpush1.bf16.msra.mxu0 %v2796_v8  ;;  %v2802_v15 = vpack.c.bf16 %v47_v13, %v44_v12  ;;  %v50_v18 = vld [vmem:[%s6283_s1 + $0x98] sm:$0xff]  ;;  %v53_v19 = vld [vmem:[%s6283_s1 + $0xb0] sm:$0xff]  ;;  %v2804_v20 = vpack.c.bf16 %v46_v17, %v43_v16  ;;  %v52_v23 = vld [vmem:[%s6283_s1 + $0xa8] sm:$0xff]  ;;  %v3857_v13 = vshrl.u32 %v633_v60, 7 }
   0x6   :  { %2799 = vmatprep.subr.bf16.mxu0 %v2798_v9  ;;  %v2806_v21 = vpack.c.bf16 %v53_v19, %v50_v18  ;;  %v49_v22 = vld [vmem:[%s6283_s1 + $0x90] sm:$0xff]  ;;  %v56_v24 = vld [vmem:[%s6283_s1 + $0xc8] sm:$0xff]  ;;  %v59_v25 = vld [vmem:[%s6283_s1 + $0xe0] sm:$0xff] }
   0x7   :  { %v2808_v26 = vpack.c.bf16 %v52_v23, %v49_v22  ;;  %v55_v27 = vld [vmem:[%s6283_s1 + $0xc0] sm:$0xff]  ;;  %v608_v28 = vld [vmem:[%s6283_s1 + $0x1208] sm:$0xff]  ;;  %v2810_v30 = vpack.c.bf16 %v59_v25, %v56_v24  ;;  %v58_v31 = vld [vmem:[%s6283_s1 + $0xd8] sm:$0xff] }
   0x8   :  { %v611_v29 = vld [vmem:[%s6283_s1 + $0x1220] sm:$0xff]  ;;  %v610_v34 = vld [vmem:[%s6283_s1 + $0x1218] sm:$0xff]  ;;  %v65_v36 = vld [vmem:[%s6283_s1 + $0x110] sm:$0xff]  ;;  %v2812_v40 = vpack.c.bf16 %v58_v31, %v55_v27 }
   0x9   :  { %2801 = vmatpush1.bf16.msra.mxu0 %v2800_v14  ;;  %v3178_v32 = vpack.c.bf16 %v611_v29, %v608_v28  ;;  %v607_v33 = vld [vmem:[%s6283_s1 + $0x1200] sm:$0xff]  ;;  %v62_v35 = vld [vmem:[%s6283_s1 + $0xf8] sm:$0xff]  ;;  %v617_v39 = vld [vmem:[%s6283_s1 + $0x1250] sm:$0xff]  ;;  %v655_v14 = vunpack.c.0.s8 %v654_v62 }
   0xa   :  { %2803 = vmatprep.subr.bf16.mxu0 %v2802_v15  ;;  %v3180_v37 = vpack.c.bf16 %v610_v34, %v607_v33  ;;  %v614_v38 = vld [vmem:[%s6283_s1 + $0x1238] sm:$0xff]  ;;  %v61_v41 = vld [vmem:[%s6283_s1 + $0xf0] sm:$0xff]  ;;  %v616_v44 = vld [vmem:[%s6283_s1 + $0x1248] sm:$0xff]  ;;  %v2814_v45 = vpack.c.bf16 %v65_v36, %v62_v35 }
   0xb   :  { %3179 = vmatprep.subr.bf16.mxu1 %v3178_v32  ;;  %v3182_v42 = vpack.c.bf16 %v617_v39, %v614_v38  ;;  %v613_v43 = vld [vmem:[%s6283_s1 + $0x1230] sm:$0xff]  ;;  %v64_v46 = vld [vmem:[%s6283_s1 + $0x108] sm:$0xff]  ;;  %v623_v49 = vld [vmem:[%s6283_s1 + $0x1280] sm:$0xff]  ;;  %v3887_v28 = vsub.s32 %v655_v14, %v3857_v13 }
   0xc   :  { %3181 = vmatpush1.bf16.msra.mxu1 %v3180_v37  ;;  %v3184_v47 = vpack.c.bf16 %v616_v44, %v613_v43  ;;  %v620_v48 = vld [vmem:[%s6283_s1 + $0x1268] sm:$0xff]  ;;  %v71_v51 = vld [vmem:[%s6283_s1 + $0x140] sm:$0xff]  ;;  %v622_v54 = vld [vmem:[%s6283_s1 + $0x1278] sm:$0xff]  ;;  %v2816_v55 = vpack.c.bf16 %v64_v46, %v61_v41 }
   0xd   :  { %2805 = vmatpush1.bf16.msra.mxu0 %v2804_v20  ;;  %v68_v50 = vld [vmem:[%s6283_s1 + $0x128] sm:$0xff]  ;;  %3183 = vmatprep.subr.bf16.mxu1 %v3182_v42  ;;  %v3186_v52 = vpack.c.bf16 %v623_v49, %v620_v48  ;;  %v619_v53 = vld [vmem:[%s6283_s1 + $0x1260] sm:$0xff]  ;;  %v626_v58 = vld [vmem:[%s6283_s1 + $0x1298] sm:$0xff] }
   0xe   :  { %2807 = vmatprep.subr.bf16.mxu0 %v2806_v21  ;;  %v67_v56 = vld [vmem:[%s6283_s1 + $0x120] sm:$0xff]  ;;  %v3188_v57 = vpack.c.bf16 %v622_v54, %v619_v53  ;;  %v629_v59 = vld [vmem:[%s6283_s1 + $0x12b0] sm:$0xff]  ;;  %v2818_v63 = vpack.c.bf16 %v71_v51, %v68_v50  ;;  %v70_v0 = vld [vmem:[%s6283_s1 + $0x138] sm:$0xff] }
   0xf   :  { %v3190_v1 = vpack.c.bf16 %v629_v59, %v626_v58  ;;  %v625_v2 = vld [vmem:[%s6283_s1 + $0x1290] sm:$0xff]  ;;  %v628_v3 = vld [vmem:[%s6283_s1 + $0x12a8] sm:$0xff]  ;;  %v74_v4 = vld [vmem:[%s6283_s1 + $0x158] sm:$0xff]  ;;  %v2820_v9 = vpack.c.bf16 %v70_v0, %v67_v56 }
  0x10   :  { %3185 = vmatpush1.bf16.msra.mxu1 %v3184_v47  ;;  %v77_v5 = vld [vmem:[%s6283_s1 + $0x170] sm:$0xff]  ;;  %v84_v8 = vld [vmem:[%s6283_s1 + $0x1a8] sm:$0xff]  ;;  %v3192_v12 = vpack.c.bf16 %v628_v3, %v625_v2  ;;  %v83_v20 = vld [vmem:[%s6283_s1 + $0x1a0] sm:$0xff] }
  0x11   :  { %2809 = vmatpush1.bf16.msra.mxu0 %v2808_v26  ;;  %3187 = vmatprep.subr.bf16.mxu1 %v3186_v52  ;;  %v81_v6 = vld [vmem:[%s6283_s1 + $0x190] sm:$0xff]  ;;  %v76_v11 = vld [vmem:[%s6283_s1 + $0x168] sm:$0xff]  ;;  %v2822_v15 = vpack.c.bf16 %v77_v5, %v74_v4  ;;  %v87_v21 = vld [vmem:[%s6283_s1 + $0x1c0] sm:$0xff] }
  0x12   :  { %2811 = vmatprep.subr.bf16.mxu0 %v2810_v30  ;;  %v73_v10 = vld [vmem:[%s6283_s1 + $0x150] sm:$0xff]  ;;  %v80_v16 = vld [vmem:[%s6283_s1 + $0x188] sm:$0xff]  ;;  %v3194_v17 = vpack.c.bf16 %v84_v8, %v81_v6  ;;  %v90_v22 = vld [vmem:[%s6283_s1 + $0x1d8] sm:$0xff] }
  0x13   :  { %v33_v18 = vld [vmem:[%s6283_s1 + $0x10] sm:$0xff]  ;;  %v36_v19 = vld [vmem:[%s6283_s1 + $0x28] sm:$0xff]  ;;  %v2824_v23 = vpack.c.bf16 %v76_v11, %v73_v10  ;;  %v79_v24 = vld [vmem:[%s6283_s1 + $0x180] sm:$0xff]  ;;  %v2826_v29 = vpack.c.bf16 %v83_v20, %v80_v16  ;;  %v3198_v31 = vpack.c.bf16 %v90_v22, %v87_v21 }
  0x14   :  { %3189 = vmatpush1.bf16.msra.mxu1 %v3188_v57  ;;  %v82_v25 = vld [vmem:[%s6283_s1 + $0x198] sm:$0xff]  ;;  %v3196_v27 = vpack.c.bf16 %v36_v19, %v33_v18  ;;  %v39_v32 = vld [vmem:[%s6283_s1 + $0x40] sm:$0xff]  ;;  %v89_v34 = vld [vmem:[%s6283_s1 + $0x1d0] sm:$0xff] }
  0x15   :  { %2813 = vmatpush1.bf16.msra.mxu0 %v2812_v40  ;;  %3191 = vmatprep.subr.bf16.mxu1 %v3190_v1  ;;  %v2377_v26 = vld.sshfl [vmem:[%s6282_s0 + $0x18] sm:$0x3 pattern:$0x76325410]  ;;  %v93_v35 = vld [vmem:[%s6283_s1 + $0x1f0] sm:$0xff]  ;;  %v96_v36 = vld [vmem:[%s6283_s1 + $0x208] sm:$0xff]  ;;  %v2828_v38 = vpack.c.bf16 %v82_v25, %v79_v24 }
  0x16   :  { %2815 = vmatprep.subr.bf16.mxu0 %v2814_v45  ;;  %v86_v30 = vld [vmem:[%s6283_s1 + $0x1b8] sm:$0xff]  ;;  %v3911_v37 = vld [vmem:[%s6282_s0] sm:$0xff]  ;;  %v85_v39 = vld [vmem:[%s6283_s1 + $0x1b0] sm:$0xff]  ;;  %v3202_v45 = vpack.c.bf16 %v96_v36, %v93_v35 }
  0x17   :  { %v42_v33 = vld [vmem:[%s6283_s1 + $0x58] sm:$0xff]  ;;  %v88_v40 = vld [vmem:[%s6283_s1 + $0x1c8] sm:$0xff]  ;;  %v3921_v42 = vrot.slane %v3911_v37, %v3887_v28  ;;  %v2830_v43 = vpack.c.bf16 %v89_v34, %v86_v30  ;;  %v45_v46 = vld [vmem:[%s6283_s1 + $0x70] sm:$0xff] }
  0x18   :  { %3193 = vmatpush1.bf16.msra.mxu1 %v3192_v12  ;;  %v3200_v41 = vpack.c.bf16 %v42_v33, %v39_v32  ;;  %v92_v44 = vld [vmem:[%s6283_s1 + $0x1e8] sm:$0xff]  ;;  %v95_v48 = vld [vmem:[%s6283_s1 + $0x200] sm:$0xff]  ;;  %v102_v50 = vld [vmem:[%s6283_s1 + $0x238] sm:$0xff]  ;;  %v2832_v52 = vpack.c.bf16 %v88_v40, %v85_v39 }
  0x19   :  { %2817 = vmatpush1.bf16.msra.mxu0 %v2816_v55  ;;  %3195 = vmatprep.subr.bf16.mxu1 %v3194_v17  ;;  %v48_v47 = vld [vmem:[%s6283_s1 + $0x88] sm:$0xff]  ;;  %v99_v49 = vld [vmem:[%s6283_s1 + $0x220] sm:$0xff]  ;;  %v667_v51 = vcombine.high %v3921_v42, %v3921_v42  ;;  %v94_v54 = vld [vmem:[%s6283_s1 + $0x1f8] sm:$0xff]  ;;  %v2834_v56 = vpack.c.bf16 %v95_v48, %v92_v44 }
  0x1a   :  { %2819 = vmatprep.subr.bf16.mxu0 %v2818_v63  ;;  %v91_v53 = vld [vmem:[%s6283_s1 + $0x1e0] sm:$0xff]  ;;  %v3204_v55 = vpack.c.bf16 %v48_v47, %v45_v46  ;;  %v98_v57 = vld [vmem:[%s6283_s1 + $0x218] sm:$0xff]  ;;  %v3206_v58 = vpack.c.bf16 %v102_v50, %v99_v49  ;;  %v101_v61 = vld [vmem:[%s6283_s1 + $0x230] sm:$0xff] }
  0x1b   :  { %2378 = vmatmul.mubr.msk.f32.vlgmr.msra.gmra.mrb[0].mxu1 %vm722_vm0, %v2377_v26  ;;  %v51_v59 = vld [vmem:[%s6283_s1 + $0xa0] sm:$0xff]  ;;  %v54_v60 = vld [vmem:[%s6283_s1 + $0xb8] sm:$0xff]  ;;  %789 = vmatprep.mubr.f32.mxu0 %v667_v51  ;;  %v105_v62 = vld [vmem:[%s6283_s1 + $0x250] sm:$0xff]  ;;  %v2836_v0 = vpack.c.bf16 %v94_v54, %v91_v53  ;;  %v2838_v4 = vpack.c.bf16 %v101_v61, %v98_v57 }
  0x1c   :  { %3197 = vmatpush3.bf16.msra.mxu1 %v3196_v27  ;;  %v108_v63 = vld [vmem:[%s6283_s1 + $0x268] sm:$0xff]  ;;  %1286 = vmatprep.mubr.f32.mxu1 %v667_v51  ;;  %v97_v1 = vld [vmem:[%s6283_s1 + $0x210] sm:$0xff]  ;;  %v3208_v3 = vpack.c.bf16 %v54_v60, %v51_v59  ;;  %v107_v10 = vld [vmem:[%s6283_s1 + $0x260] sm:$0xff]  ;;  %v652_v51 = vcombine.high %v3911_v37, %v3911_v37 }
  0x1d   :  { %2821 = vmatpush1.bf16.msra.mxu0 %v2820_v9  ;;  %3199 = vmatprep.subr.bf16.mxu1 %v3198_v31  ;;  %v100_v2 = vld [vmem:[%s6283_s1 + $0x228] sm:$0xff]  ;;  %v3210_v6 = vpack.c.bf16 %v108_v63, %v105_v62  ;;  %v57_v8 = vld [vmem:[%s6283_s1 + $0xd0] sm:$0xff]  ;;  %v111_v11 = vld [vmem:[%s6283_s1 + $0x280] sm:$0xff] }
  0x1e   :  { %2823 = vmatprep.subr.bf16.mxu0 %v2822_v15  ;;  %v104_v5 = vld [vmem:[%s6283_s1 + $0x248] sm:$0xff]  ;;  %v114_v12 = vld [vmem:[%s6283_s1 + $0x298] sm:$0xff]  ;;  %v2840_v14 = vpack.c.bf16 %v100_v2, %v97_v1  ;;  %v103_v15 = vld [vmem:[%s6283_s1 + $0x240] sm:$0xff]  ;;  %v4090_v1 = vrot.slane %v652_v51, %v3887_v28 }
  0x1f   :  { %v60_v9 = vld [vmem:[%s6283_s1 + $0xe8] sm:$0xff]  ;;  %v106_v16 = vld [vmem:[%s6283_s1 + $0x258] sm:$0xff]  ;;  %v2842_v18 = vpack.c.bf16 %v107_v10, %v104_v5  ;;  %v3214_v20 = vpack.c.bf16 %v114_v12, %v111_v11  ;;  %v63_v21 = vld [vmem:[%s6283_s1 + $0x100] sm:$0xff] }
  0x20   :  { %3201 = vmatpush3.bf16.msra.mxu1 %v3200_v41  ;;  %v3212_v17 = vpack.c.bf16 %v60_v9, %v57_v8  ;;  %v110_v19 = vld [vmem:[%s6283_s1 + $0x278] sm:$0xff]  ;;  %v117_v24 = vld [vmem:[%s6283_s1 + $0x2b0] sm:$0xff]  ;;  %v120_v25 = vld [vmem:[%s6283_s1 + $0x2c8] sm:$0xff]  ;;  %v2844_v26 = vpack.c.bf16 %v106_v16, %v103_v15  ;;  %v668_v16 = vcombine.high %v4090_v1, %v4090_v1 }
  0x21   :  { %2825 = vmatpush1.bf16.msra.mxu0 %v2824_v23  ;;  %3203 = vmatprep.subr.bf16.mxu1 %v3202_v45  ;;  %v66_v22 = vld [vmem:[%s6283_s1 + $0x118] sm:$0xff]  ;;  %v113_v23 = vld [vmem:[%s6283_s1 + $0x290] sm:$0xff]  ;;  %v116_v32 = vld [vmem:[%s6283_s1 + $0x2a8] sm:$0xff]  ;;  %v3218_v33 = vpack.c.bf16 %v120_v25, %v117_v24 }
  0x22   :  { %2827 = vmatprep.subr.bf16.mxu0 %v2826_v29  ;;  %v109_v27 = vld [vmem:[%s6283_s1 + $0x270] sm:$0xff]  ;;  %v112_v29 = vld [vmem:[%s6283_s1 + $0x288] sm:$0xff]  ;;  %v3216_v30 = vpack.c.bf16 %v66_v22, %v63_v21  ;;  %v2846_v31 = vpack.c.bf16 %v113_v23, %v110_v19  ;;  %v119_v36 = vld [vmem:[%s6283_s1 + $0x2c0] sm:$0xff] }
  0x23   :  { %v69_v34 = vld [vmem:[%s6283_s1 + $0x130] sm:$0xff]  ;;  %v72_v35 = vld [vmem:[%s6283_s1 + $0x148] sm:$0xff]  ;;  %v126_v39 = vld [vmem:[%s6283_s1 + $0x2f8] sm:$0xff]  ;;  %v2848_v40 = vpack.c.bf16 %v112_v29, %v109_v27  ;;  %v2850_v45 = vpack.c.bf16 %v119_v36, %v116_v32 }
  0x24   :  { %3205 = vmatpush3.bf16.msra.mxu1 %v3204_v55  ;;  %v115_v41 = vld [vmem:[%s6283_s1 + $0x2a0] sm:$0xff]  ;;  %v3220_v44 = vpack.c.bf16 %v72_v35, %v69_v34  ;;  %v122_v46 = vld [vmem:[%s6283_s1 + $0x2d8] sm:$0xff]  ;;  %v125_v50 = vld [vmem:[%s6283_s1 + $0x2f0] sm:$0xff] }
  0x25   :  { %2829 = vmatpush1.bf16.msra.mxu0 %v2828_v38  ;;  %3207 = vmatprep.subr.bf16.mxu1 %v3206_v58  ;;  %v123_v38 = vld [vmem:[%s6283_s1 + $0x2e0] sm:$0xff]  ;;  %v78_v49 = vld [vmem:[%s6283_s1 + $0x178] sm:$0xff]  ;;  %v180_v53 = vld [vmem:[%s6283_s1 + $0x4a8] sm:$0xff]  ;;  %v2854_v57 = vpack.c.bf16 %v125_v50, %v122_v46 }
  0x26   :  { %2831 = vmatprep.subr.bf16.mxu0 %v2830_v43  ;;  %v118_v43 = vld [vmem:[%s6283_s1 + $0x2b8] sm:$0xff]  ;;  %v3222_v47 = vpack.c.bf16 %v126_v39, %v123_v38  ;;  %v75_v48 = vld [vmem:[%s6283_s1 + $0x160] sm:$0xff]  ;;  %v121_v55 = vld [vmem:[%s6283_s1 + $0x2d0] sm:$0xff] }
  0x27   :  { %v2852_v54 = vpack.c.bf16 %v118_v43, %v115_v41  ;;  %v3224_v37 = vpack.c.bf16 %v78_v49, %v75_v48  ;;  %v128_v58 = vld [vmem:[%s6283_s1 + $0x308] sm:$0xff]  ;;  %v129_v60 = vld [vmem:[%s6283_s1 + $0x310] sm:$0xff]  ;;  %v131_v62 = vld [vmem:[%s6283_s1 + $0x320] sm:$0xff] }
  0x28   :  { %3209 = vmatpush3.bf16.msra.mxu1 %v3208_v3  ;;  %v132_v61 = vld [vmem:[%s6283_s1 + $0x328] sm:$0xff]  ;;  %v183_v63 = vld [vmem:[%s6283_s1 + $0x4c0] sm:$0xff]  ;;  %v134_v8 = vld [vmem:[%s6283_s1 + $0x338] sm:$0xff] }
  0x29   :  { %2833 = vmatpush1.bf16.msra.mxu0 %v2832_v52  ;;  %3211 = vmatprep.subr.bf16.mxu1 %v3210_v6  ;;  %v177_v52 = vld [vmem:[%s6283_s1 + $0x490] sm:$0xff]  ;;  %v127_v3 = vld [vmem:[%s6283_s1 + $0x300] sm:$0xff]  ;;  %v3228_v5 = vpack.c.bf16 %v132_v61, %v129_v60  ;;  %v2858_v6 = vpack.c.bf16 %v131_v62, %v128_v58  ;;  %v138_v11 = vld [vmem:[%s6283_s1 + $0x358] sm:$0xff] }
  0x2a   :  { %2835 = vmatprep.subr.bf16.mxu0 %v2834_v56  ;;  %v124_v56 = vld [vmem:[%s6283_s1 + $0x2e8] sm:$0xff]  ;;  %v3226_v59 = vpack.c.bf16 %v180_v53, %v177_v52  ;;  %v135_v10 = vld [vmem:[%s6283_s1 + $0x340] sm:$0xff]  ;;  %v137_v12 = vld [vmem:[%s6283_s1 + $0x350] sm:$0xff] }
  0x2b   :  { %v2856_v2 = vpack.c.bf16 %v124_v56, %v121_v55  ;;  %v192_v15 = vld [vmem:[%s6283_s1 + $0x508] sm:$0xff]  ;;  %v2862_v21 = vpack.c.bf16 %v137_v12, %v134_v8  ;;  %v141_v24 = vld [vmem:[%s6283_s1 + $0x370] sm:$0xff]  ;;  %v195_v27 = vld [vmem:[%s6283_s1 + $0x520] sm:$0xff] }
  0x2c   :  { %3213 = vmatpush3.bf16.msra.mxu1 %v3212_v17  ;;  %v136_v19 = vld [vmem:[%s6283_s1 + $0x348] sm:$0xff]  ;;  %v198_v29 = vld [vmem:[%s6283_s1 + $0x538] sm:$0xff]  ;;  %v147_v36 = vld [vmem:[%s6283_s1 + $0x3a0] sm:$0xff] }
  0x2d   :  { %2837 = vmatpush1.bf16.msra.mxu0 %v2836_v0  ;;  %3215 = vmatprep.subr.bf16.mxu1 %v3214_v20  ;;  %v186_v0 = vld [vmem:[%s6283_s1 + $0x4d8] sm:$0xff]  ;;  %v3232_v20 = vpack.c.bf16 %v138_v11, %v135_v10  ;;  %v140_v22 = vld [vmem:[%s6283_s1 + $0x368] sm:$0xff]  ;;  %v149_v39 = vld [vmem:[%s6283_s1 + $0x3b0] sm:$0xff] }
  0x2e   :  { %2839 = vmatprep.subr.bf16.mxu0 %v2838_v4  ;;  %v130_v4 = vld [vmem:[%s6283_s1 + $0x318] sm:$0xff]  ;;  %v3230_v9 = vpack.c.bf16 %v186_v0, %v183_v63  ;;  %v144_v25 = vld [vmem:[%s6283_s1 + $0x388] sm:$0xff]  ;;  %v153_v50 = vld [vmem:[%s6283_s1 + $0x3d0] sm:$0xff] }
  0x2f   :  { %v2860_v17 = vpack.c.bf16 %v130_v4, %v127_v3  ;;  %v142_v32 = vld [vmem:[%s6283_s1 + $0x378] sm:$0xff]  ;;  %v204_v41 = vld [vmem:[%s6283_s1 + $0x568] sm:$0xff]  ;;  %v155_v52 = vld [vmem:[%s6283_s1 + $0x3e0] sm:$0xff] }
  0x30   :  { %3217 = vmatpush3.bf16.msra.mxu1 %v3216_v30  ;;  %v146_v35 = vld [vmem:[%s6283_s1 + $0x398] sm:$0xff]  ;;  %v152_v48 = vld [vmem:[%s6283_s1 + $0x3c8] sm:$0xff]  ;;  %v207_v53 = vld [vmem:[%s6283_s1 + $0x580] sm:$0xff] }
  0x31   :  { %2841 = vmatpush1.bf16.msra.mxu0 %v2840_v14  ;;  %3219 = vmatprep.subr.bf16.mxu1 %v3218_v33  ;;  %v189_v14 = vld [vmem:[%s6283_s1 + $0x4f0] sm:$0xff]  ;;  %v3236_v33 = vpack.c.bf16 %v144_v25, %v141_v24  ;;  %v150_v38 = vld [vmem:[%s6283_s1 + $0x3b8] sm:$0xff]  ;;  %v156_v51 = vld [vmem:[%s6283_s1 + $0x3e8] sm:$0xff]  ;;  %v2874_v58 = vpack.c.bf16 %v155_v52, %v152_v48 }
  0x32   :  { %2843 = vmatprep.subr.bf16.mxu0 %v2842_v18  ;;  %v133_v18 = vld [vmem:[%s6283_s1 + $0x330] sm:$0xff]  ;;  %v3234_v23 = vpack.c.bf16 %v192_v15, %v189_v14  ;;  %v3240_v46 = vpack.c.bf16 %v150_v38, %v147_v36  ;;  %v151_v56 = vld [vmem:[%s6283_s1 + $0x3c0] sm:$0xff]  ;;  %v162_v62 = vld [vmem:[%s6283_s1 + $0x418] sm:$0xff] }
  0x33   :  { %v2864_v30 = vpack.c.bf16 %v136_v19, %v133_v18  ;;  %v159_v61 = vld [vmem:[%s6283_s1 + $0x400] sm:$0xff]  ;;  %v161_v63 = vld [vmem:[%s6283_s1 + $0x410] sm:$0xff]  ;;  %v168_v12 = vld [vmem:[%s6283_s1 + $0x448] sm:$0xff] }
  0x34   :  { %3221 = vmatpush3.bf16.msra.mxu1 %v3220_v44  ;;  %v145_v44 = vld [vmem:[%s6283_s1 + $0x390] sm:$0xff]  ;;  %v167_v14 = vld [vmem:[%s6283_s1 + $0x440] sm:$0xff]  ;;  %v166_v19 = vld [vmem:[%s6283_s1 + $0x438] sm:$0xff] }
  0x35   :  { %2845 = vmatpush1.bf16.msra.mxu0 %v2844_v26  ;;  %3223 = vmatprep.subr.bf16.mxu1 %v3222_v47  ;;  %v143_v26 = vld [vmem:[%s6283_s1 + $0x380] sm:$0xff]  ;;  %v2870_v47 = vpack.c.bf16 %v149_v39, %v146_v35  ;;  %v213_v0 = vld [vmem:[%s6283_s1 + $0x5b0] sm:$0xff]  ;;  %v174_v25 = vld [vmem:[%s6283_s1 + $0x478] sm:$0xff] }
  0x36   :  { %2847 = vmatprep.subr.bf16.mxu0 %v2846_v31  ;;  %v139_v31 = vld [vmem:[%s6283_s1 + $0x360] sm:$0xff]  ;;  %v2866_v34 = vpack.c.bf16 %v143_v26, %v140_v22  ;;  %v157_v4 = vld [vmem:[%s6283_s1 + $0x3f0] sm:$0xff]  ;;  %v170_v22 = vld [vmem:[%s6283_s1 + $0x458] sm:$0xff] }
  0x37   :  { %v2868_v43 = vpack.c.bf16 %v142_v32, %v139_v31  ;;  %v165_v11 = vld [vmem:[%s6283_s1 + $0x430] sm:$0xff]  ;;  %v219_v15 = vld [vmem:[%s6283_s1 + $0x5e0] sm:$0xff]  ;;  %v228_v39 = vld [vmem:[%s6283_s1 + $0x628] sm:$0xff] }
  0x38   :  { %3225 = vmatpush3.bf16.msra.mxu1 %v3224_v37  ;;  %v154_v37 = vld [vmem:[%s6283_s1 + $0x3d8] sm:$0xff]  ;;  %v163_v18 = vld [vmem:[%s6283_s1 + $0x420] sm:$0xff]  ;;  %v173_v26 = vld [vmem:[%s6283_s1 + $0x470] sm:$0xff] }
  0x39   :  { %2849 = vmatpush1.bf16.msra.mxu0 %v2848_v40  ;;  %3227 = vmatprep.subr.bf16.mxu1 %v3226_v59  ;;  %v201_v40 = vld [vmem:[%s6283_s1 + $0x550] sm:$0xff]  ;;  %v158_v59 = vld [vmem:[%s6283_s1 + $0x3f8] sm:$0xff]  ;;  %v2876_v3 = vpack.c.bf16 %v154_v37, %v151_v56  ;;  %v171_v24 = vld [vmem:[%s6283_s1 + $0x460] sm:$0xff]  ;;  %v2884_v31 = vpack.c.bf16 %v166_v19, %v163_v18  ;;  %v2886_v35 = vpack.c.bf16 %v173_v26, %v170_v22 }
  0x3a   :  { %2851 = vmatprep.subr.bf16.mxu0 %v2850_v45  ;;  %v148_v45 = vld [vmem:[%s6283_s1 + $0x3a8] sm:$0xff]  ;;  %v3242_v49 = vpack.c.bf16 %v204_v41, %v201_v40  ;;  %v2878_v8 = vpack.c.bf16 %v161_v63, %v158_v59  ;;  %v169_v32 = vld [vmem:[%s6283_s1 + $0x450] sm:$0xff]  ;;  %v179_v40 = vld [vmem:[%s6283_s1 + $0x4a0] sm:$0xff] }
  0x3b   :  { %1287 = vmatmul.mubr.f32.vlgmr.msra.gmra.mrb[2].mxu1 %v3921_v42  ;;  %v2872_v55 = vpack.c.bf16 %v148_v45, %v145_v44  ;;  %v225_v38 = vld [vmem:[%s6283_s1 + $0x610] sm:$0xff]  ;;  %v279_v41 = vld [vmem:[%s6283_s1 + $0x7c0] sm:$0xff]  ;;  %v288_v56 = vld [vmem:[%s6283_s1 + $0x808] sm:$0xff] }
  0x3c   :  { %3229 = vmatpush3.bf16.msra.mxu1 %v3228_v5  ;;  %1356 = vmatprep.mubr.f32.mxu1 %v668_v16  ;;  %v160_v5 = vld [vmem:[%s6283_s1 + $0x408] sm:$0xff]  ;;  %v3260_v48 = vpack.c.bf16 %v228_v39, %v225_v38  ;;  %v231_v52 = vld [vmem:[%s6283_s1 + $0x640] sm:$0xff]  ;;  %v297_v18 = vld [vmem:[%s6283_s1 + $0x850] sm:$0xff] }
  0x3d   :  { %2853 = vmatpush1.bf16.msra.mxu0 %v2852_v54  ;;  %3231 = vmatprep.subr.bf16.mxu1 %v3230_v9  ;;  %v210_v54 = vld [vmem:[%s6283_s1 + $0x598] sm:$0xff]  ;;  %v164_v9 = vld [vmem:[%s6283_s1 + $0x428] sm:$0xff] }
  0x3e   :  { %2855 = vmatprep.subr.bf16.mxu0 %v2854_v57  ;;  %v3244_v57 = vpack.c.bf16 %v156_v51, %v153_v50  ;;  %v3246_v60 = vpack.c.bf16 %v210_v54, %v207_v53  ;;  %v182_v50 = vld [vmem:[%s6283_s1 + $0x4b8] sm:$0xff]  ;;  %v185_v54 = vld [vmem:[%s6283_s1 + $0x4d0] sm:$0xff]  ;;  %v184_v59 = vld [vmem:[%s6283_s1 + $0x4c8] sm:$0xff] }
  0x3f   :  { %v234_v53 = vld [vmem:[%s6283_s1 + $0x658] sm:$0xff]  ;;  %v300_v19 = vld [vmem:[%s6283_s1 + $0x868] sm:$0xff] }
  0x40   :  { %3233 = vmatpush3.bf16.msra.mxu1 %v3232_v20  ;;  %v3252_v20 = vpack.c.bf16 %v168_v12, %v165_v11  ;;  %v194_v12 = vld [vmem:[%s6283_s1 + $0x518] sm:$0xff]  ;;  %v196_v22 = vld [vmem:[%s6283_s1 + $0x528] sm:$0xff]  ;;  %v3274_v26 = vpack.c.bf16 %v300_v19, %v297_v18  ;;  %v321_v18 = vld [vmem:[%s6283_s1 + $0x910] sm:$0xff] }
  0x41   :  { %2857 = vmatpush1.bf16.msra.mxu0 %v2856_v2  ;;  %3235 = vmatprep.subr.bf16.mxu1 %v3234_v23  ;;  %v216_v2 = vld [vmem:[%s6283_s1 + $0x5c8] sm:$0xff]  ;;  %v206_v39 = vld [vmem:[%s6283_s1 + $0x578] sm:$0xff] }
  0x42   :  { %2859 = vmatprep.subr.bf16.mxu0 %v2858_v6  ;;  %v3248_v6 = vpack.c.bf16 %v162_v62, %v159_v61  ;;  %v3250_v10 = vpack.c.bf16 %v216_v2, %v213_v0  ;;  %v2894_v61 = vpack.c.bf16 %v185_v54, %v182_v50  ;;  %v188_v62 = vld [vmem:[%s6283_s1 + $0x4e8] sm:$0xff]  ;;  %v237_v0 = vld [vmem:[%s6283_s1 + $0x670] sm:$0xff] }
  0x43   :  { %v240_v2 = vld [vmem:[%s6283_s1 + $0x688] sm:$0xff] }
  0x44   :  { %790 = vmatmul.mubr.f32.vlgmr.msra.gmra.mrb[0].mxu0 %v3921_v42  ;;  %v3238_v42 = vpack.c.bf16 %v198_v29, %v195_v27  ;;  %3237 = vmatpush3.bf16.msra.mxu1 %v3236_v33  ;;  %v273_v27 = vld [vmem:[%s6283_s1 + $0x790] sm:$0xff]  ;;  %v276_v29 = vld [vmem:[%s6283_s1 + $0x7a8] sm:$0xff] }
  0x45   :  { %2861 = vmatpush1.bf16.msra.mxu0 %v2860_v17  ;;  %860 = vmatprep.mubr.f32.mxu0 %v668_v16  ;;  %v222_v16 = vld [vmem:[%s6283_s1 + $0x5f8] sm:$0xff]  ;;  %v2880_v17 = vpack.c.bf16 %v160_v5, %v157_v4  ;;  %v172_v33 = vld [vmem:[%s6283_s1 + $0x468] sm:$0xff]  ;;  %v3258_v36 = vpack.c.bf16 %v276_v29, %v273_v27  ;;  %v291_v4 = vld [vmem:[%s6283_s1 + $0x820] sm:$0xff] }
  0x46   :  { %2863 = vmatprep.subr.bf16.mxu0 %v2862_v21  ;;  %3239 = vmatprep.subr.bf16.mxu1 %v3238_v42  ;;  %v2882_v21 = vpack.c.bf16 %v167_v14, %v164_v9  ;;  %v3254_v23 = vpack.c.bf16 %v222_v16, %v219_v15  ;;  %v176_v42 = vld [vmem:[%s6283_s1 + $0x488] sm:$0xff]  ;;  %v2888_v45 = vpack.c.bf16 %v172_v33, %v169_v32  ;;  %v294_v5 = vld [vmem:[%s6283_s1 + $0x838] sm:$0xff]  ;;  %v243_v15 = vld [vmem:[%s6283_s1 + $0x6a0] sm:$0xff] }
  0x47   :  { %v190_v9 = vld [vmem:[%s6283_s1 + $0x4f8] sm:$0xff]  ;;  %v3270_v14 = vpack.c.bf16 %v294_v5, %v291_v4  ;;  %v249_v27 = vld [vmem:[%s6283_s1 + $0x6d0] sm:$0xff]  ;;  %v252_v29 = vld [vmem:[%s6283_s1 + $0x6e8] sm:$0xff] }
  0x48   :  { %3241 = vmatpush3.bf16.msra.mxu1 %v3240_v46  ;;  %v175_v46 = vld [vmem:[%s6283_s1 + $0x480] sm:$0xff]  ;;  %v246_v16 = vld [vmem:[%s6283_s1 + $0x6b8] sm:$0xff]  ;;  %v208_v50 = vld [vmem:[%s6283_s1 + $0x588] sm:$0xff] }
  0x49   :  { %2865 = vmatpush1.bf16.msra.mxu0 %v2864_v30  ;;  %3243 = vmatprep.subr.bf16.mxu1 %v3242_v49  ;;  %v4267_v30 = vld [vmem:[%s6282_s0 + $0x8] sm:$0xff]  ;;  %v2890_v49 = vpack.c.bf16 %v179_v40, %v176_v42  ;;  %v303_v32 = vld [vmem:[%s6283_s1 + $0x880] sm:$0xff]  ;;  %v306_v33 = vld [vmem:[%s6283_s1 + $0x898] sm:$0xff] }
  0x4a   :  { %2867 = vmatprep.subr.bf16.mxu0 %v2866_v34  ;;  %v3256_v34 = vpack.c.bf16 %v174_v25, %v171_v24  ;;  %v4295_v44 = vrot.slane %v4267_v30, %v3887_v28  ;;  %v200_v25 = vld [vmem:[%s6283_s1 + $0x548] sm:$0xff]  ;;  %v202_v42 = vld [vmem:[%s6283_s1 + $0x558] sm:$0xff]  ;;  %v3278_v40 = vpack.c.bf16 %v306_v33, %v303_v32  ;;  %v267_v4 = vld [vmem:[%s6283_s1 + $0x760] sm:$0xff] }
  0x4b   :  { %v270_v5 = vld [vmem:[%s6283_s1 + $0x778] sm:$0xff]  ;;  %v324_v19 = vld [vmem:[%s6283_s1 + $0x928] sm:$0xff]  ;;  %v327_v33 = vld [vmem:[%s6283_s1 + $0x940] sm:$0xff] }
  0x4c   :  { %3245 = vmatpush3.bf16.msra.mxu1 %v3244_v57  ;;  %v4323_v37 = vcombine.high %v4295_v44, %v4295_v44 }
  0x4d   :  { %2869 = vmatpush1.bf16.msra.mxu0 %v2868_v43  ;;  %3247 = vmatprep.subr.bf16.mxu1 %v3246_v60  ;;  %v282_v43 = vld [vmem:[%s6283_s1 + $0x7d8] sm:$0xff]  ;;  %v3264_v60 = vpack.c.bf16 %v234_v53, %v231_v52  ;;  %v212_v53 = vld [vmem:[%s6283_s1 + $0x5a8] sm:$0xff] }
  0x4e   :  { %2871 = vmatprep.subr.bf16.mxu0 %v2870_v47  ;;  %v178_v47 = vld [vmem:[%s6283_s1 + $0x498] sm:$0xff]  ;;  %v3262_v51 = vpack.c.bf16 %v282_v43, %v279_v41  ;;  %v255_v41 = vld [vmem:[%s6283_s1 + $0x700] sm:$0xff] }
  0x4f   :  { %v2892_v57 = vpack.c.bf16 %v178_v47, %v175_v46  ;;  %v258_v43 = vld [vmem:[%s6283_s1 + $0x718] sm:$0xff]  ;;  %v309_v46 = vld [vmem:[%s6283_s1 + $0x8b0] sm:$0xff]  ;;  %v312_v47 = vld [vmem:[%s6283_s1 + $0x8c8] sm:$0xff] }
  0x50   :  { %3249 = vmatpush3.bf16.msra.mxu1 %v3248_v6  ;;  %v3282_v54 = vpack.c.bf16 %v312_v47, %v309_v46  ;;  %v236_v46 = vld [vmem:[%s6283_s1 + $0x668] sm:$0xff] }
  0x51   :  { %2873 = vmatpush1.bf16.msra.mxu0 %v2872_v55  ;;  %3251 = vmatprep.subr.bf16.mxu1 %v3250_v10  ;;  %v285_v55 = vld [vmem:[%s6283_s1 + $0x7f0] sm:$0xff]  ;;  %v3268_v10 = vpack.c.bf16 %v240_v2, %v237_v0  ;;  %v218_v2 = vld [vmem:[%s6283_s1 + $0x5d8] sm:$0xff] }
  0x52   :  { %2875 = vmatprep.subr.bf16.mxu0 %v2874_v58  ;;  %v181_v58 = vld [vmem:[%s6283_s1 + $0x4b0] sm:$0xff]  ;;  %v3266_v63 = vpack.c.bf16 %v288_v56, %v285_v55  ;;  %v264_v56 = vld [vmem:[%s6283_s1 + $0x748] sm:$0xff] }
  0x53   :  { %v2896_v6 = vpack.c.bf16 %v184_v59, %v181_v58  ;;  %v261_v55 = vld [vmem:[%s6283_s1 + $0x730] sm:$0xff]  ;;  %v315_v58 = vld [vmem:[%s6283_s1 + $0x8e0] sm:$0xff]  ;;  %v318_v59 = vld [vmem:[%s6283_s1 + $0x8f8] sm:$0xff] }
  0x54   :  { %3253 = vmatpush3.bf16.msra.mxu1 %v3252_v20 }
  0x55   :  { %2877 = vmatpush1.bf16.msra.mxu0 %v2876_v3  ;;  %3255 = vmatprep.subr.bf16.mxu1 %v3254_v23  ;;  %v191_v3 = vld [vmem:[%s6283_s1 + $0x500] sm:$0xff]  ;;  %v3272_v23 = vpack.c.bf16 %v246_v16, %v243_v15  ;;  %v3288_v15 = vpack.c.bf16 %v270_v5, %v267_v4 }
  0x56   :  { %2879 = vmatprep.subr.bf16.mxu0 %v2878_v8  ;;  %v187_v8 = vld [vmem:[%s6283_s1 + $0x4e0] sm:$0xff]  ;;  %v2898_v11 = vpack.c.bf16 %v191_v3, %v188_v62  ;;  %v214_v62 = vld [vmem:[%s6283_s1 + $0x5b8] sm:$0xff]  ;;  %v3286_v3 = vpack.c.bf16 %v318_v59, %v315_v58 }
  0x57   :  { %v2900_v20 = vpack.c.bf16 %v190_v9, %v187_v8  ;;  %v369_v8 = vld [vmem:[%s6283_s1 + $0xa90] sm:$0xff]  ;;  %v372_v9 = vld [vmem:[%s6283_s1 + $0xaa8] sm:$0xff]  ;;  %v242_v58 = vld [vmem:[%s6283_s1 + $0x698] sm:$0xff] }
  0x58   :  { %3257 = vmatpush3.bf16.msra.mxu1 %v3256_v34  ;;  %v339_v59 = vld [vmem:[%s6283_s1 + $0x9a0] sm:$0xff] }
  0x59   :  { %2881 = vmatpush1.bf16.msra.mxu0 %v2880_v17  ;;  %3259 = vmatprep.subr.bf16.mxu1 %v3258_v36  ;;  %v197_v17 = vld [vmem:[%s6283_s1 + $0x530] sm:$0xff]  ;;  %v3276_v36 = vpack.c.bf16 %v252_v29, %v249_v27  ;;  %v3292_v27 = vpack.c.bf16 %v324_v19, %v321_v18  ;;  %v254_v18 = vld [vmem:[%s6283_s1 + $0x6f8] sm:$0xff] }
  0x5a   :  { %2883 = vmatprep.subr.bf16.mxu0 %v2882_v21  ;;  %v193_v21 = vld [vmem:[%s6283_s1 + $0x510] sm:$0xff]  ;;  %v2902_v24 = vpack.c.bf16 %v197_v17, %v194_v12  ;;  %v224_v17 = vld [vmem:[%s6283_s1 + $0x608] sm:$0xff] }
  0x5b   :  { %1357 = vmatmul.mubr.f32.vlgmr.msra.gmra.mrb[4].mxu1 %v4090_v1  ;;  %v2904_v34 = vpack.c.bf16 %v196_v22, %v193_v21  ;;  %v217_v12 = vld [vmem:[%s6283_s1 + $0x5d0] sm:$0xff]  ;;  %v375_v21 = vld [vmem:[%s6283_s1 + $0xac0] sm:$0xff]  ;;  %v378_v22 = vld [vmem:[%s6283_s1 + $0xad8] sm:$0xff] }
  0x5c   :  { %3261 = vmatpush3.bf16.msra.mxu1 %v3260_v48  ;;  %1426 = vmatprep.mubr.f32.mxu1 %v4323_v37  ;;  %v3294_v32 = vpack.c.bf16 %v378_v22, %v375_v21  ;;  %v354_v21 = vld [vmem:[%s6283_s1 + $0xa18] sm:$0xff]  ;;  %v257_v22 = vld [vmem:[%s6283_s1 + $0x710] sm:$0xff] }
  0x5d   :  { %2885 = vmatpush1.bf16.msra.mxu0 %v2884_v31  ;;  %3263 = vmatprep.subr.bf16.mxu1 %v3262_v51  ;;  %v203_v31 = vld [vmem:[%s6283_s1 + $0x560] sm:$0xff]  ;;  %v3280_v51 = vpack.c.bf16 %v258_v43, %v255_v41  ;;  %v232_v41 = vld [vmem:[%s6283_s1 + $0x648] sm:$0xff] }
  0x5e   :  { %2887 = vmatprep.subr.bf16.mxu0 %v2886_v35  ;;  %v199_v35 = vld [vmem:[%s6283_s1 + $0x540] sm:$0xff]  ;;  %v2906_v38 = vpack.c.bf16 %v203_v31, %v200_v25  ;;  %v230_v31 = vld [vmem:[%s6283_s1 + $0x638] sm:$0xff] }
  0x5f   :  { %v2908_v48 = vpack.c.bf16 %v202_v42, %v199_v35  ;;  %v223_v25 = vld [vmem:[%s6283_s1 + $0x600] sm:$0xff]  ;;  %v233_v35 = vld [vmem:[%s6283_s1 + $0x650] sm:$0xff] }
  0x60   :  { %3265 = vmatpush3.bf16.msra.mxu1 %v3264_v60  ;;  %v381_v42 = vld [vmem:[%s6283_s1 + $0xaf0] sm:$0xff] }
  0x61   :  { %2889 = vmatpush1.bf16.msra.mxu0 %v2888_v45  ;;  %3267 = vmatprep.subr.bf16.mxu1 %v3266_v63  ;;  %v209_v45 = vld [vmem:[%s6283_s1 + $0x590] sm:$0xff]  ;;  %v3284_v63 = vpack.c.bf16 %v264_v56, %v261_v55  ;;  %v238_v55 = vld [vmem:[%s6283_s1 + $0x678] sm:$0xff] }
  0x62   :  { %2891 = vmatprep.subr.bf16.mxu0 %v2890_v49  ;;  %v205_v49 = vld [vmem:[%s6283_s1 + $0x570] sm:$0xff]  ;;  %v2910_v52 = vpack.c.bf16 %v209_v45, %v206_v39  ;;  %v2926_v45 = vpack.c.bf16 %v233_v35, %v230_v31 }
  0x63   :  { %v2912_v60 = vpack.c.bf16 %v208_v50, %v205_v49  ;;  %v336_v49 = vld [vmem:[%s6283_s1 + $0x988] sm:$0xff]  ;;  %v239_v50 = vld [vmem:[%s6283_s1 + $0x680] sm:$0xff]  ;;  %v357_v35 = vld [vmem:[%s6283_s1 + $0xa30] sm:$0xff] }
  0x64   :  { %3269 = vmatpush3.bf16.msra.mxu1 %v3268_v10  ;;  %v669_v10 = vcombine.high %v4267_v30, %v4267_v30  ;;  %v3290_v30 = vpack.c.bf16 %v372_v9, %v369_v8  ;;  %v345_v8 = vld [vmem:[%s6283_s1 + $0x9d0] sm:$0xff]  ;;  %v348_v9 = vld [vmem:[%s6283_s1 + $0x9e8] sm:$0xff] }
  0x65   :  { %2893 = vmatpush1.bf16.msra.mxu0 %v2892_v57  ;;  %3271 = vmatprep.subr.bf16.mxu1 %v3270_v14  ;;  %v215_v57 = vld [vmem:[%s6283_s1 + $0x5c0] sm:$0xff]  ;;  %v220_v14 = vld [vmem:[%s6283_s1 + $0x5e8] sm:$0xff] }
  0x66   :  { %2895 = vmatprep.subr.bf16.mxu0 %v2894_v61  ;;  %v211_v61 = vld [vmem:[%s6283_s1 + $0x5a0] sm:$0xff]  ;;  %v2914_v0 = vpack.c.bf16 %v215_v57, %v212_v53  ;;  %v2930_v57 = vpack.c.bf16 %v239_v50, %v236_v46 }
  0x67   :  { %v363_v50 = vld [vmem:[%s6283_s1 + $0xa60] sm:$0xff] }
  0x68   :  { %3273 = vmatpush3.bf16.msra.mxu1 %v3272_v23  ;;  %v4498_v23 = vrot.slane %v669_v10, %v3887_v28  ;;  %v251_v10 = vld [vmem:[%s6283_s1 + $0x6e0] sm:$0xff] }
  0x69   :  { %2897 = vmatpush1.bf16.msra.mxu0 %v2896_v6  ;;  %3275 = vmatprep.subr.bf16.mxu1 %v3274_v26  ;;  %v221_v6 = vld [vmem:[%s6283_s1 + $0x5f0] sm:$0xff]  ;;  %v226_v26 = vld [vmem:[%s6283_s1 + $0x618] sm:$0xff] }
  0x6a   :  { %2899 = vmatprep.subr.bf16.mxu0 %v2898_v11  ;;  %v2916_v11 = vpack.c.bf16 %v214_v62, %v211_v61  ;;  %v2918_v16 = vpack.c.bf16 %v221_v6, %v218_v2  ;;  %v2924_v39 = vpack.c.bf16 %v226_v26, %v223_v25  ;;  %v245_v61 = vld [vmem:[%s6283_s1 + $0x6b0] sm:$0xff]  ;;  %v248_v6 = vld [vmem:[%s6283_s1 + $0x6c8] sm:$0xff] }
  0x6b   :  { %v393_v62 = vld [vmem:[%s6283_s1 + $0xb50] sm:$0xff]  ;;  %v2934_v5 = vpack.c.bf16 %v245_v61, %v242_v58  ;;  %v408_v25 = vld [vmem:[%s6283_s1 + $0xbc8] sm:$0xff] }
  0x6c   :  { %3277 = vmatpush3.bf16.msra.mxu1 %v3276_v36  ;;  %v384_v36 = vld [vmem:[%s6283_s1 + $0xb08] sm:$0xff]  ;;  %v241_v2 = vld [vmem:[%s6283_s1 + $0x690] sm:$0xff] }
  0x6d   :  { %2901 = vmatpush1.bf16.msra.mxu0 %v2900_v20  ;;  %3279 = vmatprep.subr.bf16.mxu1 %v3278_v40  ;;  %v227_v20 = vld [vmem:[%s6283_s1 + $0x620] sm:$0xff]  ;;  %v229_v40 = vld [vmem:[%s6283_s1 + $0x630] sm:$0xff]  ;;  %v3298_v47 = vpack.c.bf16 %v384_v36, %v381_v42  ;;  %v360_v42 = vld [vmem:[%s6283_s1 + $0xa48] sm:$0xff] }
  0x6e   :  { %2903 = vmatprep.subr.bf16.mxu0 %v2902_v24  ;;  %v2920_v24 = vpack.c.bf16 %v220_v14, %v217_v12  ;;  %v2922_v29 = vpack.c.bf16 %v227_v20, %v224_v17  ;;  %v2928_v53 = vpack.c.bf16 %v232_v41, %v229_v40  ;;  %v402_v12 = vld [vmem:[%s6283_s1 + $0xb98] sm:$0xff]  ;;  %v3308_v17 = vpack.c.bf16 %v348_v9, %v345_v8  ;;  %v351_v20 = vld [vmem:[%s6283_s1 + $0xa00] sm:$0xff]  ;;  %v268_v58 = vld [vmem:[%s6283_s1 + $0x768] sm:$0xff] }
  0x6f   :  { %v3312_v31 = vpack.c.bf16 %v354_v21, %v351_v20  ;;  %v263_v36 = vld [vmem:[%s6283_s1 + $0x740] sm:$0xff]  ;;  %v414_v40 = vld [vmem:[%s6283_s1 + $0xbf8] sm:$0xff]  ;;  %v3316_v46 = vpack.c.bf16 %v360_v42, %v357_v35  ;;  %v280_v20 = vld [vmem:[%s6283_s1 + $0x7c8] sm:$0xff] }
  0x70   :  { %3281 = vmatpush3.bf16.msra.mxu1 %v3280_v51  ;;  %v387_v51 = vld [vmem:[%s6283_s1 + $0xb20] sm:$0xff]  ;;  %v286_v35 = vld [vmem:[%s6283_s1 + $0x7f8] sm:$0xff] }
  0x71   :  { %2905 = vmatpush1.bf16.msra.mxu0 %v2904_v34  ;;  %3283 = vmatprep.subr.bf16.mxu1 %v3282_v54  ;;  %v330_v34 = vld [vmem:[%s6283_s1 + $0x958] sm:$0xff]  ;;  %v235_v54 = vld [vmem:[%s6283_s1 + $0x660] sm:$0xff] }
  0x72   :  { %2907 = vmatprep.subr.bf16.mxu0 %v2906_v38  ;;  %v4526_v38 = vcombine.high %v4498_v23, %v4498_v23  ;;  %v3296_v43 = vpack.c.bf16 %v330_v34, %v327_v33  ;;  %v260_v33 = vld [vmem:[%s6283_s1 + $0x728] sm:$0xff] }
  0x74   :  { %3285 = vmatpush3.bf16.msra.mxu1 %v3284_v63  ;;  %v396_v63 = vld [vmem:[%s6283_s1 + $0xb68] sm:$0xff] }
  0x75   :  { %2909 = vmatpush1.bf16.msra.mxu0 %v2908_v48  ;;  %3287 = vmatprep.subr.bf16.mxu1 %v3286_v3  ;;  %v333_v48 = vld [vmem:[%s6283_s1 + $0x970] sm:$0xff]  ;;  %v244_v3 = vld [vmem:[%s6283_s1 + $0x6a8] sm:$0xff] }
  0x76   :  { %2911 = vmatprep.subr.bf16.mxu0 %v2910_v52  ;;  %v390_v52 = vld [vmem:[%s6283_s1 + $0xb38] sm:$0xff]  ;;  %v3300_v56 = vpack.c.bf16 %v336_v49, %v333_v48  ;;  %v2936_v14 = vpack.c.bf16 %v244_v3, %v241_v2  ;;  %v471_v2 = vld [vmem:[%s6283_s1 + $0xdc0] sm:$0xff] }
  0x77   :  { %v266_v48 = vld [vmem:[%s6283_s1 + $0x758] sm:$0xff] }
  0x78   :  { %3289 = vmatpush3.bf16.msra.mxu1 %v3288_v15  ;;  %v247_v15 = vld [vmem:[%s6283_s1 + $0x6c0] sm:$0xff]  ;;  %v474_v3 = vld [vmem:[%s6283_s1 + $0xdd8] sm:$0xff] }
  0x79   :  { %2913 = vmatpush1.bf16.msra.mxu0 %v2912_v60  ;;  %3291 = vmatprep.subr.bf16.mxu1 %v3290_v30  ;;  %v342_v60 = vld [vmem:[%s6283_s1 + $0x9b8] sm:$0xff]  ;;  %v2938_v30 = vpack.c.bf16 %v251_v10, %v248_v6  ;;  %v271_v6 = vld [vmem:[%s6283_s1 + $0x780] sm:$0xff] }
  0x7a   :  { %2915 = vmatprep.subr.bf16.mxu0 %v2914_v0  ;;  %v2932_v0 = vpack.c.bf16 %v238_v55, %v235_v54  ;;  %v3304_v4 = vpack.c.bf16 %v342_v60, %v339_v59  ;;  %v468_v54 = vld [vmem:[%s6283_s1 + $0xda8] sm:$0xff]  ;;  %v4679_v55 = vld [vmem:[%s6282_s0 + $0x10] sm:$0xff]  ;;  %v278_v10 = vld [vmem:[%s6283_s1 + $0x7b8] sm:$0xff] }
  0x7b   :  { %1427 = vmatmul.mubr.f32.vlgmr.msra.gmra.mrb[6].mxu1 %v4295_v44  ;;  %v272_v60 = vld [vmem:[%s6283_s1 + $0x788] sm:$0xff] }
  0x7c   :  { %3293 = vmatpush3.bf16.msra.mxu1 %v3292_v27  ;;  %1496 = vmatprep.mubr.f32.mxu1 %v4526_v38  ;;  %v253_v27 = vld [vmem:[%s6283_s1 + $0x6f0] sm:$0xff] }
  0x7d   :  { %2917 = vmatpush1.bf16.msra.mxu0 %v2916_v11  ;;  %3295 = vmatprep.subr.bf16.mxu1 %v3294_v32  ;;  %v399_v11 = vld [vmem:[%s6283_s1 + $0xb80] sm:$0xff]  ;;  %v2942_v32 = vpack.c.bf16 %v257_v22, %v254_v18 }
  0x7e   :  { %2919 = vmatprep.subr.bf16.mxu0 %v2918_v16  ;;  %v250_v16 = vld [vmem:[%s6283_s1 + $0x6d8] sm:$0xff]  ;;  %v3310_v19 = vpack.c.bf16 %v402_v12, %v399_v11  ;;  %v3326_v11 = vpack.c.bf16 %v474_v3, %v471_v2  ;;  %v423_v12 = vld [vmem:[%s6283_s1 + $0xc40] sm:$0xff]  ;;  %v305_v3 = vld [vmem:[%s6283_s1 + $0x890] sm:$0xff] }
  0x7f   :  { %v2940_v26 = vpack.c.bf16 %v250_v16, %v247_v15  ;;  %v281_v15 = vld [vmem:[%s6283_s1 + $0x7d0] sm:$0xff] }
  0x80   :  { %3297 = vmatpush3.bf16.msra.mxu1 %v3296_v43  ;;  %v259_v43 = vld [vmem:[%s6283_s1 + $0x720] sm:$0xff]  ;;  %v477_v16 = vld [vmem:[%s6283_s1 + $0xdf0] sm:$0xff]  ;;  %v2958_v22 = vpack.c.bf16 %v281_v15, %v278_v10 }
  0x81   :  { %2921 = vmatpush1.bf16.msra.mxu0 %v2920_v24  ;;  %3299 = vmatprep.subr.bf16.mxu1 %v3298_v47  ;;  %v405_v24 = vld [vmem:[%s6283_s1 + $0xbb0] sm:$0xff]  ;;  %v2946_v47 = vpack.c.bf16 %v263_v36, %v260_v33 }
  0x82   :  { %2923 = vmatprep.subr.bf16.mxu0 %v2922_v29  ;;  %v256_v29 = vld [vmem:[%s6283_s1 + $0x708] sm:$0xff]  ;;  %v3314_v34 = vpack.c.bf16 %v408_v25, %v405_v24 }
  0x83   :  { %v2944_v41 = vpack.c.bf16 %v256_v29, %v253_v27  ;;  %v284_v24 = vld [vmem:[%s6283_s1 + $0x7e8] sm:$0xff]  ;;  %v287_v29 = vld [vmem:[%s6283_s1 + $0x800] sm:$0xff] }
  0x84   :  { %861 = vmatmul.mubr.f32.vlgmr.msra.gmra.mrb[0].mxu0 %v4090_v1  ;;  %v3302_v1 = vpack.c.bf16 %v390_v52, %v387_v51  ;;  %3301 = vmatpush3.bf16.msra.mxu1 %v3300_v56  ;;  %v366_v51 = vld [vmem:[%s6283_s1 + $0xa78] sm:$0xff]  ;;  %v269_v52 = vld [vmem:[%s6283_s1 + $0x770] sm:$0xff]  ;;  %v432_v27 = vld [vmem:[%s6283_s1 + $0xc88] sm:$0xff]  ;;  %v2962_v36 = vpack.c.bf16 %v287_v29, %v284_v24 }
  0x85   :  { %2925 = vmatpush1.bf16.msra.mxu0 %v2924_v39  ;;  %931 = vmatprep.mubr.f32.mxu0 %v4323_v37  ;;  %v3306_v37 = vpack.c.bf16 %v396_v63, %v393_v62  ;;  %v411_v39 = vld [vmem:[%s6283_s1 + $0xbe0] sm:$0xff]  ;;  %v2950_v59 = vpack.c.bf16 %v269_v52, %v266_v48  ;;  %v417_v62 = vld [vmem:[%s6283_s1 + $0xc10] sm:$0xff]  ;;  %v420_v63 = vld [vmem:[%s6283_s1 + $0xc28] sm:$0xff] }
  0x86   :  { %2927 = vmatprep.subr.bf16.mxu0 %v2926_v45  ;;  %3303 = vmatprep.subr.bf16.mxu1 %v3302_v1  ;;  %v262_v45 = vld [vmem:[%s6283_s1 + $0x738] sm:$0xff]  ;;  %v3318_v49 = vpack.c.bf16 %v414_v40, %v411_v39  ;;  %v3320_v1 = vpack.c.bf16 %v366_v51, %v363_v50  ;;  %v3324_v8 = vpack.c.bf16 %v420_v63, %v417_v62  ;;  %v292_v50 = vld [vmem:[%s6283_s1 + $0x828] sm:$0xff] }
  0x87   :  { %v2948_v56 = vpack.c.bf16 %v262_v45, %v259_v43  ;;  %v290_v39 = vld [vmem:[%s6283_s1 + $0x818] sm:$0xff]  ;;  %v293_v45 = vld [vmem:[%s6283_s1 + $0x830] sm:$0xff] }
  0x88   :  { %3305 = vmatpush3.bf16.msra.mxu1 %v3304_v4  ;;  %v4707_v4 = vrot.slane %v4679_v55, %v3887_v28  ;;  %v438_v43 = vld [vmem:[%s6283_s1 + $0xcb8] sm:$0xff]  ;;  %v2966_v52 = vpack.c.bf16 %v293_v45, %v290_v39 }
  0x89   :  { %2929 = vmatpush1.bf16.msra.mxu0 %v2928_v53  ;;  %3307 = vmatprep.subr.bf16.mxu1 %v3306_v37  ;;  %v465_v53 = vld [vmem:[%s6283_s1 + $0xd90] sm:$0xff]  ;;  %v274_v37 = vld [vmem:[%s6283_s1 + $0x798] sm:$0xff] }
  0x8a   :  { %2931 = vmatprep.subr.bf16.mxu0 %v2930_v57  ;;  %v265_v57 = vld [vmem:[%s6283_s1 + $0x750] sm:$0xff]  ;;  %v3322_v61 = vpack.c.bf16 %v468_v54, %v465_v53  ;;  %v2956_v18 = vpack.c.bf16 %v274_v37, %v271_v6  ;;  %v296_v53 = vld [vmem:[%s6283_s1 + $0x848] sm:$0xff]  ;;  %v298_v62 = vld [vmem:[%s6283_s1 + $0x858] sm:$0xff] }
  0x8b   :  { %v302_v63 = vld [vmem:[%s6283_s1 + $0x878] sm:$0xff]  ;;  %v447_v6 = vld [vmem:[%s6283_s1 + $0xd00] sm:$0xff] }
  0x8c   :  { %3309 = vmatpush3.bf16.msra.mxu1 %v3308_v17  ;;  %v480_v17 = vld [vmem:[%s6283_s1 + $0xe08] sm:$0xff]  ;;  %v450_v37 = vld [vmem:[%s6283_s1 + $0xd18] sm:$0xff] }
  0x8d   :  { %2933 = vmatpush1.bf16.msra.mxu0 %v2932_v0  ;;  %3311 = vmatprep.subr.bf16.mxu1 %v3310_v19  ;;  %v275_v0 = vld [vmem:[%s6283_s1 + $0x7a0] sm:$0xff]  ;;  %v277_v19 = vld [vmem:[%s6283_s1 + $0x7b0] sm:$0xff]  ;;  %v3330_v25 = vpack.c.bf16 %v480_v17, %v477_v16 }
  0x8e   :  { %2935 = vmatprep.subr.bf16.mxu0 %v2934_v5  ;;  %v2952_v5 = vpack.c.bf16 %v268_v58, %v265_v57  ;;  %v2954_v9 = vpack.c.bf16 %v275_v0, %v272_v60  ;;  %v2960_v33 = vpack.c.bf16 %v280_v20, %v277_v19  ;;  %v444_v57 = vld [vmem:[%s6283_s1 + $0xce8] sm:$0xff]  ;;  %v299_v58 = vld [vmem:[%s6283_s1 + $0x860] sm:$0xff] }
  0x8f   :  { %v2970_v2 = vpack.c.bf16 %v299_v58, %v296_v53 }
  0x90   :  { %3313 = vmatpush3.bf16.msra.mxu1 %v3312_v31  ;;  %v483_v31 = vld [vmem:[%s6283_s1 + $0xe20] sm:$0xff] }
  0x91   :  { %2937 = vmatpush1.bf16.msra.mxu0 %v2936_v14  ;;  %3315 = vmatprep.subr.bf16.mxu1 %v3314_v34  ;;  %v426_v14 = vld [vmem:[%s6283_s1 + $0xc58] sm:$0xff]  ;;  %v283_v34 = vld [vmem:[%s6283_s1 + $0x7e0] sm:$0xff] }
  0x92   :  { %2939 = vmatprep.subr.bf16.mxu0 %v2938_v30  ;;  %v4735_v30 = vcombine.high %v4707_v4, %v4707_v4  ;;  %v3328_v21 = vpack.c.bf16 %v426_v14, %v423_v12  ;;  %v2964_v48 = vpack.c.bf16 %v286_v35, %v283_v34 }
  0x94   :  { %3317 = vmatpush3.bf16.msra.mxu1 %v3316_v46  ;;  %v489_v46 = vld [vmem:[%s6283_s1 + $0xe50] sm:$0xff] }
  0x95   :  { %2941 = vmatpush1.bf16.msra.mxu0 %v2940_v26  ;;  %3319 = vmatprep.subr.bf16.mxu1 %v3318_v49  ;;  %v429_v26 = vld [vmem:[%s6283_s1 + $0xc70] sm:$0xff] }
  0x96   :  { %2943 = vmatprep.subr.bf16.mxu0 %v2942_v32  ;;  %v486_v32 = vld [vmem:[%s6283_s1 + $0xe38] sm:$0xff]  ;;  %v3332_v42 = vpack.c.bf16 %v432_v27, %v429_v26  ;;  %v289_v49 = vld [vmem:[%s6283_s1 + $0x810] sm:$0xff] }
  0x97   :  { %v3334_v40 = vpack.c.bf16 %v486_v32, %v483_v31  ;;  %v2968_v60 = vpack.c.bf16 %v292_v50, %v289_v49 }
  0x98   :  { %3321 = vmatpush3.bf16.msra.mxu1 %v3320_v1  ;;  %v495_v1 = vld [vmem:[%s6283_s1 + $0xe80] sm:$0xff] }
  0x99   :  { %2945 = vmatpush1.bf16.msra.mxu0 %v2944_v41  ;;  %3323 = vmatprep.subr.bf16.mxu1 %v3322_v61  ;;  %v435_v41 = vld [vmem:[%s6283_s1 + $0xca0] sm:$0xff] }
  0x9a   :  { %2947 = vmatprep.subr.bf16.mxu0 %v2946_v47  ;;  %v492_v47 = vld [vmem:[%s6283_s1 + $0xe68] sm:$0xff]  ;;  %v3336_v51 = vpack.c.bf16 %v438_v43, %v435_v41  ;;  %v295_v61 = vld [vmem:[%s6283_s1 + $0x840] sm:$0xff] }
  0x9b   :  { %1497 = vmatmul.mubr.f32.vlgmr.msra.gmra.mrb[8].mxu1 %v4498_v23  ;;  %v3338_v54 = vpack.c.bf16 %v492_v47, %v489_v46 }
  0x9c   :  { %3325 = vmatpush3.bf16.msra.mxu1 %v3324_v8  ;;  %1566 = vmatprep.mubr.f32.mxu1 %v4735_v30  ;;  %v501_v8 = vld [vmem:[%s6283_s1 + $0xeb0] sm:$0xff] }
  0x9d   :  { %2949 = vmatpush1.bf16.msra.mxu0 %v2948_v56  ;;  %3327 = vmatprep.subr.bf16.mxu1 %v3326_v11  ;;  %v441_v56 = vld [vmem:[%s6283_s1 + $0xcd0] sm:$0xff] }
  0x9e   :  { %2951 = vmatprep.subr.bf16.mxu0 %v2950_v59  ;;  %v498_v59 = vld [vmem:[%s6283_s1 + $0xe98] sm:$0xff]  ;;  %v3340_v0 = vpack.c.bf16 %v444_v57, %v441_v56 }
  0xa0   :  { %3329 = vmatpush3.bf16.msra.mxu1 %v3328_v21 }
  0xa1   :  { %2953 = vmatpush1.bf16.msra.mxu0 %v2952_v5  ;;  %3331 = vmatprep.subr.bf16.mxu1 %v3330_v25  ;;  %v3342_v5 = vpack.c.bf16 %v498_v59, %v495_v1 }
  0xa2   :  { %2955 = vmatprep.subr.bf16.mxu0 %v2954_v9  ;;  %v504_v9 = vld [vmem:[%s6283_s1 + $0xec8] sm:$0xff] }
  0xa4   :  { %3333 = vmatpush3.bf16.msra.mxu1 %v3332_v42 }
  0xa5   :  { %2957 = vmatpush1.bf16.msra.mxu0 %v2956_v18  ;;  %3335 = vmatprep.subr.bf16.mxu1 %v3334_v40 }
  0xa6   :  { %2959 = vmatprep.subr.bf16.mxu0 %v2958_v22 }
  0xa8   :  { %3337 = vmatpush3.bf16.msra.mxu1 %v3336_v51 }
  0xa9   :  { %2961 = vmatpush1.bf16.msra.mxu0 %v2960_v33  ;;  %3339 = vmatprep.subr.bf16.mxu1 %v3338_v54 }
  0xaa   :  { %2963 = vmatprep.subr.bf16.mxu0 %v2962_v36 }
  0xad   :  { %2965 = vmatpush1.bf16.msra.mxu0 %v2964_v48 }
  0xae   :  { %2967 = vmatprep.subr.bf16.mxu0 %v2966_v52 }
  0xaf   :  { %12 = vsyncpa [#allocation3], 0  ;;  %v2972_v10 = vpack.c.bf16 %v298_v62, %v295_v61  ;;  %v301_v11 = vld [vmem:[%s6283_s1 + $0x870] sm:$0xff]  ;;  %v304_v12 = vld [vmem:[%s6283_s1 + $0x888] sm:$0xff]  ;;  %3341 = vmatpush3.bf16.msra.mxu1 %v3340_v0  ;;  %v3344_v14 = vpack.c.bf16 %v450_v37, %v447_v6  ;;  %v2974_v15 = vpack.c.bf16 %v305_v3, %v302_v63  ;;  %v3346_v17 = vpack.c.bf16 %v504_v9, %v501_v8  ;;  %s3665_s19 = smov [#allocation2]  }
  0xb0   :  { %v308_v16 = vld [vmem:[%s6283_s1 + $0x8a8] sm:$0xff]  ;;  %3343 = vmatprep.subr.bf16.mxu1 %v3342_v5  ;;  %v453_v18 = vld [vmem:[%s6283_s1 + $0xd30] sm:$0xff]  ;;  %v311_v20 = vld [vmem:[%s6283_s1 + $0x8c0] sm:$0xff]  ;;  %v2976_v24 = vpack.c.bf16 %v304_v12, %v301_v11  ;;  %v686_v39 = vcombine.high %v4679_v55, %v4679_v55  ;;  %vm3664_vm1 = vmmov 0   ;;  %s2369_s20 = sshll.u32 %s3665_s19, 4  ;;  %s2370_s20 = int_to_ptr.vmem [resolvable:$true] %s2369_s20 }
  0xb1   :  { %2969 = vmatpush1.bf16.msra.mxu0 %v2968_v60  ;;  %v456_v19 = vld [vmem:[%s6283_s1 + $0xd48] sm:$0xff]  ;;  %v507_v21 = vld [vmem:[%s6283_s1 + $0xee0] sm:$0xff]  ;;  %v510_v22 = vld [vmem:[%s6283_s1 + $0xef8] sm:$0xff]  ;;  %v2978_v29 = vpack.c.bf16 %v311_v20, %v308_v16  ;;  %s3637_s21 = scalar_lea.vmem %s2370_s20, 32  ;;  %p3642_p1 = scmp.lt.s32.totalorder %s2370_s20, %s2370_s20 }
  0xb2   :  { %2971 = vmatprep.subr.bf16.mxu0 %v2970_v2  ;;  %v307_v25 = vld [vmem:[%s6283_s1 + $0x8a0] sm:$0xff]  ;;  %v310_v26 = vld [vmem:[%s6283_s1 + $0x8b8] sm:$0xff]  ;;  %v3348_v27 = vpack.c.bf16 %v456_v19, %v453_v18  ;;  %v3350_v32 = vpack.c.bf16 %v510_v22, %v507_v21  ;;  %v317_v35 = vld [vmem:[%s6283_s1 + $0x8f0] sm:$0xff]  ;;  %v4910_v53 = vrot.slane %v686_v39, %v3887_v28  ;;  %p3638_p0 = scmp.ne.s32.totalorder %s2370_s20, %s3637_s21  ;;  %p3643_p2 = scmp.lt.s32.totalorder %s3637_s21, %s3637_s21 }
  0xb3   :  { %3345 = vmatpush3.bf16.msra.mxu1 %v3344_v14  ;;  %v314_v31 = vld [vmem:[%s6283_s1 + $0x8d8] sm:$0xff]  ;;  %v459_v33 = vld [vmem:[%s6283_s1 + $0xd60] sm:$0xff]  ;;  %v561_v42 = vld [vmem:[%s6283_s1 + $0x1090] sm:$0xff]  ;;  %v2980_v40 = vpack.c.bf16 %v310_v26, %v307_v25 }
  0xb4   :  { %3347 = vmatprep.subr.bf16.mxu1 %v3346_v17  ;;  %v462_v34 = vld [vmem:[%s6283_s1 + $0xd78] sm:$0xff]  ;;  %v564_v36 = vld [vmem:[%s6283_s1 + $0x10a8] sm:$0xff]  ;;  %v313_v41 = vld [vmem:[%s6283_s1 + $0x8d0] sm:$0xff]  ;;  %v2982_v46 = vpack.c.bf16 %v317_v35, %v314_v31  ;;  %v4938_v2 = vcombine.high %v4910_v53, %v4910_v53  ;;  %p3644_p3 = por %p3643_p2, %p3642_p1 }
  0xb5   :  { %2973 = vmatpush1.bf16.msra.mxu0 %v2972_v10  ;;  %v316_v43 = vld [vmem:[%s6283_s1 + $0x8e8] sm:$0xff]  ;;  %v3352_v45 = vpack.c.bf16 %v462_v34, %v459_v33  ;;  %v3354_v55 = vpack.c.bf16 %v564_v36, %v561_v42  ;;  %v513_v48 = vld [vmem:[%s6283_s1 + $0xf10] sm:$0xff]  ;;  %v323_v50 = vld [vmem:[%s6283_s1 + $0x920] sm:$0xff] }
  0xb6   :  { %2975 = vmatprep.subr.bf16.mxu0 %v2974_v15  ;;  %v320_v47 = vld [vmem:[%s6283_s1 + $0x908] sm:$0xff]  ;;  %v567_v51 = vld [vmem:[%s6283_s1 + $0x10c0] sm:$0xff]  ;;  %v570_v52 = vld [vmem:[%s6283_s1 + $0x10d8] sm:$0xff]  ;;  %v2984_v54 = vpack.c.bf16 %v316_v43, %v313_v41  ;;  %p3645_p4 = pnand %p3644_p3, %p3638_p0 }
  0xb7   :  { %3349 = vmatpush3.bf16.msra.mxu1 %v3348_v27  ;;  %v516_v49 = vld [vmem:[%s6283_s1 + $0xf28] sm:$0xff]  ;;  %v319_v56 = vld [vmem:[%s6283_s1 + $0x900] sm:$0xff]  ;;  %v322_v57 = vld [vmem:[%s6283_s1 + $0x918] sm:$0xff]  ;;  %v2986_v1 = vpack.c.bf16 %v323_v50, %v320_v47  ;;  %v3358_v28 = vpack.c.bf16 %v570_v52, %v567_v51 }
  0xb8   :  { %3351 = vmatprep.subr.bf16.mxu1 %v3350_v32  ;;  %v3356_v58 = vpack.c.bf16 %v516_v49, %v513_v48  ;;  %v326_v59 = vld [vmem:[%s6283_s1 + $0x938] sm:$0xff]  ;;  %v519_v60 = vld [vmem:[%s6283_s1 + $0xf40] sm:$0xff]  ;;  %v329_v62 = vld [vmem:[%s6283_s1 + $0x950] sm:$0xff]  ;;  %v2988_v3 = vpack.c.bf16 %v322_v57, %v319_v56 }
  0xb9   :  { %2977 = vmatpush1.bf16.msra.mxu0 %v2976_v24  ;;  %v522_v61 = vld [vmem:[%s6283_s1 + $0xf58] sm:$0xff]  ;;  %v573_v63 = vld [vmem:[%s6283_s1 + $0x10f0] sm:$0xff]  ;;  %v576_v0 = vld [vmem:[%s6283_s1 + $0x1108] sm:$0xff]  ;;  %v2990_v8 = vpack.c.bf16 %v329_v62, %v326_v59 }
  0xba   :  { %2979 = vmatprep.subr.bf16.mxu0 %v2978_v29  ;;  %v325_v5 = vld [vmem:[%s6283_s1 + $0x930] sm:$0xff]  ;;  %v328_v6 = vld [vmem:[%s6283_s1 + $0x948] sm:$0xff]  ;;  %v3360_v37 = vpack.c.bf16 %v522_v61, %v519_v60  ;;  %v3362_v10 = vpack.c.bf16 %v576_v0, %v573_v63  ;;  %v335_v14 = vld [vmem:[%s6283_s1 + $0x980] sm:$0xff] }
  0xbb   :  { %3353 = vmatpush3.bf16.msra.mxu1 %v3352_v45  ;;  %v332_v9 = vld [vmem:[%s6283_s1 + $0x968] sm:$0xff]  ;;  %v525_v11 = vld [vmem:[%s6283_s1 + $0xf70] sm:$0xff]  ;;  %v579_v15 = vld [vmem:[%s6283_s1 + $0x1120] sm:$0xff]  ;;  %v2992_v17 = vpack.c.bf16 %v328_v6, %v325_v5 }
  0xbc   :  { %3355 = vmatprep.subr.bf16.mxu1 %v3354_v55  ;;  %v528_v12 = vld [vmem:[%s6283_s1 + $0xf88] sm:$0xff]  ;;  %v582_v16 = vld [vmem:[%s6283_s1 + $0x1138] sm:$0xff]  ;;  %v331_v18 = vld [vmem:[%s6283_s1 + $0x960] sm:$0xff]  ;;  %v2994_v21 = vpack.c.bf16 %v335_v14, %v332_v9 }
  0xbd   :  { %2981 = vmatpush1.bf16.msra.mxu0 %v2980_v40  ;;  %v334_v19 = vld [vmem:[%s6283_s1 + $0x978] sm:$0xff]  ;;  %v3364_v20 = vpack.c.bf16 %v528_v12, %v525_v11  ;;  %v531_v24 = vld [vmem:[%s6283_s1 + $0xfa0] sm:$0xff]  ;;  %v341_v26 = vld [vmem:[%s6283_s1 + $0x9b0] sm:$0xff] }
  0xbe   :  { %2983 = vmatprep.subr.bf16.mxu0 %v2982_v46  ;;  %1567 = vmatmul.mubr.f32.vlgmr.msra.gmra.mrb[10].mxu1 %v4707_v4  ;;  %v338_v22 = vld [vmem:[%s6283_s1 + $0x998] sm:$0xff]  ;;  %v585_v27 = vld [vmem:[%s6283_s1 + $0x1150] sm:$0xff]  ;;  %v588_v29 = vld [vmem:[%s6283_s1 + $0x1168] sm:$0xff]  ;;  %v2996_v31 = vpack.c.bf16 %v334_v19, %v331_v18 }
  0xbf   :  { %3357 = vmatpush3.bf16.msra.mxu1 %v3356_v58  ;;  %1636 = vmatprep.mubr.f32.mxu1 %v4938_v2  ;;  %v534_v25 = vld [vmem:[%s6283_s1 + $0xfb8] sm:$0xff]  ;;  %v337_v32 = vld [vmem:[%s6283_s1 + $0x990] sm:$0xff]  ;;  %v340_v33 = vld [vmem:[%s6283_s1 + $0x9a8] sm:$0xff]  ;;  %v2998_v35 = vpack.c.bf16 %v341_v26, %v338_v22 }
  0xc0   :  { %3359 = vmatprep.subr.bf16.mxu1 %v3358_v28  ;;  %v3368_v34 = vpack.c.bf16 %v534_v25, %v531_v24  ;;  %v344_v42 = vld [vmem:[%s6283_s1 + $0x9c8] sm:$0xff]  ;;  %v537_v36 = vld [vmem:[%s6283_s1 + $0xfd0] sm:$0xff]  ;;  %v347_v40 = vld [vmem:[%s6283_s1 + $0x9e0] sm:$0xff]  ;;  %v3000_v45 = vpack.c.bf16 %v340_v33, %v337_v32 }
  0xc1   :  { %2985 = vmatpush1.bf16.msra.mxu0 %v2984_v54  ;;  %v540_v39 = vld [vmem:[%s6283_s1 + $0xfe8] sm:$0xff]  ;;  %v591_v41 = vld [vmem:[%s6283_s1 + $0x1180] sm:$0xff]  ;;  %v594_v43 = vld [vmem:[%s6283_s1 + $0x1198] sm:$0xff]  ;;  %v3002_v48 = vpack.c.bf16 %v347_v40, %v344_v42 }
  0xc2   :  { %2987 = vmatprep.subr.bf16.mxu0 %v2986_v1  ;;  %v343_v46 = vld [vmem:[%s6283_s1 + $0x9c0] sm:$0xff]  ;;  %v346_v47 = vld [vmem:[%s6283_s1 + $0x9d8] sm:$0xff]  ;;  %v3372_v55 = vpack.c.bf16 %v540_v39, %v537_v36  ;;  %v3374_v50 = vpack.c.bf16 %v594_v43, %v591_v41  ;;  %v353_v54 = vld [vmem:[%s6283_s1 + $0xa10] sm:$0xff] }
  0xc3   :  { %3361 = vmatpush3.bf16.msra.mxu1 %v3360_v37  ;;  %v350_v49 = vld [vmem:[%s6283_s1 + $0x9f8] sm:$0xff]  ;;  %v543_v51 = vld [vmem:[%s6283_s1 + $0x1000] sm:$0xff]  ;;  %v597_v56 = vld [vmem:[%s6283_s1 + $0x11b0] sm:$0xff]  ;;  %v3004_v58 = vpack.c.bf16 %v346_v47, %v343_v46 }
  0xc4   :  { %932 = vmatmul.mubr.f32.vlgmr.msra.gmra.mrb[0].mxu0 %v4295_v44  ;;  %3363 = vmatprep.subr.bf16.mxu1 %v3362_v10  ;;  %v3366_v44 = vpack.c.bf16 %v582_v16, %v579_v15  ;;  %v546_v52 = vld [vmem:[%s6283_s1 + $0x1018] sm:$0xff]  ;;  %v600_v57 = vld [vmem:[%s6283_s1 + $0x11c8] sm:$0xff]  ;;  %v349_v1 = vld [vmem:[%s6283_s1 + $0x9f0] sm:$0xff]  ;;  %v3006_v60 = vpack.c.bf16 %v353_v54, %v350_v49 }
  0xc5   :  { %2989 = vmatpush1.bf16.msra.mxu0 %v2988_v3  ;;  %1002 = vmatprep.mubr.f32.mxu0 %v4526_v38  ;;  %v3370_v38 = vpack.c.bf16 %v588_v29, %v585_v27  ;;  %v352_v59 = vld [vmem:[%s6283_s1 + $0xa08] sm:$0xff]  ;;  %v3376_v28 = vpack.c.bf16 %v546_v52, %v543_v51  ;;  %v3378_v62 = vpack.c.bf16 %v600_v57, %v597_v56  ;;  %v549_v63 = vld [vmem:[%s6283_s1 + $0x1030] sm:$0xff]  ;;  %v359_v3 = vld [vmem:[%s6283_s1 + $0xa40] sm:$0xff] }
  0xc6   :  { %2991 = vmatprep.subr.bf16.mxu0 %v2990_v8  ;;  %v356_v61 = vld [vmem:[%s6283_s1 + $0xa28] sm:$0xff]  ;;  %v603_v5 = vld [vmem:[%s6283_s1 + $0x11e0] sm:$0xff]  ;;  %v606_v6 = vld [vmem:[%s6283_s1 + $0x11f8] sm:$0xff]  ;;  %v3008_v37 = vpack.c.bf16 %v352_v59, %v349_v1 }
  0xc7   :  { %3365 = vmatpush3.bf16.msra.mxu1 %v3364_v20  ;;  %v552_v0 = vld [vmem:[%s6283_s1 + $0x1048] sm:$0xff]  ;;  %v355_v8 = vld [vmem:[%s6283_s1 + $0xa20] sm:$0xff]  ;;  %v3010_v10 = vpack.c.bf16 %v359_v3, %v356_v61  ;;  %v358_v11 = vld [vmem:[%s6283_s1 + $0xa38] sm:$0xff]  ;;  %v3382_v12 = vpack.c.bf16 %v606_v6, %v603_v5 }
  0xc8   :  { %3367 = vmatprep.subr.bf16.mxu1 %v3366_v44  ;;  %v3380_v9 = vpack.c.bf16 %v552_v0, %v549_v63  ;;  %v555_v14 = vld [vmem:[%s6283_s1 + $0x1060] sm:$0xff]  ;;  %v558_v15 = vld [vmem:[%s6283_s1 + $0x1078] sm:$0xff]  ;;  %v3012_v18 = vpack.c.bf16 %v358_v11, %v355_v8  ;;  %v361_v19 = vld [vmem:[%s6283_s1 + $0xa50] sm:$0xff] }
  0xc9   :  { %2993 = vmatpush1.bf16.msra.mxu0 %v2992_v17  ;;  %v362_v16 = vld [vmem:[%s6283_s1 + $0xa58] sm:$0xff]  ;;  %v365_v17 = vld [vmem:[%s6283_s1 + $0xa70] sm:$0xff]  ;;  %v3384_v20 = vpack.c.bf16 %v558_v15, %v555_v14  ;;  %v364_v22 = vld [vmem:[%s6283_s1 + $0xa68] sm:$0xff] }
  0xca   :  { %2995 = vmatprep.subr.bf16.mxu0 %v2994_v21  ;;  %v3014_v21 = vpack.c.bf16 %v365_v17, %v362_v16  ;;  %v609_v44 = vld [vmem:[%s6283_s1 + $0x1210] sm:$0xff]  ;;  %v612_v24 = vld [vmem:[%s6283_s1 + $0x1228] sm:$0xff]  ;;  %v371_v26 = vld [vmem:[%s6283_s1 + $0xaa0] sm:$0xff]  ;;  %v3016_v27 = vpack.c.bf16 %v364_v22, %v361_v19 }
  0xcb   :  { %3369 = vmatpush3.bf16.msra.mxu1 %v3368_v34  ;;  %v368_v25 = vld [vmem:[%s6283_s1 + $0xa88] sm:$0xff]  ;;  %v367_v29 = vld [vmem:[%s6283_s1 + $0xa80] sm:$0xff]  ;;  %v370_v33 = vld [vmem:[%s6283_s1 + $0xa98] sm:$0xff]  ;;  %v3663_v34 = vmov 0.0|0.0  }
  0xcc   :  { %3371 = vmatprep.subr.bf16.mxu1 %v3370_v38  ;;  %v3018_v32 = vpack.c.bf16 %v371_v26, %v368_v25  ;;  %v618_v42 = vld [vmem:[%s6283_s1 + $0x1258] sm:$0xff]  ;;  %v377_v36 = vld [vmem:[%s6283_s1 + $0xad0] sm:$0xff]  ;;  %v3020_v39 = vpack.c.bf16 %v370_v33, %v367_v29  ;;  %v624_v47 = vld [vmem:[%s6283_s1 + $0x1288] sm:$0xff] }
  0xcd   :  { %2997 = vmatpush1.bf16.msra.mxu0 %v2996_v31  ;;  %v3387_v31 = vpack.c.bf16 %v612_v24, %v609_v44  ;;  %v374_v38 = vld [vmem:[%s6283_s1 + $0xab8] sm:$0xff]  ;;  %v373_v40 = vld [vmem:[%s6283_s1 + $0xab0] sm:$0xff]  ;;  %v627_v56 = vld [vmem:[%s6283_s1 + $0x12a0] sm:$0xff] }
  0xce   :  { %2999 = vmatprep.subr.bf16.mxu0 %v2998_v35  ;;  %v615_v35 = vld [vmem:[%s6283_s1 + $0x1240] sm:$0xff]  ;;  %v3022_v43 = vpack.c.bf16 %v377_v36, %v374_v38  ;;  %v621_v46 = vld [vmem:[%s6283_s1 + $0x1270] sm:$0xff]  ;;  %v382_v54 = vld [vmem:[%s6283_s1 + $0xaf8] sm:$0xff] }
  0xcf   :  { %3373 = vmatpush3.bf16.msra.mxu1 %v3372_v55  ;;  %v3390_v41 = vpack.c.bf16 %v618_v42, %v615_v35  ;;  %v380_v55 = vld [vmem:[%s6283_s1 + $0xae8] sm:$0xff]  ;;  %v3393_v51 = vpack.c.bf16 %v624_v47, %v621_v46  ;;  %v630_v57 = vld [vmem:[%s6283_s1 + $0x12b8] sm:$0xff]  ;;  %v389_v1 = vld [vmem:[%s6283_s1 + $0xb30] sm:$0xff] }
  0xd0   :  { %3375 = vmatprep.subr.bf16.mxu1 %v3374_v50  ;;  %v379_v50 = vld [vmem:[%s6283_s1 + $0xae0] sm:$0xff]  ;;  %v385_v61 = vld [vmem:[%s6283_s1 + $0xb10] sm:$0xff]  ;;  %v392_v63 = vld [vmem:[%s6283_s1 + $0xb48] sm:$0xff] }
  0xd1   :  { %3001 = vmatpush1.bf16.msra.mxu0 %v3000_v45  ;;  %v376_v45 = vld [vmem:[%s6283_s1 + $0xac8] sm:$0xff]  ;;  %v3028_v59 = vpack.c.bf16 %v382_v54, %v379_v50  ;;  %v395_v0 = vld [vmem:[%s6283_s1 + $0xb60] sm:$0xff]  ;;  %v398_v8 = vld [vmem:[%s6283_s1 + $0xb78] sm:$0xff] }
  0xd2   :  { %3003 = vmatprep.subr.bf16.mxu0 %v3002_v48  ;;  %v383_v48 = vld [vmem:[%s6283_s1 + $0xb00] sm:$0xff]  ;;  %v3024_v49 = vpack.c.bf16 %v376_v45, %v373_v40  ;;  %v3034_v5 = vpack.c.bf16 %v395_v0, %v392_v63  ;;  %v397_v14 = vld [vmem:[%s6283_s1 + $0xb70] sm:$0xff]  ;;  %v400_v15 = vld [vmem:[%s6283_s1 + $0xb88] sm:$0xff] }
  0xd3   :  { %3377 = vmatpush3.bf16.msra.mxu1 %v3376_v28  ;;  %v3026_v52 = vpack.c.bf16 %v383_v48, %v380_v55  ;;  %v3396_v28 = vpack.c.bf16 %v630_v57, %v627_v56  ;;  %v391_v6 = vld [vmem:[%s6283_s1 + $0xb40] sm:$0xff]  ;;  %v404_v16 = vld [vmem:[%s6283_s1 + $0xba8] sm:$0xff]  ;;  %v410_v22 = vld [vmem:[%s6283_s1 + $0xbd8] sm:$0xff] }
  0xd4   :  { %3379 = vmatprep.subr.bf16.mxu1 %v3378_v62  ;;  %v388_v62 = vld [vmem:[%s6283_s1 + $0xb28] sm:$0xff]  ;;  %v407_v17 = vld [vmem:[%s6283_s1 + $0xbc0] sm:$0xff]  ;;  %v413_v44 = vld [vmem:[%s6283_s1 + $0xbf0] sm:$0xff] }
  0xd5   :  { %3005 = vmatpush1.bf16.msra.mxu0 %v3004_v58  ;;  %v386_v58 = vld [vmem:[%s6283_s1 + $0xb18] sm:$0xff]  ;;  %v3032_v3 = vpack.c.bf16 %v388_v62, %v385_v61  ;;  %v3042_v19 = vpack.c.bf16 %v407_v17, %v404_v16  ;;  %v3046_v25 = vpack.c.bf16 %v413_v44, %v410_v22  ;;  %v409_v26 = vld [vmem:[%s6283_s1 + $0xbd0] sm:$0xff]  ;;  %v416_v29 = vld [vmem:[%s6283_s1 + $0xc08] sm:$0xff] }
  0xd6   :  { %3007 = vmatprep.subr.bf16.mxu0 %v3006_v60  ;;  %v3030_v60 = vpack.c.bf16 %v389_v1, %v386_v58  ;;  %v415_v35 = vld [vmem:[%s6283_s1 + $0xc00] sm:$0xff]  ;;  %v418_v42 = vld [vmem:[%s6283_s1 + $0xc18] sm:$0xff]  ;;  %v425_v36 = vld [vmem:[%s6283_s1 + $0xc50] sm:$0xff] }
  0xd7   :  { %3381 = vmatpush3.bf16.msra.mxu1 %v3380_v9  ;;  %v401_v9 = vld [vmem:[%s6283_s1 + $0xb90] sm:$0xff]  ;;  %v422_v38 = vld [vmem:[%s6283_s1 + $0xc38] sm:$0xff]  ;;  %v428_v45 = vld [vmem:[%s6283_s1 + $0xc68] sm:$0xff] }
  0xd8   :  { %3383 = vmatprep.subr.bf16.mxu1 %v3382_v12  ;;  %v3038_v12 = vpack.c.bf16 %v401_v9, %v398_v8  ;;  %v3054_v40 = vpack.c.bf16 %v425_v36, %v422_v38  ;;  %v431_v46 = vld [vmem:[%s6283_s1 + $0xc80] sm:$0xff]  ;;  %v433_v56 = vld [vmem:[%s6283_s1 + $0xc90] sm:$0xff]  ;;  %v436_v57 = vld [vmem:[%s6283_s1 + $0xca8] sm:$0xff] }
  0xd9   :  { %3009 = vmatpush1.bf16.msra.mxu0 %v3008_v37  ;;  %v394_v37 = vld [vmem:[%s6283_s1 + $0xb58] sm:$0xff]  ;;  %v427_v50 = vld [vmem:[%s6283_s1 + $0xc60] sm:$0xff]  ;;  %v440_v58 = vld [vmem:[%s6283_s1 + $0xcc8] sm:$0xff] }
  0xda   :  { %3011 = vmatprep.subr.bf16.mxu0 %v3010_v10  ;;  %v3636_v10 = vld.sshfl [vmem:[%s6282_s0 + $0x18] sm:$0x3 pattern:$0x76325410]  ;;  %v3036_v11 = vpack.c.bf16 %v394_v37, %v391_v6  ;;  %v443_v1 = vld [vmem:[%s6283_s1 + $0xce0] sm:$0xff]  ;;  %v449_v63 = vld [vmem:[%s6283_s1 + $0xd10] sm:$0xff] }
  0xdb   :  { %3385 = vmatpush3.bf16.msra.mxu1 %v3384_v20  ;;  %v403_v20 = vld [vmem:[%s6283_s1 + $0xba0] sm:$0xff]  ;;  %v442_v61 = vld [vmem:[%s6283_s1 + $0xcd8] sm:$0xff]  ;;  %v448_v6 = vld [vmem:[%s6283_s1 + $0xd08] sm:$0xff] }
  0xdc   :  { %3386 = vmatprep.subr.bf16.mxu1 %v3663_v34  ;;  %v446_v62 = vld [vmem:[%s6283_s1 + $0xcf8] sm:$0xff]  ;;  %v452_v37 = vld [vmem:[%s6283_s1 + $0xd28] sm:$0xff]  ;;  %v455_v8 = vld [vmem:[%s6283_s1 + $0xd40] sm:$0xff] }
  0xdd   :  { %3013 = vmatpush1.bf16.msra.mxu0 %v3012_v18  ;;  %v3040_v18 = vpack.c.bf16 %v400_v15, %v397_v14  ;;  %v3074_v14 = vpack.c.bf16 %v455_v8, %v452_v37  ;;  %v451_v15 = vld [vmem:[%s6283_s1 + $0xd20] sm:$0xff]  ;;  %v454_v16 = vld [vmem:[%s6283_s1 + $0xd38] sm:$0xff]  ;;  %v460_v22 = vld [vmem:[%s6283_s1 + $0xd68] sm:$0xff] }
  0xde   :  { %3015 = vmatprep.subr.bf16.mxu0 %v3014_v21  ;;  %1637 = vmatmul.mubr.f32.vlgmr.msra.gmra.mrb[12].mxu1 %v4910_v53  ;;  %v406_v21 = vld [vmem:[%s6283_s1 + $0xbb8] sm:$0xff]  ;;  %v464_v44 = vld [vmem:[%s6283_s1 + $0xd88] sm:$0xff] }
  0xdf   :  { %3388 = vmatpush3.bf16.msra.mxu1 %v3387_v31  ;;  %2721 = vmatprep.mubr.msk.f32.mxu1 %vm3664_vm1, %v3661_v7  ;;  %v3044_v24 = vpack.c.bf16 %v406_v21, %v403_v20  ;;  %v419_v31 = vld [vmem:[%s6283_s1 + $0xc20] sm:$0xff]  ;;  %v458_v17 = vld [vmem:[%s6283_s1 + $0xd58] sm:$0xff]  ;;  %v457_v21 = vld [vmem:[%s6283_s1 + $0xd50] sm:$0xff] }
  0xe0   :  { %3389 = vmatprep.subr.bf16.mxu1 %v3663_v34  ;;  %v3050_v33 = vpack.c.bf16 %v419_v31, %v416_v29  ;;  %v466_v29 = vld [vmem:[%s6283_s1 + $0xd98] sm:$0xff]  ;;  %v472_v38 = vld [vmem:[%s6283_s1 + $0xdc8] sm:$0xff] }
  0xe1   :  { %3017 = vmatpush1.bf16.msra.mxu0 %v3016_v27  ;;  %v412_v27 = vld [vmem:[%s6283_s1 + $0xbe8] sm:$0xff]  ;;  %v470_v31 = vld [vmem:[%s6283_s1 + $0xdb8] sm:$0xff] }
  0xe2   :  { %3019 = vmatprep.subr.bf16.mxu0 %v3018_v32  ;;  %v3048_v32 = vpack.c.bf16 %v412_v27, %v409_v26  ;;  %v463_v27 = vld [vmem:[%s6283_s1 + $0xd80] sm:$0xff]  ;;  %v476_v36 = vld [vmem:[%s6283_s1 + $0xde8] sm:$0xff] }
  0xe3   :  { %3391 = vmatpush3.bf16.msra.mxu1 %v3390_v41  ;;  %v421_v41 = vld [vmem:[%s6283_s1 + $0xc30] sm:$0xff] }
  0xe4   :  { %3392 = vmatprep.subr.bf16.mxu1 %v3663_v34 }
  0xe5   :  { %3021 = vmatpush1.bf16.msra.mxu0 %v3020_v39  ;;  %v3052_v39 = vpack.c.bf16 %v418_v42, %v415_v35  ;;  %v469_v42 = vld [vmem:[%s6283_s1 + $0xdb0] sm:$0xff] }
  0xe6   :  { %3023 = vmatprep.subr.bf16.mxu0 %v3022_v43  ;;  %v424_v43 = vld [vmem:[%s6283_s1 + $0xc48] sm:$0xff] }
  0xe7   :  { %3394 = vmatpush3.bf16.msra.mxu1 %v3393_v51  ;;  %v3056_v55 = vpack.c.bf16 %v424_v43, %v421_v41  ;;  %v430_v51 = vld [vmem:[%s6283_s1 + $0xc78] sm:$0xff]  ;;  %v475_v43 = vld [vmem:[%s6283_s1 + $0xde0] sm:$0xff] }
  0xe8   :  { %3395 = vmatprep.subr.bf16.mxu1 %v3663_v34 }
  0xe9   :  { %3025 = vmatpush1.bf16.msra.mxu0 %v3024_v49  ;;  %v3058_v49 = vpack.c.bf16 %v431_v46, %v428_v45  ;;  %v478_v45 = vld [vmem:[%s6283_s1 + $0xdf8] sm:$0xff] }
  0xea   :  { %3027 = vmatprep.subr.bf16.mxu0 %v3026_v52  ;;  %v3060_v52 = vpack.c.bf16 %v430_v51, %v427_v50  ;;  %v482_v46 = vld [vmem:[%s6283_s1 + $0xe18] sm:$0xff]  ;;  %v481_v51 = vld [vmem:[%s6283_s1 + $0xe10] sm:$0xff] }
  0xeb   :  { %3397 = vmatpush3.bf16.msra.mxu1 %v3396_v28  ;;  %v3066_v28 = vpack.c.bf16 %v443_v1, %v440_v58  ;;  %v487_v1 = vld [vmem:[%s6283_s1 + $0xe40] sm:$0xff] }
  0xed   :  { %3029 = vmatpush1.bf16.msra.mxu0 %v3028_v59  ;;  %v3064_v59 = vpack.c.bf16 %v436_v57, %v433_v56  ;;  %v5381_v56 = vld [vmem:[%s6284_s2] sm:$0x7] }
  0xee   :  { %3031 = vmatprep.subr.bf16.mxu0 %v3030_v60  ;;  %2722 = vmatmul.mubr.msk.f32.vlgmr.msra.gmra.mrb[14].mxu1 %vm722_vm0, %v3636_v10  ;;  %v5250_v47 = vpop.f32.mrb[0].mxu1  ;;  %v439_v60 = vld [vmem:[%s6283_s1 + $0xcc0] sm:$0xff] }
  0xef   :  { %v5253_v48 = vpop.f32.mrb[1].mxu1  ;;  %v3068_v0 = vpack.c.bf16 %v442_v61, %v439_v60  ;;  %v497_v60 = vld [vmem:[%s6283_s1 + $0xe90] sm:$0xff] }
  0xf1   :  { %3033 = vmatpush1.bf16.msra.mxu0 %v3032_v3  ;;  %v3070_v3 = vpack.c.bf16 %v449_v63, %v446_v62 }
  0xf2   :  { %3035 = vmatprep.subr.bf16.mxu0 %v3034_v5  ;;  %v445_v5 = vld [vmem:[%s6283_s1 + $0xcf0] sm:$0xff] }
  0xf5   :  { %3037 = vmatpush1.bf16.msra.mxu0 %v3036_v11  ;;  %v3072_v11 = vpack.c.bf16 %v448_v6, %v445_v5  ;;  %v500_v5 = vld [vmem:[%s6283_s1 + $0xea8] sm:$0xff]  ;;  %v503_v6 = vld [vmem:[%s6283_s1 + $0xec0] sm:$0xff] }
  0xf6   :  { %3039 = vmatprep.subr.bf16.mxu0 %v3038_v12 }
  0xf9   :  { %3041 = vmatpush1.bf16.msra.mxu0 %v3040_v18  ;;  %v461_v18 = vld [vmem:[%s6283_s1 + $0xd70] sm:$0xff] }
  0xfa   :  { %3043 = vmatprep.subr.bf16.mxu0 %v3042_v19  ;;  %v3076_v19 = vpack.c.bf16 %v454_v16, %v451_v15  ;;  %v3078_v20 = vpack.c.bf16 %v461_v18, %v458_v17  ;;  %v499_v15 = vld [vmem:[%s6283_s1 + $0xea0] sm:$0xff]  ;;  %v502_v16 = vld [vmem:[%s6283_s1 + $0xeb8] sm:$0xff] }
  0xfb   :  { %v506_v17 = vld [vmem:[%s6283_s1 + $0xed8] sm:$0xff] }
  0xfd   :  { %3045 = vmatpush1.bf16.msra.mxu0 %v3044_v24  ;;  %v467_v24 = vld [vmem:[%s6283_s1 + $0xda0] sm:$0xff] }
  0xfe   :  { %3047 = vmatprep.subr.bf16.mxu0 %v3046_v25  ;;  %v3080_v25 = vpack.c.bf16 %v460_v22, %v457_v21  ;;  %v3082_v26 = vpack.c.bf16 %v467_v24, %v464_v44  ;;  %v505_v21 = vld [vmem:[%s6283_s1 + $0xed0] sm:$0xff]  ;;  %v508_v22 = vld [vmem:[%s6283_s1 + $0xee8] sm:$0xff]  ;;  %v515_v24 = vld [vmem:[%s6283_s1 + $0xf20] sm:$0xff] }
  0xff   :  { %v512_v44 = vld [vmem:[%s6283_s1 + $0xf08] sm:$0xff] }
 0x101   :  { %3049 = vmatpush1.bf16.msra.mxu0 %v3048_v32  ;;  %v473_v32 = vld [vmem:[%s6283_s1 + $0xdd0] sm:$0xff] }
 0x102   :  { %3051 = vmatprep.subr.bf16.mxu0 %v3050_v33  ;;  %v3084_v33 = vpack.c.bf16 %v466_v29, %v463_v27  ;;  %v3086_v35 = vpack.c.bf16 %v473_v32, %v470_v31  ;;  %v511_v27 = vld [vmem:[%s6283_s1 + $0xf00] sm:$0xff]  ;;  %v514_v29 = vld [vmem:[%s6283_s1 + $0xf18] sm:$0xff]  ;;  %v521_v32 = vld [vmem:[%s6283_s1 + $0xf50] sm:$0xff] }
 0x103   :  { %v518_v31 = vld [vmem:[%s6283_s1 + $0xf38] sm:$0xff] }
 0x104   :  { %1003 = vmatmul.mubr.f32.vlgmr.msra.gmra.mrb[0].mxu0 %v4498_v23  ;;  %v434_v23 = vld [vmem:[%s6283_s1 + $0xc98] sm:$0xff] }
 0x105   :  { %3053 = vmatpush1.bf16.msra.mxu0 %v3052_v39  ;;  %1073 = vmatprep.mubr.f32.mxu0 %v4735_v30  ;;  %v437_v30 = vld [vmem:[%s6283_s1 + $0xcb0] sm:$0xff]  ;;  %v479_v39 = vld [vmem:[%s6283_s1 + $0xe00] sm:$0xff] }
 0x106   :  { %3055 = vmatprep.subr.bf16.mxu0 %v3054_v40  ;;  %v3062_v54 = vpack.c.bf16 %v437_v30, %v434_v23  ;;  %v3088_v40 = vpack.c.bf16 %v472_v38, %v469_v42  ;;  %v3090_v41 = vpack.c.bf16 %v479_v39, %v476_v36  ;;  %v484_v23 = vld [vmem:[%s6283_s1 + $0xe28] sm:$0xff]  ;;  %v517_v42 = vld [vmem:[%s6283_s1 + $0xf30] sm:$0xff]  ;;  %v527_v39 = vld [vmem:[%s6283_s1 + $0xf80] sm:$0xff] }
 0x107   :  { %v488_v30 = vld [vmem:[%s6283_s1 + $0xe48] sm:$0xff]  ;;  %v3096_v57 = vpack.c.bf16 %v484_v23, %v481_v51  ;;  %v1718_v23 = vld [vmem:[%s6285_s3 + $0x18] sm:$0xff] }
 0x108   :  { %v520_v38 = vld [vmem:[%s6283_s1 + $0xf48] sm:$0xff] }
 0x109   :  { %3057 = vmatpush1.bf16.msra.mxu0 %v3056_v55  ;;  %v485_v55 = vld [vmem:[%s6283_s1 + $0xe30] sm:$0xff]  ;;  %v524_v36 = vld [vmem:[%s6283_s1 + $0xf68] sm:$0xff] }
 0x10a   :  { %3059 = vmatprep.subr.bf16.mxu0 %v3058_v49  ;;  %v3092_v49 = vpack.c.bf16 %v478_v45, %v475_v43  ;;  %v3094_v50 = vpack.c.bf16 %v485_v55, %v482_v46  ;;  %v526_v43 = vld [vmem:[%s6283_s1 + $0xf78] sm:$0xff]  ;;  %v533_v46 = vld [vmem:[%s6283_s1 + $0xfb0] sm:$0xff]  ;;  %v1716_v55 = vld [vmem:[%s6285_s3 + $0x8] sm:$0xff] }
 0x10b   :  { %v530_v45 = vld [vmem:[%s6283_s1 + $0xf98] sm:$0xff] }
 0x10d   :  { %3061 = vmatpush1.bf16.msra.mxu0 %v3060_v52  ;;  %v491_v52 = vld [vmem:[%s6283_s1 + $0xe60] sm:$0xff] }
 0x10e   :  { %3063 = vmatprep.subr.bf16.mxu0 %v3062_v54  ;;  %v2414_v9 = vpop.f32.mrb[2].mxu1  ;;  %v643_v54 = vsub.s32 2, %v3857_v13  ;;  %v3098_v58 = vpack.c.bf16 %v491_v52, %v488_v30  ;;  %v1725_v30 = vld [vmem:[%s6285_s3 + $0x50] sm:$0xff] }
 0x10f   :  { %v2415_v10 = vpop.f32.mrb[3].mxu1 }
 0x110   :  { %v5303_v12 = vadd.f32 %v2415_v10, %v2414_v9  ;;  %v644_v61 = vrot.slane %v5381_v56, %v643_v54 }
 0x111   :  { %3065 = vmatpush1.bf16.msra.mxu0 %v3064_v59  ;;  %v490_v59 = vld [vmem:[%s6283_s1 + $0xe58] sm:$0xff] }
 0x112   :  { %3067 = vmatprep.subr.bf16.mxu0 %v3066_v28  ;;  %v494_v28 = vld [vmem:[%s6283_s1 + $0xe78] sm:$0xff]  ;;  %v3100_v62 = vpack.c.bf16 %v490_v59, %v487_v1  ;;  %v1289_v37 = vadd.f32 %v5303_v12, %v644_v61  ;;  %v509_v12 = vld [vmem:[%s6283_s1 + $0xef0] sm:$0xff]  ;;  %v1724_v1 = vld [vmem:[%s6285_s3 + $0x48] sm:$0xff]  ;;  %v3126_v61 = vpack.c.bf16 %v533_v46, %v530_v45 }
 0x113   :  { %v3102_v63 = vpack.c.bf16 %v497_v60, %v494_v28  ;;  %v1728_v59 = vld [vmem:[%s6285_s3 + $0x68] sm:$0xff]  ;;  %v1731_v60 = vld [vmem:[%s6285_s3 + $0x80] sm:$0xff] }
 0x115   :  { %3069 = vmatpush1.bf16.msra.mxu0 %v3068_v0  ;;  %v493_v0 = vld [vmem:[%s6283_s1 + $0xe70] sm:$0xff] }
 0x116   :  { %3071 = vmatprep.subr.bf16.mxu0 %v3070_v3  ;;  %v496_v3 = vld [vmem:[%s6283_s1 + $0xe88] sm:$0xff] }
 0x117   :  { %v3104_v10 = vpack.c.bf16 %v496_v3, %v493_v0  ;;  %v536_v0 = vld [vmem:[%s6283_s1 + $0xfc8] sm:$0xff] }
 0x119   :  { %3073 = vmatpush1.bf16.msra.mxu0 %v3072_v11 }
 0x11a   :  { %3075 = vmatprep.subr.bf16.mxu0 %v3074_v14  ;;  %v3106_v14 = vpack.c.bf16 %v503_v6, %v500_v5  ;;  %v539_v5 = vld [vmem:[%s6283_s1 + $0xfe0] sm:$0xff]  ;;  %v3406_v6 = vpack.c.bf16 %v1731_v60, %v1728_v59  ;;  %v553_v59 = vld [vmem:[%s6283_s1 + $0x1050] sm:$0xff]  ;;  %v560_v60 = vld [vmem:[%s6283_s1 + $0x1088] sm:$0xff] }
 0x11d   :  { %3077 = vmatpush1.bf16.msra.mxu0 %v3076_v19  ;;  %v3108_v19 = vpack.c.bf16 %v502_v16, %v499_v15  ;;  %v535_v15 = vld [vmem:[%s6283_s1 + $0xfc0] sm:$0xff]  ;;  %v538_v16 = vld [vmem:[%s6283_s1 + $0xfd8] sm:$0xff] }
 0x11e   :  { %3079 = vmatprep.subr.bf16.mxu0 %v3078_v20  ;;  %v3110_v20 = vpack.c.bf16 %v509_v12, %v506_v17  ;;  %v542_v17 = vld [vmem:[%s6283_s1 + $0xff8] sm:$0xff] }
 0x121   :  { %3081 = vmatpush1.bf16.msra.mxu0 %v3080_v25  ;;  %v3112_v25 = vpack.c.bf16 %v508_v22, %v505_v21  ;;  %v1733_v21 = vld [vmem:[%s6285_s3 + $0x90] sm:$0xff]  ;;  %v1736_v22 = vld [vmem:[%s6285_s3 + $0xa8] sm:$0xff] }
 0x122   :  { %3083 = vmatprep.subr.bf16.mxu0 %v3082_v26  ;;  %v3114_v26 = vpack.c.bf16 %v515_v24, %v512_v44  ;;  %v1740_v44 = vld [vmem:[%s6285_s3 + $0xc8] sm:$0xff]  ;;  %v1743_v24 = vld [vmem:[%s6285_s3 + $0xe0] sm:$0xff] }
 0x125   :  { %3085 = vmatpush1.bf16.msra.mxu0 %v3084_v33  ;;  %v3116_v33 = vpack.c.bf16 %v514_v29, %v511_v27  ;;  %v541_v27 = vld [vmem:[%s6283_s1 + $0xff0] sm:$0xff]  ;;  %v544_v29 = vld [vmem:[%s6283_s1 + $0x1008] sm:$0xff] }
 0x126   :  { %3087 = vmatprep.subr.bf16.mxu0 %v3086_v35  ;;  %v3118_v35 = vpack.c.bf16 %v521_v32, %v518_v31  ;;  %v548_v31 = vld [vmem:[%s6283_s1 + $0x1028] sm:$0xff]  ;;  %v3412_v32 = vpack.c.bf16 %v1736_v22, %v1733_v21 }
 0x129   :  { %3089 = vmatpush1.bf16.msra.mxu0 %v3088_v40  ;;  %v523_v40 = vld [vmem:[%s6283_s1 + $0xf60] sm:$0xff] }
 0x12a   :  { %3091 = vmatprep.subr.bf16.mxu0 %v3090_v41  ;;  %v3120_v41 = vpack.c.bf16 %v520_v38, %v517_v42  ;;  %v3124_v28 = vpack.c.bf16 %v526_v43, %v523_v40  ;;  %v3414_v42 = vpack.c.bf16 %v1743_v24, %v1740_v44  ;;  %v1739_v38 = vld [vmem:[%s6285_s3 + $0xc0] sm:$0xff]  ;;  %v1746_v40 = vld [vmem:[%s6285_s3 + $0xf8] sm:$0xff]  ;;  %v3136_v43 = vpack.c.bf16 %v544_v29, %v541_v27  ;;  %v565_v44 = vld [vmem:[%s6283_s1 + $0x10b0] sm:$0xff] }
 0x12b   :  { %v568_v24 = vld [vmem:[%s6283_s1 + $0x10c8] sm:$0xff]  ;;  %v575_v27 = vld [vmem:[%s6283_s1 + $0x1100] sm:$0xff] }
 0x12d   :  { %3093 = vmatpush1.bf16.msra.mxu0 %v3092_v49  ;;  %v1719_v49 = vld [vmem:[%s6285_s3 + $0x20] sm:$0xff] }
 0x12e   :  { %3095 = vmatprep.subr.bf16.mxu0 %v3094_v50  ;;  %v2449_v8 = vpop.f32.mrb[4].mxu1  ;;  %v1715_v50 = vld [vmem:[%s6285_s3] sm:$0xff]  ;;  %v3398_v51 = vpack.c.bf16 %v1719_v49, %v1716_v55  ;;  %v550_v55 = vld [vmem:[%s6283_s1 + $0x1038] sm:$0xff] }
 0x12f   :  { %v2450_v9 = vpop.f32.mrb[5].mxu1  ;;  %v3400_v52 = vpack.c.bf16 %v1718_v23, %v1715_v50  ;;  %v554_v49 = vld [vmem:[%s6283_s1 + $0x1058] sm:$0xff] }
 0x130   :  { %v2451_v11 = vadd.f32 %v2450_v9, %v2449_v8  ;;  %3399 = vmatprep.subr.bf16.mxu1 %v3398_v51  ;;  %v1730_v8 = vld [vmem:[%s6285_s3 + $0x78] sm:$0xff]  ;;  %v557_v51 = vld [vmem:[%s6283_s1 + $0x1070] sm:$0xff] }
 0x131   :  { %3097 = vmatpush1.bf16.msra.mxu0 %v3096_v57  ;;  %3401 = vmatpush1.bf16.msra.mxu1 %v3400_v52  ;;  %v1734_v9 = vld [vmem:[%s6285_s3 + $0x98] sm:$0xff]  ;;  %v1748_v52 = vld [vmem:[%s6285_s3 + $0x108] sm:$0xff] }
 0x132   :  { %3099 = vmatprep.subr.bf16.mxu0 %v3098_v58  ;;  %v5423_v18 = vadd.f32 %v2451_v11, %v1289_v37  ;;  %v1721_v58 = vld [vmem:[%s6285_s3 + $0x30] sm:$0xff]  ;;  %v1727_v37 = vld [vmem:[%s6285_s3 + $0x60] sm:$0xff] }
 0x133   :  { %v3404_v3 = vpack.c.bf16 %v1724_v1, %v1721_v58  ;;  %v3408_v12 = vpack.c.bf16 %v1730_v8, %v1727_v37  ;;  %v1755_v58 = vld [vmem:[%s6285_s3 + $0x140] sm:$0xff]  ;;  %v3142_v1 = vpack.c.bf16 %v557_v51, %v554_v49 }
 0x134   :  { %v1779_v49 = vld [vmem:[%s6285_s3 + $0x200] sm:$0xff] }
 0x135   :  { %3101 = vmatpush1.bf16.msra.mxu0 %v3100_v62  ;;  %v529_v62 = vld [vmem:[%s6283_s1 + $0xf90] sm:$0xff] }
 0x136   :  { %3103 = vmatprep.subr.bf16.mxu0 %v3102_v63  ;;  %v532_v63 = vld [vmem:[%s6283_s1 + $0xfa8] sm:$0xff] }
 0x137   :  { %v3128_v11 = vpack.c.bf16 %v532_v63, %v529_v62  ;;  %v563_v62 = vld [vmem:[%s6283_s1 + $0x10a0] sm:$0xff] }
 0x138   :  { %v3146_v8 = vpack.c.bf16 %v563_v62, %v560_v60  ;;  %v1785_v60 = vld [vmem:[%s6285_s3 + $0x230] sm:$0xff] }
 0x139   :  { %3105 = vmatpush1.bf16.msra.mxu0 %v3104_v10  ;;  %v1737_v10 = vld [vmem:[%s6285_s3 + $0xb0] sm:$0xff] }
 0x13a   :  { %3107 = vmatprep.subr.bf16.mxu0 %v3106_v14  ;;  %v3130_v14 = vpack.c.bf16 %v539_v5, %v536_v0  ;;  %v1751_v0 = vld [vmem:[%s6285_s3 + $0x120] sm:$0xff]  ;;  %v1758_v5 = vld [vmem:[%s6285_s3 + $0x158] sm:$0xff] }
 0x13d   :  { %3109 = vmatpush1.bf16.msra.mxu0 %v3108_v19  ;;  %v545_v19 = vld [vmem:[%s6283_s1 + $0x1010] sm:$0xff] }
 0x13e   :  { %3111 = vmatprep.subr.bf16.mxu0 %v3110_v20  ;;  %v3410_v20 = vpack.c.bf16 %v1737_v10, %v1734_v9  ;;  %v559_v9 = vld [vmem:[%s6283_s1 + $0x1080] sm:$0xff]  ;;  %v562_v10 = vld [vmem:[%s6283_s1 + $0x1098] sm:$0xff] }
 0x13f   :  { %v3148_v21 = vpack.c.bf16 %v562_v10, %v559_v9  ;;  %v1784_v9 = vld [vmem:[%s6285_s3 + $0x228] sm:$0xff] }
 0x140   :  { %v1788_v10 = vld [vmem:[%s6285_s3 + $0x248] sm:$0xff] }
 0x141   :  { %3113 = vmatpush1.bf16.msra.mxu0 %v3112_v25  ;;  %v3132_v25 = vpack.c.bf16 %v538_v16, %v535_v15  ;;  %v569_v15 = vld [vmem:[%s6283_s1 + $0x10d0] sm:$0xff] }
 0x142   :  { %3115 = vmatprep.subr.bf16.mxu0 %v3114_v26  ;;  %v3134_v26 = vpack.c.bf16 %v545_v19, %v542_v17  ;;  %v1757_v17 = vld [vmem:[%s6285_s3 + $0x150] sm:$0xff]  ;;  %v1764_v19 = vld [vmem:[%s6285_s3 + $0x188] sm:$0xff] }
 0x144   :  { %1074 = vmatmul.mubr.f32.vlgmr.msra.gmra.mrb[0].mxu0 %v4707_v4  ;;  %v3122_v4 = vpack.c.bf16 %v527_v39, %v524_v36  ;;  %v1742_v36 = vld [vmem:[%s6285_s3 + $0xd8] sm:$0xff] }
 0x145   :  { %3117 = vmatpush1.bf16.msra.mxu0 %v3116_v33  ;;  %1144 = vmatprep.mubr.f32.mxu0 %v4938_v2  ;;  %v1722_v2 = vld [vmem:[%s6285_s3 + $0x38] sm:$0xff]  ;;  %v551_v33 = vld [vmem:[%s6283_s1 + $0x1040] sm:$0xff]  ;;  %v3416_v50 = vpack.c.bf16 %v1742_v36, %v1739_v38 }
 0x146   :  { %3119 = vmatprep.subr.bf16.mxu0 %v3118_v35  ;;  %v3402_v57 = vpack.c.bf16 %v1725_v30, %v1722_v2  ;;  %v3138_v46 = vpack.c.bf16 %v551_v33, %v548_v31  ;;  %v1745_v30 = vld [vmem:[%s6285_s3 + $0xf0] sm:$0xff]  ;;  %v1763_v31 = vld [vmem:[%s6285_s3 + $0x180] sm:$0xff]  ;;  %v1770_v33 = vld [vmem:[%s6285_s3 + $0x1b8] sm:$0xff] }
 0x147   :  { %v571_v36 = vld [vmem:[%s6283_s1 + $0x10e0] sm:$0xff] }
 0x148   :  { %3403 = vmatprep.subr.bf16.mxu1 %v3402_v57  ;;  %v1752_v57 = vld [vmem:[%s6285_s3 + $0x128] sm:$0xff] }
 0x149   :  { %3121 = vmatpush1.bf16.msra.mxu0 %v3120_v41  ;;  %3405 = vmatpush1.bf16.msra.mxu1 %v3404_v3  ;;  %v1749_v41 = vld [vmem:[%s6285_s3 + $0x110] sm:$0xff]  ;;  %v3422_v63 = vpack.c.bf16 %v1755_v58, %v1752_v57  ;;  %v1754_v3 = vld [vmem:[%s6285_s3 + $0x138] sm:$0xff]  ;;  %v587_v58 = vld [vmem:[%s6283_s1 + $0x1160] sm:$0xff] }
 0x14a   :  { %3123 = vmatprep.subr.bf16.mxu0 %v3122_v4  ;;  %3407 = vmatprep.subr.bf16.mxu1 %v3406_v6  ;;  %v547_v4 = vld [vmem:[%s6283_s1 + $0x1020] sm:$0xff]  ;;  %v3418_v2 = vpack.c.bf16 %v1749_v41, %v1746_v40  ;;  %v1761_v6 = vld [vmem:[%s6285_s3 + $0x170] sm:$0xff]  ;;  %v578_v40 = vld [vmem:[%s6283_s1 + $0x1118] sm:$0xff] }
 0x14b   :  { %v3426_v16 = vpack.c.bf16 %v1761_v6, %v1758_v5  ;;  %v593_v6 = vld [vmem:[%s6283_s1 + $0x1190] sm:$0xff] }
 0x14d   :  { %3125 = vmatpush1.bf16.msra.mxu0 %v3124_v28  ;;  %3409 = vmatpush1.bf16.msra.mxu1 %v3408_v12  ;;  %v556_v28 = vld [vmem:[%s6283_s1 + $0x1068] sm:$0xff] }
 0x14e   :  { %3127 = vmatprep.subr.bf16.mxu0 %v3126_v61  ;;  %v2484_v35 = vpop.f32.mrb[6].mxu1  ;;  %3411 = vmatprep.subr.bf16.mxu1 %v3410_v20  ;;  %v3420_v61 = vpack.c.bf16 %v1748_v52, %v1745_v30  ;;  %v3144_v37 = vpack.c.bf16 %v556_v28, %v553_v59  ;;  %v1760_v12 = vld [vmem:[%s6285_s3 + $0x168] sm:$0xff]  ;;  %v1767_v20 = vld [vmem:[%s6285_s3 + $0x1a0] sm:$0xff]  ;;  %v1778_v59 = vld [vmem:[%s6285_s3 + $0x1f8] sm:$0xff] }
 0x14f   :  { %v2485_v39 = vpop.f32.mrb[7].mxu1  ;;  %v3430_v29 = vpack.c.bf16 %v1767_v20, %v1764_v19  ;;  %v580_v30 = vld [vmem:[%s6283_s1 + $0x1128] sm:$0xff]  ;;  %v1782_v28 = vld [vmem:[%s6285_s3 + $0x218] sm:$0xff]  ;;  %v599_v20 = vld [vmem:[%s6283_s1 + $0x11c0] sm:$0xff] }
 0x150   :  { %v2486_v45 = vadd.f32 %v2485_v39, %v2484_v35  ;;  %v1773_v35 = vld [vmem:[%s6285_s3 + $0x1d0] sm:$0xff]  ;;  %v574_v39 = vld [vmem:[%s6283_s1 + $0x10f8] sm:$0xff]  ;;  %v584_v52 = vld [vmem:[%s6283_s1 + $0x1148] sm:$0xff] }
 0x151   :  { %3129 = vmatpush1.bf16.msra.mxu0 %v3128_v11  ;;  %3413 = vmatpush1.bf16.msra.mxu1 %v3412_v32  ;;  %v566_v11 = vld [vmem:[%s6283_s1 + $0x10b8] sm:$0xff]  ;;  %v3162_v62 = vpack.c.bf16 %v587_v58, %v584_v52 }
 0x152   :  { %3131 = vmatprep.subr.bf16.mxu0 %v3130_v14  ;;  %v5590_v23 = vadd.f32 %v2486_v45, %v5423_v18  ;;  %3415 = vmatprep.subr.bf16.mxu1 %v3414_v42  ;;  %v3140_v18 = vpack.c.bf16 %v550_v55, %v547_v4  ;;  %v3424_v14 = vpack.c.bf16 %v1754_v3, %v1751_v0  ;;  %v1766_v32 = vld [vmem:[%s6285_s3 + $0x198] sm:$0xff]  ;;  %v1772_v4 = vld [vmem:[%s6285_s3 + $0x1c8] sm:$0xff] }
 0x153   :  { %v3150_v22 = vpack.c.bf16 %v569_v15, %v566_v11  ;;  %v3152_v42 = vpack.c.bf16 %v568_v24, %v565_v44  ;;  %v3432_v41 = vpack.c.bf16 %v1766_v32, %v1763_v31  ;;  %v3434_v45 = vpack.c.bf16 %v1773_v35, %v1770_v33  ;;  %v1776_v55 = vld [vmem:[%s6285_s3 + $0x1e8] sm:$0xff]  ;;  %v586_v0 = vld [vmem:[%s6283_s1 + $0x1158] sm:$0xff]  ;;  %v1791_v11 = vld [vmem:[%s6285_s3 + $0x260] sm:$0xff] }
 0x154   :  { %v590_v3 = vld [vmem:[%s6283_s1 + $0x1178] sm:$0xff]  ;;  %v1787_v44 = vld [vmem:[%s6285_s3 + $0x240] sm:$0xff] }
 0x155   :  { %3133 = vmatpush1.bf16.msra.mxu0 %v3132_v25  ;;  %3417 = vmatpush1.bf16.msra.mxu1 %v3416_v50  ;;  %v572_v25 = vld [vmem:[%s6283_s1 + $0x10e8] sm:$0xff]  ;;  %v3156_v50 = vpack.c.bf16 %v574_v39, %v571_v36  ;;  %v3166_v15 = vpack.c.bf16 %v593_v6, %v590_v3  ;;  %v1790_v24 = vld [vmem:[%s6285_s3 + $0x258] sm:$0xff]  ;;  %v595_v33 = vld [vmem:[%s6283_s1 + $0x11a0] sm:$0xff] }
 0x156   :  { %3135 = vmatprep.subr.bf16.mxu0 %v3134_v26  ;;  %3419 = vmatprep.subr.bf16.mxu1 %v3418_v2  ;;  %v3428_v26 = vpack.c.bf16 %v1760_v12, %v1757_v17  ;;  %v3154_v38 = vpack.c.bf16 %v575_v27, %v572_v25  ;;  %v577_v2 = vld [vmem:[%s6283_s1 + $0x1110] sm:$0xff]  ;;  %v592_v17 = vld [vmem:[%s6283_s1 + $0x1188] sm:$0xff]  ;;  %v598_v35 = vld [vmem:[%s6283_s1 + $0x11b8] sm:$0xff] }
 0x157   :  { %v596_v12 = vld [vmem:[%s6283_s1 + $0x11a8] sm:$0xff]  ;;  %v1797_v27 = vld [vmem:[%s6285_s3 + $0x290] sm:$0xff]  ;;  %v1806_v3 = vld [vmem:[%s6285_s3 + $0x2d8] sm:$0xff] }
 0x158   :  { %v3170_v32 = vpack.c.bf16 %v599_v20, %v596_v12  ;;  %v605_v36 = vld [vmem:[%s6283_s1 + $0x11f0] sm:$0xff] }
 0x159   :  { %3137 = vmatpush1.bf16.msra.mxu0 %v3136_v43  ;;  %3421 = vmatpush1.bf16.msra.mxu1 %v3420_v61  ;;  %v581_v43 = vld [vmem:[%s6283_s1 + $0x1130] sm:$0xff]  ;;  %v3160_v61 = vpack.c.bf16 %v580_v30, %v577_v2 }
 0x15a   :  { %3139 = vmatprep.subr.bf16.mxu0 %v3138_v46  ;;  %3423 = vmatprep.subr.bf16.mxu1 %v3422_v63  ;;  %v1769_v46 = vld [vmem:[%s6285_s3 + $0x1b0] sm:$0xff]  ;;  %v3158_v51 = vpack.c.bf16 %v581_v43, %v578_v40  ;;  %v583_v63 = vld [vmem:[%s6283_s1 + $0x1140] sm:$0xff]  ;;  %v1796_v43 = vld [vmem:[%s6285_s3 + $0x288] sm:$0xff] }
 0x15b   :  { %v3436_v57 = vpack.c.bf16 %v1772_v4, %v1769_v46  ;;  %v601_v4 = vld [vmem:[%s6283_s1 + $0x11d0] sm:$0xff] }
 0x15d   :  { %3141 = vmatpush1.bf16.msra.mxu0 %v3140_v18  ;;  %3425 = vmatpush1.bf16.msra.mxu1 %v3424_v14  ;;  %v3438_v18 = vpack.c.bf16 %v1779_v49, %v1776_v55  ;;  %v3164_v14 = vpack.c.bf16 %v586_v0, %v583_v63  ;;  %v1802_v63 = vld [vmem:[%s6285_s3 + $0x2b8] sm:$0xff] }
 0x15e   :  { %3143 = vmatprep.subr.bf16.mxu0 %v3142_v1  ;;  %3427 = vmatprep.subr.bf16.mxu1 %v3426_v16  ;;  %v1775_v1 = vld [vmem:[%s6285_s3 + $0x1e0] sm:$0xff]  ;;  %v589_v16 = vld [vmem:[%s6283_s1 + $0x1170] sm:$0xff] }
 0x15f   :  { %v3440_v5 = vpack.c.bf16 %v1778_v59, %v1775_v1 }
 0x161   :  { %3145 = vmatpush1.bf16.msra.mxu0 %v3144_v37  ;;  %3429 = vmatpush1.bf16.msra.mxu1 %v3428_v26  ;;  %v3442_v37 = vpack.c.bf16 %v1785_v60, %v1782_v28  ;;  %v1794_v26 = vld [vmem:[%s6285_s3 + $0x278] sm:$0xff]  ;;  %v1800_v60 = vld [vmem:[%s6285_s3 + $0x2a8] sm:$0xff] }
 0x162   :  { %3147 = vmatprep.subr.bf16.mxu0 %v3146_v8  ;;  %3431 = vmatprep.subr.bf16.mxu1 %v3430_v29  ;;  %v1781_v8 = vld [vmem:[%s6285_s3 + $0x210] sm:$0xff]  ;;  %v3168_v29 = vpack.c.bf16 %v592_v17, %v589_v16  ;;  %v3450_v40 = vpack.c.bf16 %v1797_v27, %v1794_v26  ;;  %v639_v16 = vsub.s32 1, %v3857_v13 }
 0x163   :  { %v3444_v19 = vpack.c.bf16 %v1784_v9, %v1781_v8  ;;  %v1808_v8 = vld [vmem:[%s6285_s3 + $0x2e8] sm:$0xff] }
 0x164   :  { %v640_v12 = vrot.slane %v5381_v56, %v639_v16 }
 0x165   :  { %3149 = vmatpush1.bf16.msra.mxu0 %v3148_v21  ;;  %3433 = vmatpush1.bf16.msra.mxu1 %v3432_v41  ;;  %v1793_v41 = vld [vmem:[%s6285_s3 + $0x270] sm:$0xff] }
 0x166   :  { %3151 = vmatprep.subr.bf16.mxu0 %v3150_v22  ;;  %3435 = vmatprep.subr.bf16.mxu1 %v3434_v45  ;;  %v3446_v22 = vpack.c.bf16 %v1791_v11, %v1788_v10  ;;  %v3172_v45 = vpack.c.bf16 %v598_v35, %v595_v33  ;;  %v3452_v55 = vpack.c.bf16 %v1796_v43, %v1793_v41  ;;  %v1812_v10 = vld [vmem:[%s6285_s3 + $0x308] sm:$0xff]  ;;  %v1815_v11 = vld [vmem:[%s6285_s3 + $0x320] sm:$0xff]  ;;  %v1817_v33 = vld [vmem:[%s6285_s3 + $0x330] sm:$0xff] }
 0x167   :  { %v1824_v35 = vld [vmem:[%s6285_s3 + $0x368] sm:$0xff]  ;;  %v1830_v41 = vld [vmem:[%s6285_s3 + $0x398] sm:$0xff]  ;;  %v1833_v43 = vld [vmem:[%s6285_s3 + $0x3b0] sm:$0xff] }
 0x169   :  { %3153 = vmatpush1.bf16.msra.mxu0 %v3152_v42  ;;  %3437 = vmatpush1.bf16.msra.mxu1 %v3436_v57  ;;  %v602_v42 = vld [vmem:[%s6283_s1 + $0x11d8] sm:$0xff] }
 0x16a   :  { %3155 = vmatprep.subr.bf16.mxu0 %v3154_v38  ;;  %3439 = vmatprep.subr.bf16.mxu1 %v3438_v18  ;;  %v3448_v38 = vpack.c.bf16 %v1790_v24, %v1787_v44  ;;  %v3174_v46 = vpack.c.bf16 %v605_v36, %v602_v42  ;;  %v1811_v24 = vld [vmem:[%s6285_s3 + $0x300] sm:$0xff] }
 0x16b   :  { %v1827_v42 = vld [vmem:[%s6285_s3 + $0x380] sm:$0xff] }
 0x16c   :  { %v3470_v36 = vpack.c.bf16 %v1827_v42, %v1824_v35  ;;  %v1729_v35 = vld [vmem:[%s6285_s3 + $0x70] sm:$0xff]  ;;  %v1732_v42 = vld [vmem:[%s6285_s3 + $0x88] sm:$0xff] }
 0x16d   :  { %3157 = vmatpush1.bf16.msra.mxu0 %v3156_v50  ;;  %3441 = vmatpush1.bf16.msra.mxu1 %v3440_v5  ;;  %v1809_v5 = vld [vmem:[%s6285_s3 + $0x2f0] sm:$0xff] }
 0x16e   :  { %3159 = vmatprep.subr.bf16.mxu0 %v3158_v51  ;;  %v2519_v21 = vpop.f32.mrb[8].mxu1  ;;  %3443 = vmatprep.subr.bf16.mxu1 %v3442_v37  ;;  %v3458_v6 = vpack.c.bf16 %v1809_v5, %v1806_v3  ;;  %v1805_v37 = vld [vmem:[%s6285_s3 + $0x2d0] sm:$0xff]  ;;  %v1854_v3 = vld [vmem:[%s6285_s3 + $0x458] sm:$0xff] }
 0x16f   :  { %v2520_v25 = vpop.f32.mrb[9].mxu1  ;;  %v3460_v9 = vpack.c.bf16 %v1808_v8, %v1805_v37  ;;  %v1857_v5 = vld [vmem:[%s6285_s3 + $0x470] sm:$0xff] }
 0x170   :  { %v2521_v31 = vadd.f32 %v2520_v25, %v2519_v21  ;;  %v1814_v25 = vld [vmem:[%s6285_s3 + $0x318] sm:$0xff]  ;;  %v3490_v37 = vpack.c.bf16 %v1857_v5, %v1854_v3  ;;  %v1853_v8 = vld [vmem:[%s6285_s3 + $0x450] sm:$0xff] }
 0x171   :  { %3161 = vmatpush1.bf16.msra.mxu0 %v3160_v61  ;;  %3445 = vmatpush1.bf16.msra.mxu1 %v3444_v19  ;;  %v1813_v5 = vld [vmem:[%s6285_s3 + $0x310] sm:$0xff] }
 0x172   :  { %3163 = vmatprep.subr.bf16.mxu0 %v3162_v62  ;;  %v1499_v39 = vadd.f32 %v2521_v31, %v5590_v23  ;;  %3447 = vmatprep.subr.bf16.mxu1 %v3446_v22  ;;  %v604_v23 = vld [vmem:[%s6283_s1 + $0x11e8] sm:$0xff]  ;;  %v1799_v62 = vld [vmem:[%s6285_s3 + $0x2a0] sm:$0xff] }
 0x173   :  { %v3176_v49 = vpack.c.bf16 %v604_v23, %v601_v4  ;;  %v3456_v0 = vpack.c.bf16 %v1802_v63, %v1799_v62  ;;  %v1829_v4 = vld [vmem:[%s6285_s3 + $0x390] sm:$0xff]  ;;  %v1832_v23 = vld [vmem:[%s6285_s3 + $0x3a8] sm:$0xff]  ;;  %v1847_v63 = vld [vmem:[%s6285_s3 + $0x420] sm:$0xff] }
 0x175   :  { %3165 = vmatpush1.bf16.msra.mxu0 %v3164_v14  ;;  %3449 = vmatpush1.bf16.msra.mxu1 %v3448_v38  ;;  %v3462_v14 = vpack.c.bf16 %v1815_v11, %v1812_v10  ;;  %v1765_v10 = vld [vmem:[%s6285_s3 + $0x190] sm:$0xff]  ;;  %v1768_v11 = vld [vmem:[%s6285_s3 + $0x1a8] sm:$0xff] }
 0x176   :  { %3167 = vmatprep.subr.bf16.mxu0 %v3166_v15  ;;  %3451 = vmatprep.subr.bf16.mxu1 %v3450_v40  ;;  %v635_v15 = vsub.s32 0, %v3857_v13  ;;  %v1826_v40 = vld [vmem:[%s6285_s3 + $0x378] sm:$0xff] }
 0x178   :  { %v636_v17 = vrot.slane %v5381_v56, %v635_v15  ;;  %v1818_v56 = vld [vmem:[%s6285_s3 + $0x338] sm:$0xff] }
 0x179   :  { %3169 = vmatpush1.bf16.msra.mxu0 %v3168_v29  ;;  %3453 = vmatpush1.bf16.msra.mxu1 %v3452_v55  ;;  %v3464_v29 = vpack.c.bf16 %v1814_v25, %v1811_v24  ;;  %v1836_v55 = vld [vmem:[%s6285_s3 + $0x3c8] sm:$0xff] }
 0x17a   :  { %3171 = vmatprep.subr.bf16.mxu0 %v3170_v32 }
 0x17d   :  { %3173 = vmatpush1.bf16.msra.mxu0 %v3172_v45 }
 0x17e   :  { %3175 = vmatprep.subr.bf16.mxu0 %v3174_v46  ;;  %v3474_v46 = vpack.c.bf16 %v1833_v43, %v1830_v41  ;;  %v1789_v41 = vld [vmem:[%s6285_s3 + $0x250] sm:$0xff]  ;;  %v1792_v43 = vld [vmem:[%s6285_s3 + $0x268] sm:$0xff] }
 0x181   :  { %3177 = vmatpush1.bf16.msra.mxu0 %v3176_v49  ;;  %v1839_v49 = vld [vmem:[%s6285_s3 + $0x3e0] sm:$0xff] }
 0x182   :  { %3582 = vmatprep.subr.bf16.mxu0 %v3663_v34 }
 0x184   :  { %1145 = vmatmul.mubr.f32.vlgmr.msra.gmra.mrb[0].mxu0 %v4910_v53  ;;  %v1803_v53 = vld [vmem:[%s6285_s3 + $0x2c0] sm:$0xff] }
 0x185   :  { %2791 = vmatprep.mubr.msk.f32.mxu0 %vm3664_vm1, %v3661_v7  ;;  %v3454_v61 = vpack.c.bf16 %v1803_v53, %v1800_v60  ;;  %v1848_v60 = vld [vmem:[%s6285_s3 + $0x428] sm:$0xff]  ;;  %v1851_v53 = vld [vmem:[%s6285_s3 + $0x440] sm:$0xff] }
 0x186   :  { %v3486_v62 = vpack.c.bf16 %v1851_v53, %v1848_v60  ;;  %v1807_v60 = vld [vmem:[%s6285_s3 + $0x2e0] sm:$0xff]  ;;  %v1810_v53 = vld [vmem:[%s6285_s3 + $0x2f8] sm:$0xff] }
 0x187   :  { %3455 = vmatprep.subr.bf16.mxu1 %v3454_v61 }
 0x188   :  { %3457 = vmatpush1.bf16.msra.mxu1 %v3456_v0  ;;  %v1850_v0 = vld [vmem:[%s6285_s3 + $0x438] sm:$0xff] }
 0x189   :  { %3459 = vmatprep.subr.bf16.mxu1 %v3458_v6  ;;  %v3488_v6 = vpack.c.bf16 %v1850_v0, %v1847_v63  ;;  %v1759_v63 = vld [vmem:[%s6285_s3 + $0x160] sm:$0xff]  ;;  %v1762_v0 = vld [vmem:[%s6285_s3 + $0x178] sm:$0xff] }
 0x18a   :  { %v3524_v3 = vpack.c.bf16 %v1762_v0, %v1759_v63  ;;  %v2171_v0 = vld [vmem:[%s6287_s5 + $0x50] sm:$0xff] }
 0x18c   :  { %3461 = vmatpush1.bf16.msra.mxu1 %v3460_v9  ;;  %v1856_v9 = vld [vmem:[%s6285_s3 + $0x468] sm:$0xff] }
 0x18d   :  { %3463 = vmatprep.subr.bf16.mxu1 %v3462_v14  ;;  %v3492_v14 = vpack.c.bf16 %v1856_v9, %v1853_v8  ;;  %v1819_v8 = vld [vmem:[%s6285_s3 + $0x340] sm:$0xff]  ;;  %v1822_v9 = vld [vmem:[%s6285_s3 + $0x358] sm:$0xff] }
 0x191   :  { %v2554_v50 = vpop.f32.mrb[10].mxu1 }
 0x192   :  { %v2555_v51 = vpop.f32.mrb[11].mxu1 }
 0x193   :  { %v2556_v2 = vadd.f32 %v2555_v51, %v2554_v50  ;;  %v3476_v50 = vpack.c.bf16 %v1832_v23, %v1829_v4  ;;  %v3478_v51 = vpack.c.bf16 %v1839_v49, %v1836_v55  ;;  %v1741_v4 = vld [vmem:[%s6285_s3 + $0xd0] sm:$0xff]  ;;  %v1744_v23 = vld [vmem:[%s6285_s3 + $0xe8] sm:$0xff]  ;;  %v1795_v55 = vld [vmem:[%s6285_s3 + $0x280] sm:$0xff] }
 0x194   :  { %v1798_v49 = vld [vmem:[%s6285_s3 + $0x298] sm:$0xff] }
 0x195   :  { %v1569_v30 = vadd.f32 %v2556_v2, %v1499_v39  ;;  %v1823_v39 = vld [vmem:[%s6285_s3 + $0x360] sm:$0xff] }
 0x196   :  { %v3472_v45 = vpack.c.bf16 %v1826_v40, %v1823_v39  ;;  %v1835_v2 = vld [vmem:[%s6285_s3 + $0x3c0] sm:$0xff]  ;;  %v1738_v40 = vld [vmem:[%s6285_s3 + $0xb8] sm:$0xff] }
 0x197   :  { %v1735_v39 = vld [vmem:[%s6285_s3 + $0xa0] sm:$0xff] }
 0x1b1   :  { %v2589_v52 = vpop.f32.mrb[12].mxu1 }
 0x1b2   :  { %v2590_v57 = vpop.f32.mrb[13].mxu1 }
 0x1b3   :  { %v2591_v58 = vadd.f32 %v2590_v57, %v2589_v52  ;;  %v1842_v52 = vld [vmem:[%s6285_s3 + $0x3f8] sm:$0xff]  ;;  %v1845_v57 = vld [vmem:[%s6285_s3 + $0x410] sm:$0xff] }
 0x1b5   :  { %v1639_v18 = vadd.f32 %v2591_v58, %v1569_v30  ;;  %v1838_v30 = vld [vmem:[%s6285_s3 + $0x3d8] sm:$0xff] }
 0x1b6   :  { %v3480_v58 = vpack.c.bf16 %v1838_v30, %v1835_v2  ;;  %v1747_v2 = vld [vmem:[%s6285_s3 + $0x100] sm:$0xff]  ;;  %v1750_v30 = vld [vmem:[%s6285_s3 + $0x118] sm:$0xff] }
 0x1c1   :  { %v1708_v1 = vpop.f32.mrb[14].mxu1 }
 0x1c2   :  { %v5801_v59 = vadd.f32 %v1708_v1, %v1639_v18  ;;  %v2723_v28 = vpop.f32.mrb[15].mxu1  ;;  %v3482_v18 = vpack.c.bf16 %v1845_v57, %v1842_v52  ;;  %v1841_v1 = vld [vmem:[%s6285_s3 + $0x3f0] sm:$0xff]  ;;  %v1804_v57 = vld [vmem:[%s6285_s3 + $0x2c8] sm:$0xff] }
 0x1c3   :  { %v1844_v28 = vld [vmem:[%s6285_s3 + $0x408] sm:$0xff]  ;;  %v1801_v52 = vld [vmem:[%s6285_s3 + $0x2b0] sm:$0xff] }
 0x1c4   :  { %v3484_v61 = vpack.c.bf16 %v1844_v28, %v1841_v1  ;;  %v1714_v24 = vmax.f32 %v5801_v59, 0.0  ;;  %v1753_v1 = vld [vmem:[%s6285_s3 + $0x130] sm:$0xff]  ;;  %v1756_v28 = vld [vmem:[%s6285_s3 + $0x148] sm:$0xff]  ;;  %v2184_v59 = vld [vmem:[%s6287_s5 + $0xb8] sm:$0xff] }
 0x257   :  { %v1146_v19 = vpop.f32.mrb[0].mxu0 }
 0x258   :  { %v3606_v20 = vadd.f32 %v1146_v19, %v636_v17  ;;  %v1148_v21 = vpop.f32.mrb[1].mxu0  ;;  %v3494_v17 = vpack.c.bf16 %v1768_v11, %v1765_v10  ;;  %v1720_v19 = vld [vmem:[%s6285_s3 + $0x28] sm:$0xff]  ;;  %v3530_v10 = vpack.c.bf16 %v1822_v9, %v1819_v8  ;;  %v1825_v11 = vld [vmem:[%s6285_s3 + $0x370] sm:$0xff]  ;;  %v2173_v9 = vld [vmem:[%s6287_s5 + $0x60] sm:$0xff] }
 0x259   :  { %v3608_v22 = vadd.f32 %v1148_v21, %v640_v12  ;;  %v1717_v12 = vld [vmem:[%s6285_s3 + $0x10] sm:$0xff]  ;;  %v1774_v21 = vld [vmem:[%s6285_s3 + $0x1d8] sm:$0xff] }
 0x25a   :  { %v5842_v44 = vadd.f32 %v3606_v20, %v5250_v47  ;;  %v1821_v47 = vld [vmem:[%s6285_s3 + $0x350] sm:$0xff]  ;;  %v1771_v20 = vld [vmem:[%s6285_s3 + $0x1c0] sm:$0xff] }
 0x25b   :  { %v5851_v26 = vadd.f32 %v3608_v22, %v5253_v48  ;;  %v3466_v32 = vpack.c.bf16 %v1821_v47, %v1818_v56  ;;  %v1820_v48 = vld [vmem:[%s6285_s3 + $0x348] sm:$0xff]  ;;  %v3496_v22 = vpack.c.bf16 %v1720_v19, %v1717_v12  ;;  %v3498_v25 = vpack.c.bf16 %v1774_v21, %v1771_v20  ;;  %v1723_v56 = vld [vmem:[%s6285_s3 + $0x40] sm:$0xff]  ;;  %v1726_v47 = vld [vmem:[%s6285_s3 + $0x58] sm:$0xff] }
 0x25c   :  { %v1712_v31 = vmax.f32 %v5842_v44, 0.0  ;;  %v3468_v38 = vpack.c.bf16 %v1820_v48, %v1817_v33  ;;  %v3500_v33 = vpack.c.bf16 %v1726_v47, %v1723_v56  ;;  %v1831_v44 = vld [vmem:[%s6285_s3 + $0x3a0] sm:$0xff]  ;;  %v1837_v12 = vld [vmem:[%s6285_s3 + $0x3d0] sm:$0xff]  ;;  %v1840_v19 = vld [vmem:[%s6285_s3 + $0x3e8] sm:$0xff] }
 0x25d   :  { %v1713_v27 = vmax.f32 %v5851_v26, 0.0  ;;  %v1786_v26 = vld [vmem:[%s6285_s3 + $0x238] sm:$0xff]  ;;  %v3539_v20 = vpack.c.bf16 %v1840_v19, %v1837_v12  ;;  %v1843_v21 = vld [vmem:[%s6285_s3 + $0x400] sm:$0xff]  ;;  %v1849_v56 = vld [vmem:[%s6285_s3 + $0x430] sm:$0xff] }
 0x25e   :  { %v1852_v47 = vld [vmem:[%s6285_s3 + $0x448] sm:$0xff]  ;;  %v2193_v19 = vld [vmem:[%s6287_s5 + $0x100] sm:$0xff] }
 0x25f   :  { %1940 = vmatprep.mubr.f32.mxu1 %v1713_v27 }
 0x260   :  { %1941 = vmatmul.mubr.f32.vlgmr.msra.gmra.mrb[16].mxu1 %v1712_v31 }
 0x261   :  { %3465 = vmatpush1.bf16.msra.mxu1 %v3464_v29  ;;  %2011 = vmatprep.mubr.f32.mxu1 %v3661_v7  ;;  %v1777_v29 = vld [vmem:[%s6285_s3 + $0x1f0] sm:$0xff] }
 0x262   :  { %3467 = vmatprep.subr.bf16.mxu1 %v3466_v32  ;;  %v1780_v32 = vld [vmem:[%s6285_s3 + $0x208] sm:$0xff] }
 0x263   :  { %v3502_v48 = vpack.c.bf16 %v1780_v32, %v1777_v29  ;;  %v3545_v29 = vpack.c.bf16 %v1852_v47, %v1849_v56  ;;  %v1855_v32 = vld [vmem:[%s6285_s3 + $0x460] sm:$0xff] }
 0x264   :  { %v2197_v47 = vld [vmem:[%s6287_s5 + $0x120] sm:$0xff] }
 0x265   :  { %3469 = vmatpush1.bf16.msra.mxu1 %v3468_v38  ;;  %v1783_v38 = vld [vmem:[%s6285_s3 + $0x220] sm:$0xff] }
 0x266   :  { %3471 = vmatprep.subr.bf16.mxu1 %v3470_v36  ;;  %v3506_v36 = vpack.c.bf16 %v1786_v26, %v1783_v38  ;;  %v2161_v26 = vld [vmem:[%s6287_s5] sm:$0xff] }
 0x269   :  { %3473 = vmatpush1.bf16.msra.mxu1 %v3472_v45  ;;  %v3508_v45 = vpack.c.bf16 %v1738_v40, %v1735_v39  ;;  %v2180_v39 = vld [vmem:[%s6287_s5 + $0x98] sm:$0xff] }
 0x26a   :  { %3475 = vmatprep.subr.bf16.mxu1 %v3474_v46  ;;  %v3510_v46 = vpack.c.bf16 %v1792_v43, %v1789_v41  ;;  %v2163_v43 = vld [vmem:[%s6287_s5 + $0x10] sm:$0xff] }
 0x26d   :  { %3477 = vmatpush1.bf16.msra.mxu1 %v3476_v50  ;;  %v3512_v50 = vpack.c.bf16 %v1744_v23, %v1741_v4  ;;  %v2182_v4 = vld [vmem:[%s6287_s5 + $0xa8] sm:$0xff] }
 0x26e   :  { %3479 = vmatprep.subr.bf16.mxu1 %v3478_v51  ;;  %v3514_v51 = vpack.c.bf16 %v1798_v49, %v1795_v55  ;;  %v2165_v49 = vld [vmem:[%s6287_s5 + $0x20] sm:$0xff] }
 0x271   :  { %3481 = vmatpush1.bf16.msra.mxu1 %v3480_v58  ;;  %v3516_v58 = vpack.c.bf16 %v1750_v30, %v1747_v2  ;;  %v2167_v30 = vld [vmem:[%s6287_s5 + $0x30] sm:$0xff] }
 0x272   :  { %3483 = vmatprep.subr.bf16.mxu1 %v3482_v18  ;;  %v3518_v18 = vpack.c.bf16 %v1804_v57, %v1801_v52  ;;  %v2168_v52 = vld [vmem:[%s6287_s5 + $0x38] sm:$0xff]  ;;  %v2185_v57 = vld [vmem:[%s6287_s5 + $0xc0] sm:$0xff] }
 0x275   :  { %3485 = vmatpush1.bf16.msra.mxu1 %v3484_v61  ;;  %v3520_v61 = vpack.c.bf16 %v1756_v28, %v1753_v1  ;;  %v2169_v28 = vld [vmem:[%s6287_s5 + $0x40] sm:$0xff] }
 0x276   :  { %3487 = vmatprep.subr.bf16.mxu1 %v3486_v62  ;;  %v3522_v62 = vpack.c.bf16 %v1810_v53, %v1807_v60  ;;  %v2170_v60 = vld [vmem:[%s6287_s5 + $0x48] sm:$0xff]  ;;  %v2187_v53 = vld [vmem:[%s6287_s5 + $0xd0] sm:$0xff] }
 0x279   :  { %3489 = vmatpush1.bf16.msra.mxu1 %v3488_v6  ;;  %v1816_v6 = vld [vmem:[%s6285_s3 + $0x328] sm:$0xff] }
 0x27a   :  { %3491 = vmatprep.subr.bf16.mxu1 %v3490_v37  ;;  %v3527_v37 = vpack.c.bf16 %v1816_v6, %v1813_v5  ;;  %v2189_v5 = vld [vmem:[%s6287_s5 + $0xe0] sm:$0xff]  ;;  %v2190_v6 = vld [vmem:[%s6287_s5 + $0xe8] sm:$0xff] }
 0x27b   :  { %v3574_v8 = vpack.c.bf16 %v2190_v6, %v2189_v5 }
 0x27d   :  { %3493 = vmatpush1.bf16.msra.mxu1 %v3492_v14  ;;  %v1828_v14 = vld [vmem:[%s6285_s3 + $0x388] sm:$0xff] }
 0x27e   :  { %3495 = vmatprep.subr.bf16.mxu1 %v3494_v17  ;;  %v3533_v17 = vpack.c.bf16 %v1828_v14, %v1825_v11  ;;  %v2191_v11 = vld [vmem:[%s6287_s5 + $0xf0] sm:$0xff]  ;;  %v2192_v14 = vld [vmem:[%s6287_s5 + $0xf8] sm:$0xff] }
 0x280   :  { %2012 = vmatmul.mubr.f32.vlgmr.msra.gmra.mrb[16].mxu1 %v1714_v24 }
 0x281   :  { %3497 = vmatpush3.bf16.msra.mxu1 %v3496_v22  ;;  %2082 = vmatprep.mubr.f32.mxu1 %v1713_v27  ;;  %v3504_v27 = vpack.c.bf16 %v1732_v42, %v1729_v35  ;;  %v1846_v22 = vld [vmem:[%s6285_s3 + $0x418] sm:$0xff]  ;;  %v2178_v35 = vld [vmem:[%s6287_s5 + $0x88] sm:$0xff] }
 0x282   :  { %3499 = vmatprep.subr.bf16.mxu1 %v3498_v25  ;;  %v3542_v25 = vpack.c.bf16 %v1846_v22, %v1843_v21  ;;  %v2195_v21 = vld [vmem:[%s6287_s5 + $0x110] sm:$0xff] }
 0x285   :  { %3501 = vmatpush3.bf16.msra.mxu1 %v3500_v33  ;;  %v1858_v33 = vld [vmem:[%s6285_s3 + $0x478] sm:$0xff] }
 0x286   :  { %3503 = vmatprep.subr.bf16.mxu1 %v3502_v48  ;;  %v2177_v48 = vld [vmem:[%s6287_s5 + $0x80] sm:$0xff]  ;;  %v3548_v42 = vpack.c.bf16 %v1858_v33, %v1855_v32  ;;  %v2199_v33 = vld [vmem:[%s6287_s5 + $0x130] sm:$0xff] }
 0x287   :  { %v3550_v38 = vpack.c.bf16 %v2178_v35, %v2177_v48  ;;  %v2200_v48 = vld [vmem:[%s6287_s5 + $0x138] sm:$0xff] }
 0x288   :  { %v3592_v35 = vpack.c.bf16 %v2200_v48, %v2199_v33 }
 0x289   :  { %3505 = vmatpush3.bf16.msra.mxu1 %v3504_v27  ;;  %v2162_v27 = vld [vmem:[%s6287_s5 + $0x8] sm:$0xff] }
 0x28a   :  { %3507 = vmatprep.subr.bf16.mxu1 %v3506_v36  ;;  %v2179_v36 = vld [vmem:[%s6287_s5 + $0x90] sm:$0xff]  ;;  %v3552_v40 = vpack.c.bf16 %v2162_v27, %v2161_v26 }
 0x28b   :  { %v3554_v41 = vpack.c.bf16 %v2180_v39, %v2179_v36  ;;  %v2203_v27 = vld [vmem:[%s6287_s5 + $0x150] sm:$0xff]  ;;  %v2204_v36 = vld [vmem:[%s6287_s5 + $0x158] sm:$0xff] }
 0x28c   :  { %v3598_v39 = vpack.c.bf16 %v2204_v36, %v2203_v27 }
 0x28d   :  { %3509 = vmatpush3.bf16.msra.mxu1 %v3508_v45  ;;  %v2164_v45 = vld [vmem:[%s6287_s5 + $0x18] sm:$0xff] }
 0x28e   :  { %3511 = vmatprep.subr.bf16.mxu1 %v3510_v46  ;;  %v2181_v46 = vld [vmem:[%s6287_s5 + $0xa0] sm:$0xff]  ;;  %v3556_v23 = vpack.c.bf16 %v2164_v45, %v2163_v43  ;;  %v2207_v45 = vld [vmem:[%s6287_s5 + $0x170] sm:$0xff] }
 0x28f   :  { %v3558_v55 = vpack.c.bf16 %v2182_v4, %v2181_v46  ;;  %v2208_v46 = vld [vmem:[%s6287_s5 + $0x178] sm:$0xff] }
 0x290   :  { %v3604_v4 = vpack.c.bf16 %v2208_v46, %v2207_v45 }
 0x291   :  { %3513 = vmatpush3.bf16.msra.mxu1 %v3512_v50  ;;  %v2166_v50 = vld [vmem:[%s6287_s5 + $0x28] sm:$0xff] }
 0x292   :  { %3515 = vmatprep.subr.bf16.mxu1 %v3514_v51  ;;  %v2183_v51 = vld [vmem:[%s6287_s5 + $0xb0] sm:$0xff] }
 0x293   :  { %v3562_v2 = vpack.c.bf16 %v2184_v59, %v2183_v51 }
 0x295   :  { %3517 = vmatpush3.bf16.msra.mxu1 %v3516_v58  ;;  %v2186_v58 = vld [vmem:[%s6287_s5 + $0xc8] sm:$0xff] }
 0x296   :  { %3519 = vmatprep.subr.bf16.mxu1 %v3518_v18  ;;  %v3564_v18 = vpack.c.bf16 %v2168_v52, %v2167_v30  ;;  %v3566_v1 = vpack.c.bf16 %v2186_v58, %v2185_v57 }
 0x299   :  { %3521 = vmatpush3.bf16.msra.mxu1 %v3520_v61  ;;  %v2188_v61 = vld [vmem:[%s6287_s5 + $0xd8] sm:$0xff] }
 0x29a   :  { %3523 = vmatprep.subr.bf16.mxu1 %v3522_v62  ;;  %v3568_v62 = vpack.c.bf16 %v2170_v60, %v2169_v28  ;;  %v3570_v63 = vpack.c.bf16 %v2188_v61, %v2187_v53 }
 0x29d   :  { %3525 = vmatpush3.bf16.msra.mxu1 %v3524_v3  ;;  %v2172_v3 = vld [vmem:[%s6287_s5 + $0x58] sm:$0xff] }
 0x29e   :  { %3526 = vmatprep.subr.bf16.mxu1 %v3663_v34 }
 0x2a0   :  { %2083 = vmatmul.mubr.f32.vlgmr.msra.gmra.mrb[18].mxu1 %v1712_v31 }
 0x2a1   :  { %3528 = vmatpush3.bf16.msra.mxu1 %v3527_v37  ;;  %2756 = vmatprep.mubr.msk.f32.mxu1 %vm3664_vm1, %v3661_v7  ;;  %v1834_v7 = vld [vmem:[%s6285_s3 + $0x3b8] sm:$0xff]  ;;  %v3572_v37 = vpack.c.bf16 %v2172_v3, %v2171_v0 }
 0x2a2   :  { %3529 = vmatprep.subr.bf16.mxu1 %v3663_v34  ;;  %v3536_v31 = vpack.c.bf16 %v1834_v7, %v1831_v44  ;;  %v3578_v44 = vpack.c.bf16 %v2192_v14, %v2191_v11  ;;  %v2175_v7 = vld [vmem:[%s6287_s5 + $0x70] sm:$0xff] }
 0x2a5   :  { %3531 = vmatpush3.bf16.msra.mxu1 %v3530_v10  ;;  %v2174_v10 = vld [vmem:[%s6287_s5 + $0x68] sm:$0xff] }
 0x2a6   :  { %3532 = vmatprep.subr.bf16.mxu1 %v3663_v34 }
 0x2a9   :  { %3534 = vmatpush3.bf16.msra.mxu1 %v3533_v17  ;;  %v3576_v17 = vpack.c.bf16 %v2174_v10, %v2173_v9 }
 0x2aa   :  { %3535 = vmatprep.subr.bf16.mxu1 %v3663_v34 }
 0x2ad   :  { %3537 = vmatpush3.bf16.msra.mxu1 %v3536_v31  ;;  %v2176_v31 = vld [vmem:[%s6287_s5 + $0x78] sm:$0xff] }
 0x2ae   :  { %3538 = vmatprep.subr.bf16.mxu1 %v3663_v34  ;;  %v3580_v12 = vpack.c.bf16 %v2176_v31, %v2175_v7 }
 0x2b1   :  { %3540 = vmatpush3.bf16.msra.mxu1 %v3539_v20  ;;  %v2194_v20 = vld [vmem:[%s6287_s5 + $0x108] sm:$0xff] }
 0x2b2   :  { %3541 = vmatprep.subr.bf16.mxu1 %v3663_v34  ;;  %v3583_v22 = vpack.c.bf16 %v2194_v20, %v2193_v19 }
 0x2b4   :  { %3584 = vmatpush3.bf16.msra.mxu0 %v3583_v22 }
 0x2b5   :  { %3543 = vmatpush3.bf16.msra.mxu1 %v3542_v25  ;;  %v2196_v25 = vld [vmem:[%s6287_s5 + $0x118] sm:$0xff]  ;;  %3585 = vmatprep.subr.bf16.mxu0 %v3663_v34 }
 0x2b6   :  { %3544 = vmatprep.subr.bf16.mxu1 %v3663_v34  ;;  %v3586_v56 = vpack.c.bf16 %v2196_v25, %v2195_v21 }
 0x2b8   :  { %3587 = vmatpush3.bf16.msra.mxu0 %v3586_v56 }
 0x2b9   :  { %3546 = vmatpush3.bf16.msra.mxu1 %v3545_v29  ;;  %v2198_v29 = vld [vmem:[%s6287_s5 + $0x128] sm:$0xff]  ;;  %3588 = vmatprep.subr.bf16.mxu0 %v3663_v34 }
 0x2ba   :  { %3547 = vmatprep.subr.bf16.mxu1 %v3663_v34  ;;  %v3589_v32 = vpack.c.bf16 %v2198_v29, %v2197_v47 }
 0x2bc   :  { %3590 = vmatpush3.bf16.msra.mxu0 %v3589_v32 }
 0x2bd   :  { %3549 = vmatpush3.bf16.msra.mxu1 %v3548_v42  ;;  %3591 = vmatprep.subr.bf16.mxu0 %v3663_v34  ;;  %v2201_v42 = vld [vmem:[%s6287_s5 + $0x140] sm:$0xff] }
 0x2be   :  { %3551 = vmatprep.subr.bf16.mxu1 %v3550_v38  ;;  %v2202_v38 = vld [vmem:[%s6287_s5 + $0x148] sm:$0xff] }
 0x2bf   :  { %v3595_v26 = vpack.c.bf16 %v2202_v38, %v2201_v42 }
 0x2c0   :  { %2757 = vmatmul.mubr.f32.vlgmr.msra.gmra.mrb[20].mxu1 %v1714_v24  ;;  %v3560_v24 = vpack.c.bf16 %v2166_v50, %v2165_v49  ;;  %3593 = vmatpush3.bf16.msra.mxu0 %v3592_v35 }
 0x2c1   :  { %3553 = vmatpush3.bf16.msra.mxu1 %v3552_v40  ;;  %3594 = vmatprep.subr.bf16.mxu0 %v3663_v34  ;;  %v2205_v40 = vld [vmem:[%s6287_s5 + $0x160] sm:$0xff] }
 0x2c2   :  { %3555 = vmatprep.subr.bf16.mxu1 %v3554_v41  ;;  %v2206_v41 = vld [vmem:[%s6287_s5 + $0x168] sm:$0xff] }
 0x2c3   :  { %v3601_v43 = vpack.c.bf16 %v2206_v41, %v2205_v40 }
 0x2c4   :  { %3596 = vmatpush3.bf16.msra.mxu0 %v3595_v26 }
 0x2c5   :  { %3557 = vmatpush3.bf16.msra.mxu1 %v3556_v23  ;;  %3597 = vmatprep.subr.bf16.mxu0 %v3663_v34  ;;  %v1859_v23 = vld [vmem:[%s6286_s4] sm:$0x7] }
 0x2c6   :  { %3559 = vmatprep.subr.bf16.mxu1 %v3558_v55  ;;  %v1864_v55 = vrot.slane %v1859_v23, %v635_v15  ;;  %v1872_v58 = vrot.slane %v1859_v23, %v643_v54 }
 0x2c8   :  { %3599 = vmatpush3.bf16.msra.mxu0 %v3598_v39 }
 0x2c9   :  { %3561 = vmatpush3.bf16.msra.mxu1 %v3560_v24  ;;  %3600 = vmatprep.subr.bf16.mxu0 %v3663_v34 }
 0x2ca   :  { %3563 = vmatprep.subr.bf16.mxu1 %v3562_v2 }
 0x2cc   :  { %3602 = vmatpush3.bf16.msra.mxu0 %v3601_v43 }
 0x2cd   :  { %3565 = vmatpush3.bf16.msra.mxu1 %v3564_v18  ;;  %3603 = vmatprep.subr.bf16.mxu0 %v3663_v34  ;;  %v1868_v34 = vrot.slane %v1859_v23, %v639_v16 }
 0x2ce   :  { %3567 = vmatprep.subr.bf16.mxu1 %v3566_v1 }
 0x2d0   :  { %3605 = vmatpush3.bf16.msra.mxu0 %v3604_v4 }
 0x2d1   :  { %3569 = vmatpush3.bf16.msra.mxu1 %v3568_v62  ;;  %v2380_v62 = vld [vmem:[%s6288_s6] ss:$0 sm:$0xff] }
 0x2d2   :  { %3571 = vmatprep.subr.bf16.mxu1 %v3570_v63 }
 0x2d5   :  { %3573 = vmatpush3.bf16.msra.mxu1 %v3572_v37 }
 0x2d6   :  { %3575 = vmatprep.subr.bf16.mxu1 %v3574_v8 }
 0x2d9   :  { %3577 = vmatpush3.bf16.msra.mxu1 %v3576_v17 }
 0x2da   :  { %3579 = vmatprep.subr.bf16.mxu1 %v3578_v44 }
 0x2dd   :  { %3581 = vmatpush3.bf16.msra.mxu1 %v3580_v12 }
 0x353   :  { %v2013_v49 = vpop.f32.mrb[16].mxu1 }
 0x354   :  { %v3610_v50 = vadd.f32 %v2013_v49, %v1864_v55  ;;  %v2015_v51 = vpop.f32.mrb[17].mxu1 }
 0x355   :  { %v3611_v59 = vadd.f32 %v2015_v51, %v1868_v34 }
 0x356   :  { %v2158_v2 = vmax.f32 %v3610_v50, 0.0 }
 0x357   :  { %v2159_v24 = vmax.f32 %v3611_v59, 0.0 }
 0x359   :  { %2280 = vmatprep.mubr.f32.mxu1 %v2159_v24 }
 0x35a   :  { %2281 = vmatmul.mubr.f32.vlgmr.msra.gmra.mrb[22].mxu1 %v2158_v2 }
 0x373   :  { %v2633_v30 = vpop.f32.mrb[18].mxu1 }
 0x374   :  { %v2634_v52 = vpop.f32.mrb[19].mxu1 }
 0x375   :  { %v2635_v57 = vadd.f32 %v2634_v52, %v2633_v30 }
 0x377   :  { %v2085_v18 = vadd.f32 %v2635_v57, %v1872_v58 }
 0x393   :  { %v2154_v1 = vpop.f32.mrb[20].mxu1 }
 0x394   :  { %v2155_v15 = vadd.f32 %v2154_v1, %v2085_v18  ;;  %v2758_v28 = vpop.f32.mrb[21].mxu1 }
 0x396   :  { %v2160_v60 = vmax.f32 %v2155_v15, 0.0 }
 0x398   :  { %2792 = vmatmul.mubr.f32.vlgmr.msra.gmra.mrb[2].mxu0 %v2160_v60 }
 0x42d   :  { %v2685_v16 = vpop.f32.mrb[22].mxu1 }
 0x42e   :  { %v2686_v53 = vpop.f32.mrb[23].mxu1 }
 0x42f   :  { %v2687_v61 = vadd.f32 %v2686_v53, %v2685_v16 }
 0x431   :  { %v2283_v63 = vadd.f32 %v2687_v61, %v2380_v62 }
 0x46b   :  { %v2352_v0 = vpop.f32.mrb[2].mxu0 }
 0x46c   :  { %v2353_v3 = vadd.f32 %v2352_v0, %v2283_v63  ;;  %v2793_v5 = vpop.f32.mrb[3].mxu0 }
 0x46e   :  { %v2381_v6 = vmul.f32 -1.442695, %v2353_v3 }
 0x470   :  { %3632 = vpow2.f32 %v2381_v6 }
 0x47a   :  { %v3633_v13 = vpop.eup %3632 }
 0x47b   :  { %v2359_v54 = vadd.f32 1.0, %v3633_v13 }
 0x47d   :  { %3634 = vrcp.f32 %v2359_v54 }
 0x487   :  { %v3635_v37 = vpop.eup %3634 }
 0x488   :  { %2362 = vst [vmem:[#allocation2] sm:$0x3] %v3635_v37 }
 0x489   :  { %3648 = shalt.err (!%p3645_p4)
}
 0x48a   :  { %s3649_s22 = scalar_lea.hbm %s6289_s7, 32 }
 0x48b   :  { %p3650_p5 = scmp.ne.s32.totalorder %s6289_s7, %s3649_s22  ;;  %p3653_p6 = scmp.lt.u32.totalorder %s3649_s22, %s6289_s7 }
 0x48d   :  { %p3655_p7 = pnand %p3653_p6, %p3650_p5 }
 0x48f   :  { %3658 = shalt.err (!%p3655_p7)
}
 0x490   :  { %2372 = dma.vmem_to_hbm [thread:$0]  %s2370_s20, 32, %s6289_s7, [#allocation3]  }
 0x491   :  { %3659 = dma.done.wait [#allocation3], 32  }
 0x492   :  { %3660 = vsyncadd [#allocation3], 4294967264 }
 0x493   :  { %2376 = vsyncpa [#allocation3], 1 }

</bundles_post_ra>
